<compile_context>
chip_gen: v7x
topology: tpu7x:2x2x1
jax: 0.10.0
libtpu: 0.0.40
codegen_flags: <defaults>
</compile_context>

<pallas_src>
import functools

import jax
import jax.numpy as jnp
from jax.experimental import pallas as pl
from jax.experimental.pallas import tpu as pltpu

_BN_EPS = 1e-5


def _vmem_limit_bytes():
    # 3/4 of physical VMEM: ~96 MiB on v5e/v6e (128 MiB), ~48 MiB on v7x (64 MiB).
    try:
        cap = pltpu.get_tpu_info().vmem_capacity_bytes
    except Exception:                      # unknown chip -> assume 64 MiB physical
        cap = 64 * 1024 * 1024
    return int(min(cap * 3 // 4, 96 * 1024 * 1024))


_VMEM_LIMIT = _vmem_limit_bytes()


# ---------------------------------------------------------------------------
# Kernel 1: implicit-GEMM 3x3 conv (pad=1, stride=1, bias=False)
#           + fused per-channel partial BN statistics
# ---------------------------------------------------------------------------
def _conv3x3_bn_stats_kernel(xp_ref, w_ref, y_ref, ps_ref, psq_ref):
    """One padded image per grid step.

    xp_ref : (1, H+2, W+2, Cin)  bf16  spatially padded input image
    w_ref  : (9, Cin, Cout)      bf16  weights, tap-major (kh*3 + kw)
    y_ref  : (H*W, Cout)         bf16  conv output rows for this image
    ps_ref : (1, 1, Cout)        f32   per-image column sums of y
    psq_ref: (1, 1, Cout)        f32   per-image column sums of y*y
    """
    _, hp, wp, cin = xp_ref.shape
    h, w = hp - 2, wp - 2
    cout = w_ref.shape[-1]

    x = xp_ref[0]                                   # (H+2, W+2, Cin) in VMEM
    acc = jnp.zeros((h * w, cout), jnp.float32)
    # 9 taps formed in VMEM by shifted slices — no im2col in HBM.
    for dh in range(3):
        for dw in range(3):
            tap = x[dh:dh + h, dw:dw + w, :].reshape(h * w, cin)
            acc = acc + jnp.dot(tap, w_ref[dh * 3 + dw],
                                preferred_element_type=jnp.float32)

    y_ref[...] = acc.astype(y_ref.dtype)            # bf16 writeback (half bytes)
    # Stats from the f32 accumulator; only one row written (no broadcast_to).
    ps_ref[...] = jnp.sum(acc, axis=0, keepdims=True).reshape(ps_ref.shape)
    psq_ref[...] = jnp.sum(acc * acc, axis=0,
                           keepdims=True).reshape(psq_ref.shape)


def conv3x3_with_stats(xp, w9):
    """xp: (N, H+2, W+2, Cin) bf16, w9: (9, Cin, Cout) bf16 ->
    (y (N*H*W, Cout) bf16, per-image column sums, per-image column sum-sqs)."""
    n, hp, wp, cin = xp.shape
    h, w = hp - 2, wp - 2
    cout = w9.shape[-1]
    m = n * h * w

    return pl.pallas_call(
        _conv3x3_bn_stats_kernel,
        out_shape=(
            jax.ShapeDtypeStruct((m, cout), jnp.bfloat16),
            jax.ShapeDtypeStruct((n, 1, cout), jnp.float32),
            jax.ShapeDtypeStruct((n, 1, cout), jnp.float32),
        ),
        grid_spec=pltpu.PrefetchScalarGridSpec(
            num_scalar_prefetch=0,
            grid=(n,),                               # fully parallel, no k axis
            in_specs=[
                # whole padded image per step (a few MiB at UNet scales)
                pl.BlockSpec((1, hp, wp, cin), lambda i: (i, 0, 0, 0)),
                # constant weight panel (block index never changes)
                pl.BlockSpec((9, cin, cout), lambda i: (0, 0, 0)),
            ],
            out_specs=[
                pl.BlockSpec((h * w, cout), lambda i: (i, 0)),
                pl.BlockSpec((1, 1, cout), lambda i: (i, 0, 0)),
                pl.BlockSpec((1, 1, cout), lambda i: (i, 0, 0)),
            ],
        ),
        compiler_params=pltpu.CompilerParams(
            dimension_semantics=("parallel",),
            vmem_limit_bytes=_VMEM_LIMIT,
        ),
    )(xp, w9)


# ---------------------------------------------------------------------------
# Kernel 2: fused per-channel scale/shift + ReLU (BatchNorm apply)
# ---------------------------------------------------------------------------
def _bn_relu_kernel(y_ref, scale_ref, shift_ref, o_ref):
    y = y_ref[...].astype(jnp.float32)
    # (1, C) scale/shift broadcast implicitly against the (tm, C) tile.
    o_ref[...] = jnp.maximum(y * scale_ref[...] + shift_ref[...],
                             0.0).astype(o_ref.dtype)


def bn_relu(y, scale_row, shift_row, out_dtype):
    m, c = y.shape
    in_b = jnp.dtype(y.dtype).itemsize
    out_b = jnp.dtype(out_dtype).itemsize
    tm = m                                           # fallback: single tile
    for cand in (2048, 1024, 512, 256, 128, 64, 32, 16, 8):
        if m % cand == 0 and cand * c * (in_b + out_b) <= (16 << 20):
            tm = cand
            break
    return pl.pallas_call(
        _bn_relu_kernel,
        out_shape=jax.ShapeDtypeStruct((m, c), out_dtype),
        grid_spec=pltpu.PrefetchScalarGridSpec(
            num_scalar_prefetch=0,
            grid=(m // tm,),
            in_specs=[
                pl.BlockSpec((tm, c), lambda i: (i, 0)),
                pl.BlockSpec((1, c), lambda i: (0, 0)),
                pl.BlockSpec((1, c), lambda i: (0, 0)),
            ],
            out_specs=pl.BlockSpec((tm, c), lambda i: (i, 0)),
        ),
        compiler_params=pltpu.CompilerParams(
            dimension_semantics=("parallel",),
            vmem_limit_bytes=_VMEM_LIMIT,
        ),
    )(y, scale_row, shift_row)


# ---------------------------------------------------------------------------
# Glue (channels-last internally, NCHW only at the module boundary)
# ---------------------------------------------------------------------------
def _bn_scale_shift(ps, psq, count, gamma, beta):
    """Combine per-image partial sums into BatchNorm scale/shift rows."""
    s = jnp.sum(ps[:, 0, :], axis=0)
    sq = jnp.sum(psq[:, 0, :], axis=0)
    mean = s / count
    var = jnp.maximum(sq / count - mean * mean, 0.0)     # biased batch variance
    scale = gamma * jax.lax.rsqrt(var + _BN_EPS)
    shift = beta - mean * scale
    return (scale.reshape(1, -1).astype(jnp.float32),
            shift.reshape(1, -1).astype(jnp.float32))


def _pad_hw(x_nhwc):
    return jnp.pad(x_nhwc, ((0, 0), (1, 1), (1, 1), (0, 0)))


def conv3x3_bn_relu(x_nhwc, prep, out_dtype):
    """Conv2d(3x3, s=1, p=1, bias=False) + BatchNorm2d(batch stats) + ReLU."""
    n, h, w, _ = x_nhwc.shape
    cout = prep["cout"]
    xp = _pad_hw(x_nhwc.astype(jnp.bfloat16))            # cheap spatial pad only
    y, ps, psq = conv3x3_with_stats(xp, prep["w9"])
    scale, shift = _bn_scale_shift(ps, psq, n * h * w,
                                   prep["gamma"], prep["beta"])
    out = bn_relu(y, scale, shift, out_dtype)
    return out.reshape(n, h, w, cout)


def double_conv(x_nchw, params):
    """Forward pass of PyTorch DoubleConv. x: [N, Cin, H, W] -> [N, Cout, H, W]."""
    x = jnp.transpose(x_nchw, (0, 2, 3, 1))              # NCHW -> NHWC (once)
    x = conv3x3_bn_relu(x, params["c1"], out_dtype=jnp.bfloat16)
    x = conv3x3_bn_relu(x, params["c2"], out_dtype=jnp.float32)
    return jnp.transpose(x, (0, 3, 1, 2))                # NHWC -> NCHW (once)


# ---------------------------------------------------------------------------
# Parameter construction (weights reshaped/cast once, not per call)
# ---------------------------------------------------------------------------
def prepare_conv_bn(w, gamma, beta):
    """w: [Cout, Cin, 3, 3] f32 -> tap-major bf16 [9, Cin, Cout] + BN params."""
    cout, cin, kh, kw = w.shape
    w9 = jnp.transpose(w, (2, 3, 1, 0)).reshape(kh * kw, cin, cout)
    return {"w9": w9.astype(jnp.bfloat16), "cout": cout,
            "gamma": gamma.astype(jnp.float32),
            "beta": beta.astype(jnp.float32)}


def init_double_conv(key, in_channels, out_channels):
    k1, k2 = jax.random.split(key)
    w1 = jax.random.normal(k1, (out_channels, in_channels, 3, 3),
                           jnp.float32) * 0.1
    w2 = jax.random.normal(k2, (out_channels, out_channels, 3, 3),
                           jnp.float32) * 0.1
    ones = jnp.ones((out_channels,), jnp.float32)
    zeros = jnp.zeros((out_channels,), jnp.float32)
    params = {"c1": prepare_conv_bn(w1, ones, zeros),
              "c2": prepare_conv_bn(w2, ones, zeros)}
    raw = {"w1": w1, "w2": w2}
    return params, raw


# ---------------------------------------------------------------------------
# Pure-JAX reference (mirrors the kernel's bf16 rounding points)
# ---------------------------------------------------------------------------
def _reference_double_conv(x_nchw, raw):
    def layer(x_nhwc, w, last):
        xb = x_nhwc.astype(jnp.bfloat16)
        w_hwio = jnp.transpose(w, (2, 3, 1, 0)).astype(jnp.bfloat16)
        y = jax.lax.conv_general_dilated(
            xb, w_hwio, (1, 1), "SAME",
            dimension_numbers=("NHWC", "HWIO", "NHWC"),
            preferred_element_type=jnp.float32)
        mean = jnp.mean(y, axis=(0, 1, 2))
        var = jnp.maximum(jnp.mean(jnp.square(y), axis=(0, 1, 2)) - mean * mean, 0.0)
        y = y.astype(jnp.bfloat16).astype(jnp.float32)   # kernel stores y in bf16
        out = jnp.maximum((y - mean) * jax.lax.rsqrt(var + _BN_EPS), 0.0)
        return out.astype(jnp.float32 if last else jnp.bfloat16)

    x = jnp.transpose(x_nchw, (0, 2, 3, 1))
    x = layer(x, raw["w1"], last=False)
    x = layer(x, raw["w2"], last=True)
    return jnp.transpose(x, (0, 3, 1, 2))


if __name__ == "__main__":
    key = jax.random.PRNGKey(0)
    k_param, k_input = jax.random.split(key)

    in_channels, out_channels = 4, 8
    params, raw = init_double_conv(k_param, in_channels, out_channels)

    x = jax.random.normal(k_input, (2, in_channels, 16, 16), jnp.float32)

    fwd = jax.jit(functools.partial(double_conv, params=params))
    out = fwd(x)
    jax.block_until_ready(out)

    assert out.shape == (2, out_channels, 16, 16), out.shape
    assert bool(jnp.all(jnp.isfinite(out)))

    ref = _reference_double_conv(x, raw)
    max_err = float(jnp.max(jnp.abs(out - ref)))
    assert max_err < 5e-2, f"max abs error vs reference: {max_err}"
    print("KERNEL_OK")
</pallas_src>

<mosaic_0001>
module attributes {stable_mosaic.version = 11 : i64} {
  func.func @_conv3x3_bn_stats_kernel(%arg0: i32, %arg1: memref<1x18x18x4xbf16, #tpu.memory_space<vmem>>, %arg2: memref<9x4x8xbf16, #tpu.memory_space<vmem>>, %arg3: memref<256x8xbf16, #tpu.memory_space<vmem>>, %arg4: memref<1x1x8xf32, #tpu.memory_space<vmem>>, %arg5: memref<1x1x8xf32, #tpu.memory_space<vmem>>) attributes {dimension_semantics = [#tpu.dimension_semantics<parallel>], iteration_bounds = array<i64: 2>, scalar_prefetch = 0 : i64, scratch_operands = 0 : i64, tpu.core_type = #tpu.core_type<tc>, window_params = [{transform_indices = @transform_0, window_bounds = array<i64: 1, 18, 18, 4>}, {pipeline_mode = #tpu.pipeline_mode<synchronous>, transform_indices = @transform_1, window_bounds = array<i64: 9, 4, 8>}, {transform_indices = @transform_2, window_bounds = array<i64: 256, 8>}, {transform_indices = @transform_3, window_bounds = array<i64: 1, 1, 8>}, {transform_indices = @transform_4, window_bounds = array<i64: 1, 1, 8>}]} {
    %c0 = arith.constant 0 : index
    %c0_0 = arith.constant 0 : index
    %c0_1 = arith.constant 0 : index
    %c0_2 = arith.constant 0 : index
    %0 = vector.load %arg1[%c0, %c0_0, %c0_1, %c0_2] : memref<1x18x18x4xbf16, #tpu.memory_space<vmem>>, vector<1x18x18x4xbf16>
    %1 = vector.shape_cast %0 : vector<1x18x18x4xbf16> to vector<18x18x4xbf16>
    %cst = arith.constant 0.000000e+00 : f32
    %2 = vector.broadcast %cst : f32 to vector<256x8xf32>
    %3 = vector.extract_strided_slice %1 {offsets = [0, 0, 0], sizes = [16, 16, 4], strides = [1, 1, 1]} : vector<18x18x4xbf16> to vector<16x16x4xbf16>
    %4 = vector.shape_cast %3 : vector<16x16x4xbf16> to vector<256x4xbf16>
    %c0_3 = arith.constant 0 : index
    %c0_4 = arith.constant 0 : index
    %c0_5 = arith.constant 0 : index
    %5 = vector.load %arg2[%c0_3, %c0_4, %c0_5] : memref<9x4x8xbf16, #tpu.memory_space<vmem>>, vector<1x4x8xbf16>
    %6 = vector.shape_cast %5 : vector<1x4x8xbf16> to vector<4x8xbf16>
    %cst_6 = arith.constant dense<0.000000e+00> : vector<256x8xf32>
    %7 = tpu.matmul %4, %6, %cst_6 {dimension_numbers = #tpu.dot_dimension_numbers<[1], [0], [0], [1], [0, 0, 1, 1], [], []>} : vector<256x4xbf16>, vector<4x8xbf16>, vector<256x8xf32> -> vector<256x8xf32>
    %8 = arith.addf %2, %7 : vector<256x8xf32>
    %9 = vector.extract_strided_slice %1 {offsets = [0, 1, 0], sizes = [16, 16, 4], strides = [1, 1, 1]} : vector<18x18x4xbf16> to vector<16x16x4xbf16>
    %10 = vector.shape_cast %9 : vector<16x16x4xbf16> to vector<256x4xbf16>
    %c1 = arith.constant 1 : index
    %c0_7 = arith.constant 0 : index
    %c0_8 = arith.constant 0 : index
    %11 = vector.load %arg2[%c1, %c0_7, %c0_8] : memref<9x4x8xbf16, #tpu.memory_space<vmem>>, vector<1x4x8xbf16>
    %12 = vector.shape_cast %11 : vector<1x4x8xbf16> to vector<4x8xbf16>
    %cst_9 = arith.constant dense<0.000000e+00> : vector<256x8xf32>
    %13 = tpu.matmul %10, %12, %cst_9 {dimension_numbers = #tpu.dot_dimension_numbers<[1], [0], [0], [1], [0, 0, 1, 1], [], []>} : vector<256x4xbf16>, vector<4x8xbf16>, vector<256x8xf32> -> vector<256x8xf32>
    %14 = arith.addf %8, %13 : vector<256x8xf32>
    %15 = vector.extract_strided_slice %1 {offsets = [0, 2, 0], sizes = [16, 16, 4], strides = [1, 1, 1]} : vector<18x18x4xbf16> to vector<16x16x4xbf16>
    %16 = vector.shape_cast %15 : vector<16x16x4xbf16> to vector<256x4xbf16>
    %c2 = arith.constant 2 : index
    %c0_10 = arith.constant 0 : index
    %c0_11 = arith.constant 0 : index
    %17 = vector.load %arg2[%c2, %c0_10, %c0_11] : memref<9x4x8xbf16, #tpu.memory_space<vmem>>, vector<1x4x8xbf16>
    %18 = vector.shape_cast %17 : vector<1x4x8xbf16> to vector<4x8xbf16>
    %cst_12 = arith.constant dense<0.000000e+00> : vector<256x8xf32>
    %19 = tpu.matmul %16, %18, %cst_12 {dimension_numbers = #tpu.dot_dimension_numbers<[1], [0], [0], [1], [0, 0, 1, 1], [], []>} : vector<256x4xbf16>, vector<4x8xbf16>, vector<256x8xf32> -> vector<256x8xf32>
    %20 = arith.addf %14, %19 : vector<256x8xf32>
    %21 = vector.extract_strided_slice %1 {offsets = [1, 0, 0], sizes = [16, 16, 4], strides = [1, 1, 1]} : vector<18x18x4xbf16> to vector<16x16x4xbf16>
    %22 = vector.shape_cast %21 : vector<16x16x4xbf16> to vector<256x4xbf16>
    %c3 = arith.constant 3 : index
    %c0_13 = arith.constant 0 : index
    %c0_14 = arith.constant 0 : index
    %23 = vector.load %arg2[%c3, %c0_13, %c0_14] : memref<9x4x8xbf16, #tpu.memory_space<vmem>>, vector<1x4x8xbf16>
    %24 = vector.shape_cast %23 : vector<1x4x8xbf16> to vector<4x8xbf16>
    %cst_15 = arith.constant dense<0.000000e+00> : vector<256x8xf32>
    %25 = tpu.matmul %22, %24, %cst_15 {dimension_numbers = #tpu.dot_dimension_numbers<[1], [0], [0], [1], [0, 0, 1, 1], [], []>} : vector<256x4xbf16>, vector<4x8xbf16>, vector<256x8xf32> -> vector<256x8xf32>
    %26 = arith.addf %20, %25 : vector<256x8xf32>
    %27 = vector.extract_strided_slice %1 {offsets = [1, 1, 0], sizes = [16, 16, 4], strides = [1, 1, 1]} : vector<18x18x4xbf16> to vector<16x16x4xbf16>
    %28 = vector.shape_cast %27 : vector<16x16x4xbf16> to vector<256x4xbf16>
    %c4 = arith.constant 4 : index
    %c0_16 = arith.constant 0 : index
    %c0_17 = arith.constant 0 : index
    %29 = vector.load %arg2[%c4, %c0_16, %c0_17] : memref<9x4x8xbf16, #tpu.memory_space<vmem>>, vector<1x4x8xbf16>
    %30 = vector.shape_cast %29 : vector<1x4x8xbf16> to vector<4x8xbf16>
    %cst_18 = arith.constant dense<0.000000e+00> : vector<256x8xf32>
    %31 = tpu.matmul %28, %30, %cst_18 {dimension_numbers = #tpu.dot_dimension_numbers<[1], [0], [0], [1], [0, 0, 1, 1], [], []>} : vector<256x4xbf16>, vector<4x8xbf16>, vector<256x8xf32> -> vector<256x8xf32>
    %32 = arith.addf %26, %31 : vector<256x8xf32>
    %33 = vector.extract_strided_slice %1 {offsets = [1, 2, 0], sizes = [16, 16, 4], strides = [1, 1, 1]} : vector<18x18x4xbf16> to vector<16x16x4xbf16>
    %34 = vector.shape_cast %33 : vector<16x16x4xbf16> to vector<256x4xbf16>
    %c5 = arith.constant 5 : index
    %c0_19 = arith.constant 0 : index
    %c0_20 = arith.constant 0 : index
    %35 = vector.load %arg2[%c5, %c0_19, %c0_20] : memref<9x4x8xbf16, #tpu.memory_space<vmem>>, vector<1x4x8xbf16>
    %36 = vector.shape_cast %35 : vector<1x4x8xbf16> to vector<4x8xbf16>
    %cst_21 = arith.constant dense<0.000000e+00> : vector<256x8xf32>
    %37 = tpu.matmul %34, %36, %cst_21 {dimension_numbers = #tpu.dot_dimension_numbers<[1], [0], [0], [1], [0, 0, 1, 1], [], []>} : vector<256x4xbf16>, vector<4x8xbf16>, vector<256x8xf32> -> vector<256x8xf32>
    %38 = arith.addf %32, %37 : vector<256x8xf32>
    %39 = vector.extract_strided_slice %1 {offsets = [2, 0, 0], sizes = [16, 16, 4], strides = [1, 1, 1]} : vector<18x18x4xbf16> to vector<16x16x4xbf16>
    %40 = vector.shape_cast %39 : vector<16x16x4xbf16> to vector<256x4xbf16>
    %c6 = arith.constant 6 : index
    %c0_22 = arith.constant 0 : index
    %c0_23 = arith.constant 0 : index
    %41 = vector.load %arg2[%c6, %c0_22, %c0_23] : memref<9x4x8xbf16, #tpu.memory_space<vmem>>, vector<1x4x8xbf16>
    %42 = vector.shape_cast %41 : vector<1x4x8xbf16> to vector<4x8xbf16>
    %cst_24 = arith.constant dense<0.000000e+00> : vector<256x8xf32>
    %43 = tpu.matmul %40, %42, %cst_24 {dimension_numbers = #tpu.dot_dimension_numbers<[1], [0], [0], [1], [0, 0, 1, 1], [], []>} : vector<256x4xbf16>, vector<4x8xbf16>, vector<256x8xf32> -> vector<256x8xf32>
    %44 = arith.addf %38, %43 : vector<256x8xf32>
    %45 = vector.extract_strided_slice %1 {offsets = [2, 1, 0], sizes = [16, 16, 4], strides = [1, 1, 1]} : vector<18x18x4xbf16> to vector<16x16x4xbf16>
    %46 = vector.shape_cast %45 : vector<16x16x4xbf16> to vector<256x4xbf16>
    %c7 = arith.constant 7 : index
    %c0_25 = arith.constant 0 : index
    %c0_26 = arith.constant 0 : index
    %47 = vector.load %arg2[%c7, %c0_25, %c0_26] : memref<9x4x8xbf16, #tpu.memory_space<vmem>>, vector<1x4x8xbf16>
    %48 = vector.shape_cast %47 : vector<1x4x8xbf16> to vector<4x8xbf16>
    %cst_27 = arith.constant dense<0.000000e+00> : vector<256x8xf32>
    %49 = tpu.matmul %46, %48, %cst_27 {dimension_numbers = #tpu.dot_dimension_numbers<[1], [0], [0], [1], [0, 0, 1, 1], [], []>} : vector<256x4xbf16>, vector<4x8xbf16>, vector<256x8xf32> -> vector<256x8xf32>
    %50 = arith.addf %44, %49 : vector<256x8xf32>
    %51 = vector.extract_strided_slice %1 {offsets = [2, 2, 0], sizes = [16, 16, 4], strides = [1, 1, 1]} : vector<18x18x4xbf16> to vector<16x16x4xbf16>
    %52 = vector.shape_cast %51 : vector<16x16x4xbf16> to vector<256x4xbf16>
    %c8 = arith.constant 8 : index
    %c0_28 = arith.constant 0 : index
    %c0_29 = arith.constant 0 : index
    %53 = vector.load %arg2[%c8, %c0_28, %c0_29] : memref<9x4x8xbf16, #tpu.memory_space<vmem>>, vector<1x4x8xbf16>
    %54 = vector.shape_cast %53 : vector<1x4x8xbf16> to vector<4x8xbf16>
    %cst_30 = arith.constant dense<0.000000e+00> : vector<256x8xf32>
    %55 = tpu.matmul %52, %54, %cst_30 {dimension_numbers = #tpu.dot_dimension_numbers<[1], [0], [0], [1], [0, 0, 1, 1], [], []>} : vector<256x4xbf16>, vector<4x8xbf16>, vector<256x8xf32> -> vector<256x8xf32>
    %56 = arith.addf %50, %55 : vector<256x8xf32>
    %57 = arith.truncf %56 : vector<256x8xf32> to vector<256x8xbf16>
    %c0_31 = arith.constant 0 : index
    %c0_32 = arith.constant 0 : index
    %58 = vector.load %arg3[%c0_31, %c0_32] : memref<256x8xbf16, #tpu.memory_space<vmem>>, vector<256x8xbf16>
    tpu.vector_store %arg3[%c0_31, %c0_32], %57 {strides = array<i32>} : memref<256x8xbf16, #tpu.memory_space<vmem>>, vector<256x8xbf16>,
    %cst_33 = arith.constant dense<0.000000e+00> : vector<8xf32>
    %59 = vector.multi_reduction <add>, %56, %cst_33 [0] : vector<256x8xf32> to vector<8xf32>
    %60 = vector.shape_cast %59 : vector<8xf32> to vector<1x8xf32>
    %61 = vector.shape_cast %60 : vector<1x8xf32> to vector<1x1x8xf32>
    %c0_34 = arith.constant 0 : index
    %c0_35 = arith.constant 0 : index
    %c0_36 = arith.constant 0 : index
    %62 = vector.load %arg4[%c0_34, %c0_35, %c0_36] : memref<1x1x8xf32, #tpu.memory_space<vmem>>, vector<1x1x8xf32>
    tpu.vector_store %arg4[%c0_34, %c0_35, %c0_36], %61 {strides = array<i32>} : memref<1x1x8xf32, #tpu.memory_space<vmem>>, vector<1x1x8xf32>,
    %63 = arith.mulf %56, %56 : vector<256x8xf32>
    %cst_37 = arith.constant dense<0.000000e+00> : vector<8xf32>
    %64 = vector.multi_reduction <add>, %63, %cst_37 [0] : vector<256x8xf32> to vector<8xf32>
    %65 = vector.shape_cast %64 : vector<8xf32> to vector<1x8xf32>
    %66 = vector.shape_cast %65 : vector<1x8xf32> to vector<1x1x8xf32>
    %c0_38 = arith.constant 0 : index
    %c0_39 = arith.constant 0 : index
    %c0_40 = arith.constant 0 : index
    %67 = vector.load %arg5[%c0_38, %c0_39, %c0_40] : memref<1x1x8xf32, #tpu.memory_space<vmem>>, vector<1x1x8xf32>
    tpu.vector_store %arg5[%c0_38, %c0_39, %c0_40], %66 {strides = array<i32>} : memref<1x1x8xf32, #tpu.memory_space<vmem>>, vector<1x1x8xf32>,
    return
  }
  func.func @transform_0(%arg0: i32) -> (i32, i32, i32, i32) {
    %c0_i32 = arith.constant 0 : i32
    %c0_i32_0 = arith.constant 0 : i32
    %c0_i32_1 = arith.constant 0 : i32
    %c0_i32_2 = arith.constant 0 : i32
    return %arg0, %c0_i32, %c0_i32_0, %c0_i32_1 : i32, i32, i32, i32
  }
  func.func @transform_1(%arg0: i32) -> (i32, i32, i32) {
    %c0_i32 = arith.constant 0 : i32
    %c0_i32_0 = arith.constant 0 : i32
    %c0_i32_1 = arith.constant 0 : i32
    %c0_i32_2 = arith.constant 0 : i32
    return %c0_i32, %c0_i32_0, %c0_i32_1 : i32, i32, i32
  }
  func.func @transform_2(%arg0: i32) -> (i32, i32) {
    %c0_i32 = arith.constant 0 : i32
    %c0_i32_0 = arith.constant 0 : i32
    return %arg0, %c0_i32 : i32, i32
  }
  func.func @transform_3(%arg0: i32) -> (i32, i32, i32) {
    %c0_i32 = arith.constant 0 : i32
    %c0_i32_0 = arith.constant 0 : i32
    %c0_i32_1 = arith.constant 0 : i32
    return %arg0, %c0_i32, %c0_i32_0 : i32, i32, i32
  }
  func.func @transform_4(%arg0: i32) -> (i32, i32, i32) {
    %c0_i32 = arith.constant 0 : i32
    %c0_i32_0 = arith.constant 0 : i32
    %c0_i32_1 = arith.constant 0 : i32
    return %arg0, %c0_i32, %c0_i32_0 : i32, i32, i32
  }
}

module attributes {stable_mosaic.version = 11 : i64} {
  func.func @_bn_relu_kernel(%arg0: i32, %arg1: memref<512x8xbf16, #tpu.memory_space<vmem>>, %arg2: memref<1x8xf32, #tpu.memory_space<vmem>>, %arg3: memref<1x8xf32, #tpu.memory_space<vmem>>, %arg4: memref<512x8xbf16, #tpu.memory_space<vmem>>) attributes {dimension_semantics = [#tpu.dimension_semantics<parallel>], iteration_bounds = array<i64: 1>, scalar_prefetch = 0 : i64, scratch_operands = 0 : i64, tpu.core_type = #tpu.core_type<tc>, window_params = [{transform_indices = @transform_0, window_bounds = array<i64: 512, 8>}, {pipeline_mode = #tpu.pipeline_mode<synchronous>, transform_indices = @transform_1, window_bounds = array<i64: 1, 8>}, {pipeline_mode = #tpu.pipeline_mode<synchronous>, transform_indices = @transform_2, window_bounds = array<i64: 1, 8>}, {transform_indices = @transform_3, window_bounds = array<i64: 512, 8>}]} {
    %c0 = arith.constant 0 : index
    %c0_0 = arith.constant 0 : index
    %0 = vector.load %arg1[%c0, %c0_0] : memref<512x8xbf16, #tpu.memory_space<vmem>>, vector<512x8xbf16>
    %1 = arith.extf %0 : vector<512x8xbf16> to vector<512x8xf32>
    %c0_1 = arith.constant 0 : index
    %c0_2 = arith.constant 0 : index
    %2 = vector.load %arg2[%c0_1, %c0_2] : memref<1x8xf32, #tpu.memory_space<vmem>>, vector<1x8xf32>
    %3 = vector.broadcast %2 : vector<1x8xf32> to vector<512x8xf32>
    %4 = arith.mulf %1, %3 : vector<512x8xf32>
    %c0_3 = arith.constant 0 : index
    %c0_4 = arith.constant 0 : index
    %5 = vector.load %arg3[%c0_3, %c0_4] : memref<1x8xf32, #tpu.memory_space<vmem>>, vector<1x8xf32>
    %6 = vector.broadcast %5 : vector<1x8xf32> to vector<512x8xf32>
    %7 = arith.addf %4, %6 : vector<512x8xf32>
    %cst = arith.constant 0.000000e+00 : f32
    %8 = vector.broadcast %cst : f32 to vector<512x8xf32>
    %9 = arith.maximumf %7, %8 : vector<512x8xf32>
    %10 = arith.truncf %9 : vector<512x8xf32> to vector<512x8xbf16>
    %c0_5 = arith.constant 0 : index
    %c0_6 = arith.constant 0 : index
    %11 = vector.load %arg4[%c0_5, %c0_6] : memref<512x8xbf16, #tpu.memory_space<vmem>>, vector<512x8xbf16>
    tpu.vector_store %arg4[%c0_5, %c0_6], %10 {strides = array<i32>} : memref<512x8xbf16, #tpu.memory_space<vmem>>, vector<512x8xbf16>,
    return
  }
  func.func @transform_0(%arg0: i32) -> (i32, i32) {
    %c0_i32 = arith.constant 0 : i32
    %c0_i32_0 = arith.constant 0 : i32
    return %arg0, %c0_i32 : i32, i32
  }
  func.func @transform_1(%arg0: i32) -> (i32, i32) {
    %c0_i32 = arith.constant 0 : i32
    %c0_i32_0 = arith.constant 0 : i32
    %c0_i32_1 = arith.constant 0 : i32
    return %c0_i32, %c0_i32_0 : i32, i32
  }
  func.func @transform_2(%arg0: i32) -> (i32, i32) {
    %c0_i32 = arith.constant 0 : i32
    %c0_i32_0 = arith.constant 0 : i32
    %c0_i32_1 = arith.constant 0 : i32
    return %c0_i32, %c0_i32_0 : i32, i32
  }
  func.func @transform_3(%arg0: i32) -> (i32, i32) {
    %c0_i32 = arith.constant 0 : i32
    %c0_i32_0 = arith.constant 0 : i32
    return %arg0, %c0_i32 : i32, i32
  }
}

module attributes {stable_mosaic.version = 11 : i64} {
  func.func @_conv3x3_bn_stats_kernel(%arg0: i32, %arg1: memref<1x18x18x8xbf16, #tpu.memory_space<vmem>>, %arg2: memref<9x8x8xbf16, #tpu.memory_space<vmem>>, %arg3: memref<256x8xbf16, #tpu.memory_space<vmem>>, %arg4: memref<1x1x8xf32, #tpu.memory_space<vmem>>, %arg5: memref<1x1x8xf32, #tpu.memory_space<vmem>>) attributes {dimension_semantics = [#tpu.dimension_semantics<parallel>], iteration_bounds = array<i64: 2>, scalar_prefetch = 0 : i64, scratch_operands = 0 : i64, tpu.core_type = #tpu.core_type<tc>, window_params = [{transform_indices = @transform_0, window_bounds = array<i64: 1, 18, 18, 8>}, {pipeline_mode = #tpu.pipeline_mode<synchronous>, transform_indices = @transform_1, window_bounds = array<i64: 9, 8, 8>}, {transform_indices = @transform_2, window_bounds = array<i64: 256, 8>}, {transform_indices = @transform_3, window_bounds = array<i64: 1, 1, 8>}, {transform_indices = @transform_4, window_bounds = array<i64: 1, 1, 8>}]} {
    %c0 = arith.constant 0 : index
    %c0_0 = arith.constant 0 : index
    %c0_1 = arith.constant 0 : index
    %c0_2 = arith.constant 0 : index
    %0 = vector.load %arg1[%c0, %c0_0, %c0_1, %c0_2] : memref<1x18x18x8xbf16, #tpu.memory_space<vmem>>, vector<1x18x18x8xbf16>
    %1 = vector.shape_cast %0 : vector<1x18x18x8xbf16> to vector<18x18x8xbf16>
    %cst = arith.constant 0.000000e+00 : f32
    %2 = vector.broadcast %cst : f32 to vector<256x8xf32>
    %3 = vector.extract_strided_slice %1 {offsets = [0, 0, 0], sizes = [16, 16, 8], strides = [1, 1, 1]} : vector<18x18x8xbf16> to vector<16x16x8xbf16>
    %4 = vector.shape_cast %3 : vector<16x16x8xbf16> to vector<256x8xbf16>
    %c0_3 = arith.constant 0 : index
    %c0_4 = arith.constant 0 : index
    %c0_5 = arith.constant 0 : index
    %5 = vector.load %arg2[%c0_3, %c0_4, %c0_5] : memref<9x8x8xbf16, #tpu.memory_space<vmem>>, vector<1x8x8xbf16>
    %6 = vector.shape_cast %5 : vector<1x8x8xbf16> to vector<8x8xbf16>
    %cst_6 = arith.constant dense<0.000000e+00> : vector<256x8xf32>
    %7 = tpu.matmul %4, %6, %cst_6 {dimension_numbers = #tpu.dot_dimension_numbers<[1], [0], [0], [1], [0, 0, 1, 1], [], []>} : vector<256x8xbf16>, vector<8x8xbf16>, vector<256x8xf32> -> vector<256x8xf32>
    %8 = arith.addf %2, %7 : vector<256x8xf32>
    %9 = vector.extract_strided_slice %1 {offsets = [0, 1, 0], sizes = [16, 16, 8], strides = [1, 1, 1]} : vector<18x18x8xbf16> to vector<16x16x8xbf16>
    %10 = vector.shape_cast %9 : vector<16x16x8xbf16> to vector<256x8xbf16>
    %c1 = arith.constant 1 : index
    %c0_7 = arith.constant 0 : index
    %c0_8 = arith.constant 0 : index
    %11 = vector.load %arg2[%c1, %c0_7, %c0_8] : memref<9x8x8xbf16, #tpu.memory_space<vmem>>, vector<1x8x8xbf16>
    %12 = vector.shape_cast %11 : vector<1x8x8xbf16> to vector<8x8xbf16>
    %cst_9 = arith.constant dense<0.000000e+00> : vector<256x8xf32>
    %13 = tpu.matmul %10, %12, %cst_9 {dimension_numbers = #tpu.dot_dimension_numbers<[1], [0], [0], [1], [0, 0, 1, 1], [], []>} : vector<256x8xbf16>, vector<8x8xbf16>, vector<256x8xf32> -> vector<256x8xf32>
    %14 = arith.addf %8, %13 : vector<256x8xf32>
    %15 = vector.extract_strided_slice %1 {offsets = [0, 2, 0], sizes = [16, 16, 8], strides = [1, 1, 1]} : vector<18x18x8xbf16> to vector<16x16x8xbf16>
    %16 = vector.shape_cast %15 : vector<16x16x8xbf16> to vector<256x8xbf16>
    %c2 = arith.constant 2 : index
    %c0_10 = arith.constant 0 : index
    %c0_11 = arith.constant 0 : index
    %17 = vector.load %arg2[%c2, %c0_10, %c0_11] : memref<9x8x8xbf16, #tpu.memory_space<vmem>>, vector<1x8x8xbf16>
    %18 = vector.shape_cast %17 : vector<1x8x8xbf16> to vector<8x8xbf16>
    %cst_12 = arith.constant dense<0.000000e+00> : vector<256x8xf32>
    %19 = tpu.matmul %16, %18, %cst_12 {dimension_numbers = #tpu.dot_dimension_numbers<[1], [0], [0], [1], [0, 0, 1, 1], [], []>} : vector<256x8xbf16>, vector<8x8xbf16>, vector<256x8xf32> -> vector<256x8xf32>
    %20 = arith.addf %14, %19 : vector<256x8xf32>
    %21 = vector.extract_strided_slice %1 {offsets = [1, 0, 0], sizes = [16, 16, 8], strides = [1, 1, 1]} : vector<18x18x8xbf16> to vector<16x16x8xbf16>
    %22 = vector.shape_cast %21 : vector<16x16x8xbf16> to vector<256x8xbf16>
    %c3 = arith.constant 3 : index
    %c0_13 = arith.constant 0 : index
    %c0_14 = arith.constant 0 : index
    %23 = vector.load %arg2[%c3, %c0_13, %c0_14] : memref<9x8x8xbf16, #tpu.memory_space<vmem>>, vector<1x8x8xbf16>
    %24 = vector.shape_cast %23 : vector<1x8x8xbf16> to vector<8x8xbf16>
    %cst_15 = arith.constant dense<0.000000e+00> : vector<256x8xf32>
    %25 = tpu.matmul %22, %24, %cst_15 {dimension_numbers = #tpu.dot_dimension_numbers<[1], [0], [0], [1], [0, 0, 1, 1], [], []>} : vector<256x8xbf16>, vector<8x8xbf16>, vector<256x8xf32> -> vector<256x8xf32>
    %26 = arith.addf %20, %25 : vector<256x8xf32>
    %27 = vector.extract_strided_slice %1 {offsets = [1, 1, 0], sizes = [16, 16, 8], strides = [1, 1, 1]} : vector<18x18x8xbf16> to vector<16x16x8xbf16>
    %28 = vector.shape_cast %27 : vector<16x16x8xbf16> to vector<256x8xbf16>
    %c4 = arith.constant 4 : index
    %c0_16 = arith.constant 0 : index
    %c0_17 = arith.constant 0 : index
    %29 = vector.load %arg2[%c4, %c0_16, %c0_17] : memref<9x8x8xbf16, #tpu.memory_space<vmem>>, vector<1x8x8xbf16>
    %30 = vector.shape_cast %29 : vector<1x8x8xbf16> to vector<8x8xbf16>
    %cst_18 = arith.constant dense<0.000000e+00> : vector<256x8xf32>
    %31 = tpu.matmul %28, %30, %cst_18 {dimension_numbers = #tpu.dot_dimension_numbers<[1], [0], [0], [1], [0, 0, 1, 1], [], []>} : vector<256x8xbf16>, vector<8x8xbf16>, vector<256x8xf32> -> vector<256x8xf32>
    %32 = arith.addf %26, %31 : vector<256x8xf32>
    %33 = vector.extract_strided_slice %1 {offsets = [1, 2, 0], sizes = [16, 16, 8], strides = [1, 1, 1]} : vector<18x18x8xbf16> to vector<16x16x8xbf16>
    %34 = vector.shape_cast %33 : vector<16x16x8xbf16> to vector<256x8xbf16>
    %c5 = arith.constant 5 : index
    %c0_19 = arith.constant 0 : index
    %c0_20 = arith.constant 0 : index
    %35 = vector.load %arg2[%c5, %c0_19, %c0_20] : memref<9x8x8xbf16, #tpu.memory_space<vmem>>, vector<1x8x8xbf16>
    %36 = vector.shape_cast %35 : vector<1x8x8xbf16> to vector<8x8xbf16>
    %cst_21 = arith.constant dense<0.000000e+00> : vector<256x8xf32>
    %37 = tpu.matmul %34, %36, %cst_21 {dimension_numbers = #tpu.dot_dimension_numbers<[1], [0], [0], [1], [0, 0, 1, 1], [], []>} : vector<256x8xbf16>, vector<8x8xbf16>, vector<256x8xf32> -> vector<256x8xf32>
    %38 = arith.addf %32, %37 : vector<256x8xf32>
    %39 = vector.extract_strided_slice %1 {offsets = [2, 0, 0], sizes = [16, 16, 8], strides = [1, 1, 1]} : vector<18x18x8xbf16> to vector<16x16x8xbf16>
    %40 = vector.shape_cast %39 : vector<16x16x8xbf16> to vector<256x8xbf16>
    %c6 = arith.constant 6 : index
    %c0_22 = arith.constant 0 : index
    %c0_23 = arith.constant 0 : index
    %41 = vector.load %arg2[%c6, %c0_22, %c0_23] : memref<9x8x8xbf16, #tpu.memory_space<vmem>>, vector<1x8x8xbf16>
    %42 = vector.shape_cast %41 : vector<1x8x8xbf16> to vector<8x8xbf16>
    %cst_24 = arith.constant dense<0.000000e+00> : vector<256x8xf32>
    %43 = tpu.matmul %40, %42, %cst_24 {dimension_numbers = #tpu.dot_dimension_numbers<[1], [0], [0], [1], [0, 0, 1, 1], [], []>} : vector<256x8xbf16>, vector<8x8xbf16>, vector<256x8xf32> -> vector<256x8xf32>
    %44 = arith.addf %38, %43 : vector<256x8xf32>
    %45 = vector.extract_strided_slice %1 {offsets = [2, 1, 0], sizes = [16, 16, 8], strides = [1, 1, 1]} : vector<18x18x8xbf16> to vector<16x16x8xbf16>
    %46 = vector.shape_cast %45 : vector<16x16x8xbf16> to vector<256x8xbf16>
    %c7 = arith.constant 7 : index
    %c0_25 = arith.constant 0 : index
    %c0_26 = arith.constant 0 : index
    %47 = vector.load %arg2[%c7, %c0_25, %c0_26] : memref<9x8x8xbf16, #tpu.memory_space<vmem>>, vector<1x8x8xbf16>
    %48 = vector.shape_cast %47 : vector<1x8x8xbf16> to vector<8x8xbf16>
    %cst_27 = arith.constant dense<0.000000e+00> : vector<256x8xf32>
    %49 = tpu.matmul %46, %48, %cst_27 {dimension_numbers = #tpu.dot_dimension_numbers<[1], [0], [0], [1], [0, 0, 1, 1], [], []>} : vector<256x8xbf16>, vector<8x8xbf16>, vector<256x8xf32> -> vector<256x8xf32>
    %50 = arith.addf %44, %49 : vector<256x8xf32>
    %51 = vector.extract_strided_slice %1 {offsets = [2, 2, 0], sizes = [16, 16, 8], strides = [1, 1, 1]} : vector<18x18x8xbf16> to vector<16x16x8xbf16>
    %52 = vector.shape_cast %51 : vector<16x16x8xbf16> to vector<256x8xbf16>
    %c8 = arith.constant 8 : index
    %c0_28 = arith.constant 0 : index
    %c0_29 = arith.constant 0 : index
    %53 = vector.load %arg2[%c8, %c0_28, %c0_29] : memref<9x8x8xbf16, #tpu.memory_space<vmem>>, vector<1x8x8xbf16>
    %54 = vector.shape_cast %53 : vector<1x8x8xbf16> to vector<8x8xbf16>
    %cst_30 = arith.constant dense<0.000000e+00> : vector<256x8xf32>
    %55 = tpu.matmul %52, %54, %cst_30 {dimension_numbers = #tpu.dot_dimension_numbers<[1], [0], [0], [1], [0, 0, 1, 1], [], []>} : vector<256x8xbf16>, vector<8x8xbf16>, vector<256x8xf32> -> vector<256x8xf32>
    %56 = arith.addf %50, %55 : vector<256x8xf32>
    %57 = arith.truncf %56 : vector<256x8xf32> to vector<256x8xbf16>
    %c0_31 = arith.constant 0 : index
    %c0_32 = arith.constant 0 : index
    %58 = vector.load %arg3[%c0_31, %c0_32] : memref<256x8xbf16, #tpu.memory_space<vmem>>, vector<256x8xbf16>
    tpu.vector_store %arg3[%c0_31, %c0_32], %57 {strides = array<i32>} : memref<256x8xbf16, #tpu.memory_space<vmem>>, vector<256x8xbf16>,
    %cst_33 = arith.constant dense<0.000000e+00> : vector<8xf32>
    %59 = vector.multi_reduction <add>, %56, %cst_33 [0] : vector<256x8xf32> to vector<8xf32>
    %60 = vector.shape_cast %59 : vector<8xf32> to vector<1x8xf32>
    %61 = vector.shape_cast %60 : vector<1x8xf32> to vector<1x1x8xf32>
    %c0_34 = arith.constant 0 : index
    %c0_35 = arith.constant 0 : index
    %c0_36 = arith.constant 0 : index
    %62 = vector.load %arg4[%c0_34, %c0_35, %c0_36] : memref<1x1x8xf32, #tpu.memory_space<vmem>>, vector<1x1x8xf32>
    tpu.vector_store %arg4[%c0_34, %c0_35, %c0_36], %61 {strides = array<i32>} : memref<1x1x8xf32, #tpu.memory_space<vmem>>, vector<1x1x8xf32>,
    %63 = arith.mulf %56, %56 : vector<256x8xf32>
    %cst_37 = arith.constant dense<0.000000e+00> : vector<8xf32>
    %64 = vector.multi_reduction <add>, %63, %cst_37 [0] : vector<256x8xf32> to vector<8xf32>
    %65 = vector.shape_cast %64 : vector<8xf32> to vector<1x8xf32>
    %66 = vector.shape_cast %65 : vector<1x8xf32> to vector<1x1x8xf32>
    %c0_38 = arith.constant 0 : index
    %c0_39 = arith.constant 0 : index
    %c0_40 = arith.constant 0 : index
    %67 = vector.load %arg5[%c0_38, %c0_39, %c0_40] : memref<1x1x8xf32, #tpu.memory_space<vmem>>, vector<1x1x8xf32>
    tpu.vector_store %arg5[%c0_38, %c0_39, %c0_40], %66 {strides = array<i32>} : memref<1x1x8xf32, #tpu.memory_space<vmem>>, vector<1x1x8xf32>,
    return
  }
  func.func @transform_0(%arg0: i32) -> (i32, i32, i32, i32) {
    %c0_i32 = arith.constant 0 : i32
    %c0_i32_0 = arith.constant 0 : i32
    %c0_i32_1 = arith.constant 0 : i32
    %c0_i32_2 = arith.constant 0 : i32
    return %arg0, %c0_i32, %c0_i32_0, %c0_i32_1 : i32, i32, i32, i32
  }
  func.func @transform_1(%arg0: i32) -> (i32, i32, i32) {
    %c0_i32 = arith.constant 0 : i32
    %c0_i32_0 = arith.constant 0 : i32
    %c0_i32_1 = arith.constant 0 : i32
    %c0_i32_2 = arith.constant 0 : i32
    return %c0_i32, %c0_i32_0, %c0_i32_1 : i32, i32, i32
  }
  func.func @transform_2(%arg0: i32) -> (i32, i32) {
    %c0_i32 = arith.constant 0 : i32
    %c0_i32_0 = arith.constant 0 : i32
    return %arg0, %c0_i32 : i32, i32
  }
  func.func @transform_3(%arg0: i32) -> (i32, i32, i32) {
    %c0_i32 = arith.constant 0 : i32
    %c0_i32_0 = arith.constant 0 : i32
    %c0_i32_1 = arith.constant 0 : i32
    return %arg0, %c0_i32, %c0_i32_0 : i32, i32, i32
  }
  func.func @transform_4(%arg0: i32) -> (i32, i32, i32) {
    %c0_i32 = arith.constant 0 : i32
    %c0_i32_0 = arith.constant 0 : i32
    %c0_i32_1 = arith.constant 0 : i32
    return %arg0, %c0_i32, %c0_i32_0 : i32, i32, i32
  }
}

module attributes {stable_mosaic.version = 11 : i64} {
  func.func @_bn_relu_kernel(%arg0: i32, %arg1: memref<512x8xbf16, #tpu.memory_space<vmem>>, %arg2: memref<1x8xf32, #tpu.memory_space<vmem>>, %arg3: memref<1x8xf32, #tpu.memory_space<vmem>>, %arg4: memref<512x8xf32, #tpu.memory_space<vmem>>) attributes {dimension_semantics = [#tpu.dimension_semantics<parallel>], iteration_bounds = array<i64: 1>, scalar_prefetch = 0 : i64, scratch_operands = 0 : i64, tpu.core_type = #tpu.core_type<tc>, window_params = [{transform_indices = @transform_0, window_bounds = array<i64: 512, 8>}, {pipeline_mode = #tpu.pipeline_mode<synchronous>, transform_indices = @transform_1, window_bounds = array<i64: 1, 8>}, {pipeline_mode = #tpu.pipeline_mode<synchronous>, transform_indices = @transform_2, window_bounds = array<i64: 1, 8>}, {transform_indices = @transform_3, window_bounds = array<i64: 512, 8>}]} {
    %c0 = arith.constant 0 : index
    %c0_0 = arith.constant 0 : index
    %0 = vector.load %arg1[%c0, %c0_0] : memref<512x8xbf16, #tpu.memory_space<vmem>>, vector<512x8xbf16>
    %1 = arith.extf %0 : vector<512x8xbf16> to vector<512x8xf32>
    %c0_1 = arith.constant 0 : index
    %c0_2 = arith.constant 0 : index
    %2 = vector.load %arg2[%c0_1, %c0_2] : memref<1x8xf32, #tpu.memory_space<vmem>>, vector<1x8xf32>
    %3 = vector.broadcast %2 : vector<1x8xf32> to vector<512x8xf32>
    %4 = arith.mulf %1, %3 : vector<512x8xf32>
    %c0_3 = arith.constant 0 : index
    %c0_4 = arith.constant 0 : index
    %5 = vector.load %arg3[%c0_3, %c0_4] : memref<1x8xf32, #tpu.memory_space<vmem>>, vector<1x8xf32>
    %6 = vector.broadcast %5 : vector<1x8xf32> to vector<512x8xf32>
    %7 = arith.addf %4, %6 : vector<512x8xf32>
    %cst = arith.constant 0.000000e+00 : f32
    %8 = vector.broadcast %cst : f32 to vector<512x8xf32>
    %9 = arith.maximumf %7, %8 : vector<512x8xf32>
    %c0_5 = arith.constant 0 : index
    %c0_6 = arith.constant 0 : index
    %10 = vector.load %arg4[%c0_5, %c0_6] : memref<512x8xf32, #tpu.memory_space<vmem>>, vector<512x8xf32>
    tpu.vector_store %arg4[%c0_5, %c0_6], %9 {strides = array<i32>} : memref<512x8xf32, #tpu.memory_space<vmem>>, vector<512x8xf32>,
    return
  }
  func.func @transform_0(%arg0: i32) -> (i32, i32) {
    %c0_i32 = arith.constant 0 : i32
    %c0_i32_0 = arith.constant 0 : i32
    return %arg0, %c0_i32 : i32, i32
  }
  func.func @transform_1(%arg0: i32) -> (i32, i32) {
    %c0_i32 = arith.constant 0 : i32
    %c0_i32_0 = arith.constant 0 : i32
    %c0_i32_1 = arith.constant 0 : i32
    return %c0_i32, %c0_i32_0 : i32, i32
  }
  func.func @transform_2(%arg0: i32) -> (i32, i32) {
    %c0_i32 = arith.constant 0 : i32
    %c0_i32_0 = arith.constant 0 : i32
    %c0_i32_1 = arith.constant 0 : i32
    return %c0_i32, %c0_i32_0 : i32, i32
  }
  func.func @transform_3(%arg0: i32) -> (i32, i32) {
    %c0_i32 = arith.constant 0 : i32
    %c0_i32_0 = arith.constant 0 : i32
    return %arg0, %c0_i32 : i32, i32
  }
}

</mosaic_0001>

<bundles_post_ra>
// kernel: double_conv.5
= control target key start
LH: loop header
LB: loop body
LE: loop exit
PB: predicated region body
PF: predicated region fallthrough
CT: control target
= control target key end

     0   :  { %vm604_vm0 = vcmask 60416   ;;  %s1472_s0 = inlined_call_operand.vmem [shape: bf16[512,8], index: 0, kind: input, shape index: {}]   ;;  %s1473_s1 = inlined_call_operand.vmem [shape: f32[1,8], index: 1, kind: input, shape index: {}]   ;;  %s1474_s2 = inlined_call_operand.vmem [shape: f32[1,8], index: 2, kind: input, shape index: {}]   ;;  %s1475_s3 = inlined_call_operand.vmem [shape: bf16[512,8], index: 3, kind: output, shape index: {}]  }
   0x1   :  { %v804_v0 = vld [vmem:[%s1472_s0] sm:$0xff]   ;;  %v931_v4 = vld [vmem:[%s1472_s0 + $0x8] sm:$0xff]   ;;  %v932_v5 = vld [vmem:[%s1472_s0 + $0x10] sm:$0xff]  }
   0x2   :  { %v988_v1 = vld [vmem:[%s1473_s1] ss:$0 sm:$0xff]  ;;  %v805_v2 = vunpack.c.l.bf16 %v804_v0  ;;  %v806_v3 = vunpack.c.h.bf16 %v804_v0  ;;  %v933_v6 = vld [vmem:[%s1472_s0 + $0x18] sm:$0xff]   ;;  %v809_v8 = vunpack.c.l.bf16 %v931_v4  ;;  %v810_v9 = vunpack.c.h.bf16 %v931_v4  ;;  %v935_v41 = vld [vmem:[%s1472_s0 + $0x28] sm:$0xff]  }
   0x3   :  { %v1002_v7 = vld [vmem:[%s1474_s2] ss:$0 sm:$0xff]  ;;  %v813_v10 = vunpack.c.l.bf16 %v932_v5  ;;  %v814_v11 = vunpack.c.h.bf16 %v932_v5  ;;  %v817_v14 = vunpack.c.l.bf16 %v933_v6  ;;  %v818_v15 = vunpack.c.h.bf16 %v933_v6  ;;  %v936_v42 = vld [vmem:[%s1472_s0 + $0x30] sm:$0xff]   ;;  %v937_v47 = vld [vmem:[%s1472_s0 + $0x38] sm:$0xff]  }
   0x4   :  { %v149_v12 = vmul.f32 %v805_v2, %v988_v1  ;;  %v150_v13 = vmul.f32 %v806_v3, %v988_v1  ;;  %v151_v16 = vmul.f32 %v809_v8, %v988_v1  ;;  %v152_v17 = vmul.f32 %v810_v9, %v988_v1  ;;  %v934_v36 = vld [vmem:[%s1472_s0 + $0x20] sm:$0xff]  }
   0x5   :  { %v153_v18 = vmul.f32 %v813_v10, %v988_v1  ;;  %v154_v19 = vmul.f32 %v814_v11, %v988_v1  ;;  %v155_v22 = vmul.f32 %v817_v14, %v988_v1  ;;  %v156_v23 = vmul.f32 %v818_v15, %v988_v1 }
   0x6   :  { %v220_v20 = vadd.f32 %v1002_v7, %v149_v12  ;;  %v221_v21 = vadd.f32 %v1002_v7, %v150_v13  ;;  %v222_v24 = vadd.f32 %v1002_v7, %v151_v16  ;;  %v223_v25 = vadd.f32 %v1002_v7, %v152_v17 }
   0x7   :  { %v224_v26 = vadd.f32 %v1002_v7, %v153_v18  ;;  %v225_v27 = vadd.f32 %v1002_v7, %v154_v19  ;;  %v226_v30 = vadd.f32 %v1002_v7, %v155_v22  ;;  %v227_v31 = vadd.f32 %v1002_v7, %v156_v23  ;;  %v938_v18 = vld [vmem:[%s1472_s0 + $0x40] sm:$0xff]   ;;  %v939_v23 = vld [vmem:[%s1472_s0 + $0x48] sm:$0xff]  }
   0x8   :  { %v284_v28 = vmax.f32 %v220_v20, 0.0  ;;  %v285_v29 = vmax.f32 %v221_v21, 0.0  ;;  %v286_v32 = vmax.f32 %v222_v24, 0.0  ;;  %v287_v33 = vmax.f32 %v223_v25, 0.0  ;;  %v940_v24 = vld [vmem:[%s1472_s0 + $0x50] sm:$0xff]  }
   0x9   :  { %v288_v34 = vmax.f32 %v224_v26, 0.0  ;;  %v289_v35 = vmax.f32 %v225_v27, 0.0  ;;  %v290_v39 = vmax.f32 %v226_v30, 0.0  ;;  %v291_v40 = vmax.f32 %v227_v31, 0.0 }
   0xa   :  { %v739_v37 = vpack.c.bf16 %v284_v28, %v284_v28  ;;  %v740_v38 = vpack.c.bf16 %v285_v29, %v285_v29  ;;  %v741_v43 = vpack.c.bf16 %v286_v32, %v286_v32  ;;  %v742_v44 = vpack.c.bf16 %v287_v33, %v287_v33  ;;  %v941_v29 = vld [vmem:[%s1472_s0 + $0x58] sm:$0xff]  }
   0xb   :  { %v743_v45 = vpack.c.bf16 %v288_v34, %v288_v34  ;;  %v744_v46 = vpack.c.bf16 %v289_v35, %v289_v35  ;;  %v745_v48 = vpack.c.bf16 %v290_v39, %v290_v39  ;;  %v746_v49 = vpack.c.bf16 %v291_v40, %v291_v40 }
   0xc   :  { %605 = vst.msk [vmem:[%s1475_s3] sm:$0xf] %vm604_vm0, %v739_v37  ;;  %606 = vst.msk [vmem:[%s1475_s3 + $0x4] sm:$0xf] %vm604_vm0, %v740_v38  ;;  %v821_v50 = vunpack.c.l.bf16 %v934_v36  ;;  %v822_v51 = vunpack.c.h.bf16 %v934_v36  ;;  %v825_v52 = vunpack.c.l.bf16 %v935_v41  ;;  %v826_v53 = vunpack.c.h.bf16 %v935_v41 }
   0xd   :  { %607 = vst.msk [vmem:[%s1475_s3 + $0x8] sm:$0xf] %vm604_vm0, %v741_v43  ;;  %608 = vst.msk [vmem:[%s1475_s3 + $0xc] sm:$0xf] %vm604_vm0, %v742_v44  ;;  %v829_v54 = vunpack.c.l.bf16 %v936_v42  ;;  %v830_v55 = vunpack.c.h.bf16 %v936_v42  ;;  %v833_v58 = vunpack.c.l.bf16 %v937_v47  ;;  %v834_v59 = vunpack.c.h.bf16 %v937_v47 }
   0xe   :  { %609 = vst.msk [vmem:[%s1475_s3 + $0x10] sm:$0xf] %vm604_vm0, %v743_v45  ;;  %610 = vst.msk [vmem:[%s1475_s3 + $0x14] sm:$0xf] %vm604_vm0, %v744_v46  ;;  %v157_v56 = vmul.f32 %v821_v50, %v988_v1  ;;  %v158_v57 = vmul.f32 %v822_v51, %v988_v1  ;;  %v159_v60 = vmul.f32 %v825_v52, %v988_v1  ;;  %v837_v32 = vunpack.c.l.bf16 %v938_v18 }
   0xf   :  { %611 = vst.msk [vmem:[%s1475_s3 + $0x18] sm:$0xf] %vm604_vm0, %v745_v48  ;;  %612 = vst.msk [vmem:[%s1475_s3 + $0x1c] sm:$0xf] %vm604_vm0, %v746_v49  ;;  %v160_v61 = vmul.f32 %v826_v53, %v988_v1  ;;  %v161_v62 = vmul.f32 %v829_v54, %v988_v1  ;;  %v162_v63 = vmul.f32 %v830_v55, %v988_v1  ;;  %v838_v33 = vunpack.c.h.bf16 %v938_v18 }
  0x10   :  { %v228_v0 = vadd.f32 %v1002_v7, %v157_v56  ;;  %v229_v2 = vadd.f32 %v1002_v7, %v158_v57  ;;  %v163_v3 = vmul.f32 %v833_v58, %v988_v1  ;;  %v164_v4 = vmul.f32 %v834_v59, %v988_v1 }
  0x11   :  { %v230_v5 = vadd.f32 %v1002_v7, %v159_v60  ;;  %v231_v6 = vadd.f32 %v1002_v7, %v160_v61  ;;  %v232_v8 = vadd.f32 %v1002_v7, %v161_v62  ;;  %v233_v9 = vadd.f32 %v1002_v7, %v162_v63  ;;  %v942_v62 = vld [vmem:[%s1472_s0 + $0x60] sm:$0xff]  }
  0x12   :  { %v292_v10 = vmax.f32 %v228_v0, 0.0  ;;  %v293_v11 = vmax.f32 %v229_v2, 0.0  ;;  %v234_v12 = vadd.f32 %v1002_v7, %v163_v3  ;;  %v235_v13 = vadd.f32 %v1002_v7, %v164_v4  ;;  %v943_v4 = vld [vmem:[%s1472_s0 + $0x68] sm:$0xff]  }
  0x13   :  { %v294_v14 = vmax.f32 %v230_v5, 0.0  ;;  %v295_v15 = vmax.f32 %v231_v6, 0.0  ;;  %v296_v16 = vmax.f32 %v232_v8, 0.0  ;;  %v297_v17 = vmax.f32 %v233_v9, 0.0  ;;  %v944_v5 = vld [vmem:[%s1472_s0 + $0x70] sm:$0xff]  }
  0x14   :  { %v747_v19 = vpack.c.bf16 %v292_v10, %v292_v10  ;;  %v748_v20 = vpack.c.bf16 %v293_v11, %v293_v11  ;;  %v298_v21 = vmax.f32 %v234_v12, 0.0  ;;  %v299_v22 = vmax.f32 %v235_v13, 0.0  ;;  %v945_v11 = vld [vmem:[%s1472_s0 + $0x78] sm:$0xff]  }
  0x15   :  { %v749_v25 = vpack.c.bf16 %v294_v14, %v294_v14  ;;  %v750_v26 = vpack.c.bf16 %v295_v15, %v295_v15  ;;  %v751_v27 = vpack.c.bf16 %v296_v16, %v296_v16  ;;  %v752_v28 = vpack.c.bf16 %v297_v17, %v297_v17 }
  0x16   :  { %613 = vst.msk [vmem:[%s1475_s3 + $0x20] sm:$0xf] %vm604_vm0, %v747_v19  ;;  %614 = vst.msk [vmem:[%s1475_s3 + $0x24] sm:$0xf] %vm604_vm0, %v748_v20  ;;  %v753_v30 = vpack.c.bf16 %v298_v21, %v298_v21  ;;  %v754_v31 = vpack.c.bf16 %v299_v22, %v299_v22  ;;  %v841_v34 = vunpack.c.l.bf16 %v939_v23  ;;  %v842_v35 = vunpack.c.h.bf16 %v939_v23 }
  0x17   :  { %615 = vst.msk [vmem:[%s1475_s3 + $0x28] sm:$0xf] %vm604_vm0, %v749_v25  ;;  %616 = vst.msk [vmem:[%s1475_s3 + $0x2c] sm:$0xf] %vm604_vm0, %v750_v26  ;;  %v845_v36 = vunpack.c.l.bf16 %v940_v24  ;;  %v846_v37 = vunpack.c.h.bf16 %v940_v24  ;;  %v165_v38 = vmul.f32 %v837_v32, %v988_v1  ;;  %v166_v39 = vmul.f32 %v838_v33, %v988_v1 }
  0x18   :  { %617 = vst.msk [vmem:[%s1475_s3 + $0x30] sm:$0xf] %vm604_vm0, %v751_v27  ;;  %618 = vst.msk [vmem:[%s1475_s3 + $0x34] sm:$0xf] %vm604_vm0, %v752_v28  ;;  %v849_v40 = vunpack.c.l.bf16 %v941_v29  ;;  %v850_v41 = vunpack.c.h.bf16 %v941_v29  ;;  %v167_v42 = vmul.f32 %v841_v34, %v988_v1  ;;  %v168_v43 = vmul.f32 %v842_v35, %v988_v1 }
  0x19   :  { %619 = vst.msk [vmem:[%s1475_s3 + $0x38] sm:$0xf] %vm604_vm0, %v753_v30  ;;  %620 = vst.msk [vmem:[%s1475_s3 + $0x3c] sm:$0xf] %vm604_vm0, %v754_v31  ;;  %v169_v44 = vmul.f32 %v845_v36, %v988_v1  ;;  %v170_v45 = vmul.f32 %v846_v37, %v988_v1  ;;  %v236_v46 = vadd.f32 %v1002_v7, %v165_v38  ;;  %v853_v14 = vunpack.c.l.bf16 %v942_v62 }
  0x1a   :  { %v237_v47 = vadd.f32 %v1002_v7, %v166_v39  ;;  %v171_v48 = vmul.f32 %v849_v40, %v988_v1  ;;  %v172_v49 = vmul.f32 %v850_v41, %v988_v1  ;;  %v238_v50 = vadd.f32 %v1002_v7, %v167_v42 }
  0x1b   :  { %v239_v51 = vadd.f32 %v1002_v7, %v168_v43  ;;  %v240_v52 = vadd.f32 %v1002_v7, %v169_v44  ;;  %v241_v53 = vadd.f32 %v1002_v7, %v170_v45  ;;  %v300_v54 = vmax.f32 %v236_v46, 0.0  ;;  %v946_v44 = vld [vmem:[%s1472_s0 + $0x80] sm:$0xff]  }
  0x1c   :  { %v301_v55 = vmax.f32 %v237_v47, 0.0  ;;  %v242_v56 = vadd.f32 %v1002_v7, %v171_v48  ;;  %v243_v57 = vadd.f32 %v1002_v7, %v172_v49  ;;  %v302_v58 = vmax.f32 %v238_v50, 0.0  ;;  %v947_v49 = vld [vmem:[%s1472_s0 + $0x88] sm:$0xff]   ;;  %v948_v50 = vld [vmem:[%s1472_s0 + $0x90] sm:$0xff]  }
  0x1d   :  { %v303_v59 = vmax.f32 %v239_v51, 0.0  ;;  %v304_v60 = vmax.f32 %v240_v52, 0.0  ;;  %v305_v61 = vmax.f32 %v241_v53, 0.0  ;;  %v755_v63 = vpack.c.bf16 %v300_v54, %v300_v54 }
  0x1e   :  { %v756_v0 = vpack.c.bf16 %v301_v55, %v301_v55  ;;  %v306_v2 = vmax.f32 %v242_v56, 0.0  ;;  %v307_v3 = vmax.f32 %v243_v57, 0.0  ;;  %v757_v6 = vpack.c.bf16 %v302_v58, %v302_v58  ;;  %v949_v55 = vld [vmem:[%s1472_s0 + $0x98] sm:$0xff]  }
  0x1f   :  { %v758_v8 = vpack.c.bf16 %v303_v59, %v303_v59  ;;  %v759_v9 = vpack.c.bf16 %v304_v60, %v304_v60  ;;  %v760_v10 = vpack.c.bf16 %v305_v61, %v305_v61  ;;  %621 = vst.msk [vmem:[%s1475_s3 + $0x40] sm:$0xf] %vm604_vm0, %v755_v63  ;;  %v854_v15 = vunpack.c.h.bf16 %v942_v62 }
  0x20   :  { %622 = vst.msk [vmem:[%s1475_s3 + $0x44] sm:$0xf] %vm604_vm0, %v756_v0  ;;  %v761_v12 = vpack.c.bf16 %v306_v2, %v306_v2  ;;  %v762_v13 = vpack.c.bf16 %v307_v3, %v307_v3  ;;  %623 = vst.msk [vmem:[%s1475_s3 + $0x48] sm:$0xf] %vm604_vm0, %v757_v6  ;;  %v857_v16 = vunpack.c.l.bf16 %v943_v4  ;;  %v858_v17 = vunpack.c.h.bf16 %v943_v4 }
  0x21   :  { %624 = vst.msk [vmem:[%s1475_s3 + $0x4c] sm:$0xf] %vm604_vm0, %v758_v8  ;;  %625 = vst.msk [vmem:[%s1475_s3 + $0x50] sm:$0xf] %vm604_vm0, %v759_v9  ;;  %v861_v18 = vunpack.c.l.bf16 %v944_v5  ;;  %v862_v19 = vunpack.c.h.bf16 %v944_v5  ;;  %v173_v20 = vmul.f32 %v853_v14, %v988_v1  ;;  %v174_v21 = vmul.f32 %v854_v15, %v988_v1 }
  0x22   :  { %626 = vst.msk [vmem:[%s1475_s3 + $0x54] sm:$0xf] %vm604_vm0, %v760_v10  ;;  %627 = vst.msk [vmem:[%s1475_s3 + $0x58] sm:$0xf] %vm604_vm0, %v761_v12  ;;  %v865_v22 = vunpack.c.l.bf16 %v945_v11  ;;  %v866_v23 = vunpack.c.h.bf16 %v945_v11  ;;  %v175_v24 = vmul.f32 %v857_v16, %v988_v1  ;;  %v176_v25 = vmul.f32 %v858_v17, %v988_v1 }
  0x23   :  { %628 = vst.msk [vmem:[%s1475_s3 + $0x5c] sm:$0xf] %vm604_vm0, %v762_v13  ;;  %v177_v26 = vmul.f32 %v861_v18, %v988_v1  ;;  %v178_v27 = vmul.f32 %v862_v19, %v988_v1  ;;  %v244_v28 = vadd.f32 %v1002_v7, %v173_v20  ;;  %v245_v29 = vadd.f32 %v1002_v7, %v174_v21 }
  0x24   :  { %v179_v30 = vmul.f32 %v865_v22, %v988_v1  ;;  %v180_v31 = vmul.f32 %v866_v23, %v988_v1  ;;  %v246_v32 = vadd.f32 %v1002_v7, %v175_v24  ;;  %v247_v33 = vadd.f32 %v1002_v7, %v176_v25 }
  0x25   :  { %v248_v34 = vadd.f32 %v1002_v7, %v177_v26  ;;  %v249_v35 = vadd.f32 %v1002_v7, %v178_v27  ;;  %v308_v36 = vmax.f32 %v244_v28, 0.0  ;;  %v309_v37 = vmax.f32 %v245_v29, 0.0  ;;  %v950_v26 = vld [vmem:[%s1472_s0 + $0xa0] sm:$0xff]  }
  0x26   :  { %v250_v38 = vadd.f32 %v1002_v7, %v179_v30  ;;  %v251_v39 = vadd.f32 %v1002_v7, %v180_v31  ;;  %v310_v40 = vmax.f32 %v246_v32, 0.0  ;;  %v311_v41 = vmax.f32 %v247_v33, 0.0  ;;  %v951_v31 = vld [vmem:[%s1472_s0 + $0xa8] sm:$0xff]   ;;  %v952_v32 = vld [vmem:[%s1472_s0 + $0xb0] sm:$0xff]  }
  0x27   :  { %v312_v42 = vmax.f32 %v248_v34, 0.0  ;;  %v313_v43 = vmax.f32 %v249_v35, 0.0  ;;  %v763_v45 = vpack.c.bf16 %v308_v36, %v308_v36  ;;  %v764_v46 = vpack.c.bf16 %v309_v37, %v309_v37  ;;  %v953_v37 = vld [vmem:[%s1472_s0 + $0xb8] sm:$0xff]  }
  0x28   :  { %v314_v47 = vmax.f32 %v250_v38, 0.0  ;;  %v315_v48 = vmax.f32 %v251_v39, 0.0  ;;  %v765_v51 = vpack.c.bf16 %v310_v40, %v310_v40  ;;  %v766_v52 = vpack.c.bf16 %v311_v41, %v311_v41 }
  0x29   :  { %v767_v53 = vpack.c.bf16 %v312_v42, %v312_v42  ;;  %v768_v54 = vpack.c.bf16 %v313_v43, %v313_v43  ;;  %629 = vst.msk [vmem:[%s1475_s3 + $0x60] sm:$0xf] %vm604_vm0, %v763_v45  ;;  %630 = vst.msk [vmem:[%s1475_s3 + $0x64] sm:$0xf] %vm604_vm0, %v764_v46  ;;  %v869_v58 = vunpack.c.l.bf16 %v946_v44  ;;  %v870_v59 = vunpack.c.h.bf16 %v946_v44 }
  0x2a   :  { %v769_v56 = vpack.c.bf16 %v314_v47, %v314_v47  ;;  %v770_v57 = vpack.c.bf16 %v315_v48, %v315_v48  ;;  %631 = vst.msk [vmem:[%s1475_s3 + $0x68] sm:$0xf] %vm604_vm0, %v765_v51  ;;  %632 = vst.msk [vmem:[%s1475_s3 + $0x6c] sm:$0xf] %vm604_vm0, %v766_v52  ;;  %v873_v60 = vunpack.c.l.bf16 %v947_v49  ;;  %v874_v61 = vunpack.c.h.bf16 %v947_v49 }
  0x2b   :  { %633 = vst.msk [vmem:[%s1475_s3 + $0x70] sm:$0xf] %vm604_vm0, %v767_v53  ;;  %634 = vst.msk [vmem:[%s1475_s3 + $0x74] sm:$0xf] %vm604_vm0, %v768_v54  ;;  %v877_v62 = vunpack.c.l.bf16 %v948_v50  ;;  %v878_v63 = vunpack.c.h.bf16 %v948_v50  ;;  %v181_v0 = vmul.f32 %v869_v58, %v988_v1  ;;  %v182_v2 = vmul.f32 %v870_v59, %v988_v1 }
  0x2c   :  { %635 = vst.msk [vmem:[%s1475_s3 + $0x78] sm:$0xf] %vm604_vm0, %v769_v56  ;;  %636 = vst.msk [vmem:[%s1475_s3 + $0x7c] sm:$0xf] %vm604_vm0, %v770_v57  ;;  %v881_v3 = vunpack.c.l.bf16 %v949_v55  ;;  %v882_v4 = vunpack.c.h.bf16 %v949_v55  ;;  %v183_v5 = vmul.f32 %v873_v60, %v988_v1  ;;  %v184_v6 = vmul.f32 %v874_v61, %v988_v1 }
  0x2d   :  { %v185_v8 = vmul.f32 %v877_v62, %v988_v1  ;;  %v186_v9 = vmul.f32 %v878_v63, %v988_v1  ;;  %v252_v10 = vadd.f32 %v1002_v7, %v181_v0  ;;  %v253_v11 = vadd.f32 %v1002_v7, %v182_v2 }
  0x2e   :  { %v187_v12 = vmul.f32 %v881_v3, %v988_v1  ;;  %v188_v13 = vmul.f32 %v882_v4, %v988_v1  ;;  %v254_v14 = vadd.f32 %v1002_v7, %v183_v5  ;;  %v255_v15 = vadd.f32 %v1002_v7, %v184_v6 }
  0x2f   :  { %v256_v16 = vadd.f32 %v1002_v7, %v185_v8  ;;  %v257_v17 = vadd.f32 %v1002_v7, %v186_v9  ;;  %v316_v18 = vmax.f32 %v252_v10, 0.0  ;;  %v317_v19 = vmax.f32 %v253_v11, 0.0  ;;  %v954_v8 = vld [vmem:[%s1472_s0 + $0xc0] sm:$0xff]  }
  0x30   :  { %v258_v20 = vadd.f32 %v1002_v7, %v187_v12  ;;  %v259_v21 = vadd.f32 %v1002_v7, %v188_v13  ;;  %v318_v22 = vmax.f32 %v254_v14, 0.0  ;;  %v319_v23 = vmax.f32 %v255_v15, 0.0  ;;  %v955_v13 = vld [vmem:[%s1472_s0 + $0xc8] sm:$0xff]   ;;  %v956_v14 = vld [vmem:[%s1472_s0 + $0xd0] sm:$0xff]  }
  0x31   :  { %v320_v24 = vmax.f32 %v256_v16, 0.0  ;;  %v321_v25 = vmax.f32 %v257_v17, 0.0  ;;  %v771_v27 = vpack.c.bf16 %v316_v18, %v316_v18  ;;  %v772_v28 = vpack.c.bf16 %v317_v19, %v317_v19  ;;  %v957_v19 = vld [vmem:[%s1472_s0 + $0xd8] sm:$0xff]  }
  0x32   :  { %v322_v29 = vmax.f32 %v258_v20, 0.0  ;;  %v323_v30 = vmax.f32 %v259_v21, 0.0  ;;  %v773_v33 = vpack.c.bf16 %v318_v22, %v318_v22  ;;  %v774_v34 = vpack.c.bf16 %v319_v23, %v319_v23 }
  0x33   :  { %v775_v35 = vpack.c.bf16 %v320_v24, %v320_v24  ;;  %v776_v36 = vpack.c.bf16 %v321_v25, %v321_v25  ;;  %637 = vst.msk [vmem:[%s1475_s3 + $0x80] sm:$0xf] %vm604_vm0, %v771_v27  ;;  %638 = vst.msk [vmem:[%s1475_s3 + $0x84] sm:$0xf] %vm604_vm0, %v772_v28  ;;  %v885_v40 = vunpack.c.l.bf16 %v950_v26  ;;  %v886_v41 = vunpack.c.h.bf16 %v950_v26 }
  0x34   :  { %v777_v38 = vpack.c.bf16 %v322_v29, %v322_v29  ;;  %v778_v39 = vpack.c.bf16 %v323_v30, %v323_v30  ;;  %639 = vst.msk [vmem:[%s1475_s3 + $0x88] sm:$0xf] %vm604_vm0, %v773_v33  ;;  %640 = vst.msk [vmem:[%s1475_s3 + $0x8c] sm:$0xf] %vm604_vm0, %v774_v34  ;;  %v889_v42 = vunpack.c.l.bf16 %v951_v31  ;;  %v890_v43 = vunpack.c.h.bf16 %v951_v31 }
  0x35   :  { %641 = vst.msk [vmem:[%s1475_s3 + $0x90] sm:$0xf] %vm604_vm0, %v775_v35  ;;  %642 = vst.msk [vmem:[%s1475_s3 + $0x94] sm:$0xf] %vm604_vm0, %v776_v36  ;;  %v893_v44 = vunpack.c.l.bf16 %v952_v32  ;;  %v894_v45 = vunpack.c.h.bf16 %v952_v32  ;;  %v189_v46 = vmul.f32 %v885_v40, %v988_v1  ;;  %v190_v47 = vmul.f32 %v886_v41, %v988_v1 }
  0x36   :  { %643 = vst.msk [vmem:[%s1475_s3 + $0x98] sm:$0xf] %vm604_vm0, %v777_v38  ;;  %644 = vst.msk [vmem:[%s1475_s3 + $0x9c] sm:$0xf] %vm604_vm0, %v778_v39  ;;  %v897_v48 = vunpack.c.l.bf16 %v953_v37  ;;  %v898_v49 = vunpack.c.h.bf16 %v953_v37  ;;  %v191_v50 = vmul.f32 %v889_v42, %v988_v1  ;;  %v192_v51 = vmul.f32 %v890_v43, %v988_v1 }
  0x37   :  { %v193_v52 = vmul.f32 %v893_v44, %v988_v1  ;;  %v194_v53 = vmul.f32 %v894_v45, %v988_v1  ;;  %v260_v54 = vadd.f32 %v1002_v7, %v189_v46  ;;  %v261_v55 = vadd.f32 %v1002_v7, %v190_v47 }
  0x38   :  { %v195_v56 = vmul.f32 %v897_v48, %v988_v1  ;;  %v196_v57 = vmul.f32 %v898_v49, %v988_v1  ;;  %v262_v58 = vadd.f32 %v1002_v7, %v191_v50  ;;  %v263_v59 = vadd.f32 %v1002_v7, %v192_v51 }
  0x39   :  { %v264_v60 = vadd.f32 %v1002_v7, %v193_v52  ;;  %v265_v61 = vadd.f32 %v1002_v7, %v194_v53  ;;  %v324_v62 = vmax.f32 %v260_v54, 0.0  ;;  %v325_v63 = vmax.f32 %v261_v55, 0.0  ;;  %v958_v52 = vld [vmem:[%s1472_s0 + $0xe0] sm:$0xff]  }
  0x3a   :  { %v266_v0 = vadd.f32 %v1002_v7, %v195_v56  ;;  %v267_v2 = vadd.f32 %v1002_v7, %v196_v57  ;;  %v326_v3 = vmax.f32 %v262_v58, 0.0  ;;  %v327_v4 = vmax.f32 %v263_v59, 0.0  ;;  %v959_v57 = vld [vmem:[%s1472_s0 + $0xe8] sm:$0xff]   ;;  %v960_v58 = vld [vmem:[%s1472_s0 + $0xf0] sm:$0xff]  }
  0x3b   :  { %v328_v5 = vmax.f32 %v264_v60, 0.0  ;;  %v329_v6 = vmax.f32 %v265_v61, 0.0  ;;  %v779_v9 = vpack.c.bf16 %v324_v62, %v324_v62  ;;  %v780_v10 = vpack.c.bf16 %v325_v63, %v325_v63  ;;  %v961_v63 = vld [vmem:[%s1472_s0 + $0xf8] sm:$0xff]  }
  0x3c   :  { %v330_v11 = vmax.f32 %v266_v0, 0.0  ;;  %v331_v12 = vmax.f32 %v267_v2, 0.0  ;;  %v781_v15 = vpack.c.bf16 %v326_v3, %v326_v3  ;;  %v782_v16 = vpack.c.bf16 %v327_v4, %v327_v4 }
  0x3d   :  { %v783_v17 = vpack.c.bf16 %v328_v5, %v328_v5  ;;  %v784_v18 = vpack.c.bf16 %v329_v6, %v329_v6  ;;  %645 = vst.msk [vmem:[%s1475_s3 + $0xa0] sm:$0xf] %vm604_vm0, %v779_v9  ;;  %646 = vst.msk [vmem:[%s1475_s3 + $0xa4] sm:$0xf] %vm604_vm0, %v780_v10  ;;  %v901_v22 = vunpack.c.l.bf16 %v954_v8  ;;  %v902_v23 = vunpack.c.h.bf16 %v954_v8 }
  0x3e   :  { %v785_v20 = vpack.c.bf16 %v330_v11, %v330_v11  ;;  %v786_v21 = vpack.c.bf16 %v331_v12, %v331_v12  ;;  %647 = vst.msk [vmem:[%s1475_s3 + $0xa8] sm:$0xf] %vm604_vm0, %v781_v15  ;;  %648 = vst.msk [vmem:[%s1475_s3 + $0xac] sm:$0xf] %vm604_vm0, %v782_v16  ;;  %v905_v24 = vunpack.c.l.bf16 %v955_v13  ;;  %v906_v25 = vunpack.c.h.bf16 %v955_v13 }
  0x3f   :  { %649 = vst.msk [vmem:[%s1475_s3 + $0xb0] sm:$0xf] %vm604_vm0, %v783_v17  ;;  %650 = vst.msk [vmem:[%s1475_s3 + $0xb4] sm:$0xf] %vm604_vm0, %v784_v18  ;;  %v909_v26 = vunpack.c.l.bf16 %v956_v14  ;;  %v910_v27 = vunpack.c.h.bf16 %v956_v14  ;;  %v197_v28 = vmul.f32 %v901_v22, %v988_v1  ;;  %v198_v29 = vmul.f32 %v902_v23, %v988_v1 }
  0x40   :  { %651 = vst.msk [vmem:[%s1475_s3 + $0xb8] sm:$0xf] %vm604_vm0, %v785_v20  ;;  %652 = vst.msk [vmem:[%s1475_s3 + $0xbc] sm:$0xf] %vm604_vm0, %v786_v21  ;;  %v913_v30 = vunpack.c.l.bf16 %v957_v19  ;;  %v914_v31 = vunpack.c.h.bf16 %v957_v19  ;;  %v199_v32 = vmul.f32 %v905_v24, %v988_v1  ;;  %v200_v33 = vmul.f32 %v906_v25, %v988_v1 }
  0x41   :  { %v201_v34 = vmul.f32 %v909_v26, %v988_v1  ;;  %v202_v35 = vmul.f32 %v910_v27, %v988_v1  ;;  %v268_v36 = vadd.f32 %v1002_v7, %v197_v28  ;;  %v269_v37 = vadd.f32 %v1002_v7, %v198_v29 }
  0x42   :  { %v203_v38 = vmul.f32 %v913_v30, %v988_v1  ;;  %v204_v39 = vmul.f32 %v914_v31, %v988_v1  ;;  %v270_v40 = vadd.f32 %v1002_v7, %v199_v32  ;;  %v271_v41 = vadd.f32 %v1002_v7, %v200_v33 }
  0x43   :  { %v272_v42 = vadd.f32 %v1002_v7, %v201_v34  ;;  %v273_v43 = vadd.f32 %v1002_v7, %v202_v35  ;;  %v332_v44 = vmax.f32 %v268_v36, 0.0  ;;  %v333_v45 = vmax.f32 %v269_v37, 0.0 }
  0x44   :  { %v274_v46 = vadd.f32 %v1002_v7, %v203_v38  ;;  %v275_v47 = vadd.f32 %v1002_v7, %v204_v39  ;;  %v334_v48 = vmax.f32 %v270_v40, 0.0  ;;  %v335_v49 = vmax.f32 %v271_v41, 0.0 }
  0x45   :  { %v336_v50 = vmax.f32 %v272_v42, 0.0  ;;  %v337_v51 = vmax.f32 %v273_v43, 0.0  ;;  %v787_v53 = vpack.c.bf16 %v332_v44, %v332_v44  ;;  %v788_v54 = vpack.c.bf16 %v333_v45, %v333_v45 }
  0x46   :  { %v338_v55 = vmax.f32 %v274_v46, 0.0  ;;  %v339_v56 = vmax.f32 %v275_v47, 0.0  ;;  %v789_v59 = vpack.c.bf16 %v334_v48, %v334_v48  ;;  %v790_v60 = vpack.c.bf16 %v335_v49, %v335_v49 }
  0x47   :  { %v791_v61 = vpack.c.bf16 %v336_v50, %v336_v50  ;;  %v792_v62 = vpack.c.bf16 %v337_v51, %v337_v51  ;;  %653 = vst.msk [vmem:[%s1475_s3 + $0xc0] sm:$0xf] %vm604_vm0, %v787_v53  ;;  %654 = vst.msk [vmem:[%s1475_s3 + $0xc4] sm:$0xf] %vm604_vm0, %v788_v54  ;;  %v917_v3 = vunpack.c.l.bf16 %v958_v52  ;;  %v918_v4 = vunpack.c.h.bf16 %v958_v52 }
  0x48   :  { %v793_v0 = vpack.c.bf16 %v338_v55, %v338_v55  ;;  %v794_v2 = vpack.c.bf16 %v339_v56, %v339_v56  ;;  %655 = vst.msk [vmem:[%s1475_s3 + $0xc8] sm:$0xf] %vm604_vm0, %v789_v59  ;;  %656 = vst.msk [vmem:[%s1475_s3 + $0xcc] sm:$0xf] %vm604_vm0, %v790_v60  ;;  %v921_v5 = vunpack.c.l.bf16 %v959_v57  ;;  %v922_v6 = vunpack.c.h.bf16 %v959_v57 }
  0x49   :  { %657 = vst.msk [vmem:[%s1475_s3 + $0xd0] sm:$0xf] %vm604_vm0, %v791_v61  ;;  %658 = vst.msk [vmem:[%s1475_s3 + $0xd4] sm:$0xf] %vm604_vm0, %v792_v62  ;;  %v925_v8 = vunpack.c.l.bf16 %v960_v58  ;;  %v926_v9 = vunpack.c.h.bf16 %v960_v58  ;;  %v205_v10 = vmul.f32 %v917_v3, %v988_v1  ;;  %v206_v11 = vmul.f32 %v918_v4, %v988_v1 }
  0x4a   :  { %659 = vst.msk [vmem:[%s1475_s3 + $0xd8] sm:$0xf] %vm604_vm0, %v793_v0  ;;  %660 = vst.msk [vmem:[%s1475_s3 + $0xdc] sm:$0xf] %vm604_vm0, %v794_v2  ;;  %v929_v12 = vunpack.c.l.bf16 %v961_v63  ;;  %v930_v13 = vunpack.c.h.bf16 %v961_v63  ;;  %v207_v14 = vmul.f32 %v921_v5, %v988_v1  ;;  %v208_v15 = vmul.f32 %v922_v6, %v988_v1 }
  0x4b   :  { %v209_v16 = vmul.f32 %v925_v8, %v988_v1  ;;  %v210_v17 = vmul.f32 %v926_v9, %v988_v1  ;;  %v276_v18 = vadd.f32 %v1002_v7, %v205_v10  ;;  %v277_v19 = vadd.f32 %v1002_v7, %v206_v11 }
  0x4c   :  { %v211_v20 = vmul.f32 %v929_v12, %v988_v1  ;;  %v212_v21 = vmul.f32 %v930_v13, %v988_v1  ;;  %v278_v22 = vadd.f32 %v1002_v7, %v207_v14  ;;  %v279_v23 = vadd.f32 %v1002_v7, %v208_v15 }
  0x4d   :  { %v280_v24 = vadd.f32 %v1002_v7, %v209_v16  ;;  %v281_v25 = vadd.f32 %v1002_v7, %v210_v17  ;;  %v340_v26 = vmax.f32 %v276_v18, 0.0  ;;  %v341_v27 = vmax.f32 %v277_v19, 0.0 }
  0x4e   :  { %v282_v28 = vadd.f32 %v1002_v7, %v211_v20  ;;  %v283_v29 = vadd.f32 %v1002_v7, %v212_v21  ;;  %v342_v30 = vmax.f32 %v278_v22, 0.0  ;;  %v343_v31 = vmax.f32 %v279_v23, 0.0 }
  0x4f   :  { %v344_v32 = vmax.f32 %v280_v24, 0.0  ;;  %v345_v33 = vmax.f32 %v281_v25, 0.0  ;;  %v795_v34 = vpack.c.bf16 %v340_v26, %v340_v26  ;;  %v796_v1 = vpack.c.bf16 %v341_v27, %v341_v27 }
  0x50   :  { %v346_v35 = vmax.f32 %v282_v28, 0.0  ;;  %v347_v36 = vmax.f32 %v283_v29, 0.0  ;;  %v797_v37 = vpack.c.bf16 %v342_v30, %v342_v30  ;;  %v798_v38 = vpack.c.bf16 %v343_v31, %v343_v31 }
  0x51   :  { %v799_v39 = vpack.c.bf16 %v344_v32, %v344_v32  ;;  %v800_v40 = vpack.c.bf16 %v345_v33, %v345_v33  ;;  %661 = vst.msk [vmem:[%s1475_s3 + $0xe0] sm:$0xf] %vm604_vm0, %v795_v34  ;;  %662 = vst.msk [vmem:[%s1475_s3 + $0xe4] sm:$0xf] %vm604_vm0, %v796_v1 }
  0x52   :  { %v801_v7 = vpack.c.bf16 %v346_v35, %v346_v35  ;;  %v802_v41 = vpack.c.bf16 %v347_v36, %v347_v36  ;;  %663 = vst.msk [vmem:[%s1475_s3 + $0xe8] sm:$0xf] %vm604_vm0, %v797_v37  ;;  %664 = vst.msk [vmem:[%s1475_s3 + $0xec] sm:$0xf] %vm604_vm0, %v798_v38 }
  0x53   :  { %665 = vst.msk [vmem:[%s1475_s3 + $0xf0] sm:$0xf] %vm604_vm0, %v799_v39  ;;  %666 = vst.msk [vmem:[%s1475_s3 + $0xf4] sm:$0xf] %vm604_vm0, %v800_v40 }
  0x54   :  { %667 = vst.msk [vmem:[%s1475_s3 + $0xf8] sm:$0xf] %vm604_vm0, %v801_v7  ;;  %668 = vst.msk [vmem:[%s1475_s3 + $0xfc] sm:$0xf] %vm604_vm0, %v802_v41 }

// kernel: double_conv.7
= control target key start
LH: loop header
LB: loop body
LE: loop exit
PB: predicated region body
PF: predicated region fallthrough
CT: control target
= control target key end

     0   :  { %vm348_vm0 = vcmask 64512   ;;  %s1088_s0 = inlined_call_operand.vmem [shape: bf16[512,8], index: 0, kind: input, shape index: {}]   ;;  %s1089_s1 = inlined_call_operand.vmem [shape: f32[1,8], index: 1, kind: input, shape index: {}]   ;;  %s1090_s2 = inlined_call_operand.vmem [shape: f32[1,8], index: 2, kind: input, shape index: {}]   ;;  %s1091_s3 = inlined_call_operand.vmem [shape: f32[512,8], index: 3, kind: output, shape index: {}]  }
   0x1   :  { %v420_v0 = vld [vmem:[%s1088_s0] sm:$0xff]   ;;  %v547_v4 = vld [vmem:[%s1088_s0 + $0x8] sm:$0xff]   ;;  %v548_v5 = vld [vmem:[%s1088_s0 + $0x10] sm:$0xff]  }
   0x2   :  { %v604_v1 = vld [vmem:[%s1089_s1] ss:$0 sm:$0xff]  ;;  %v421_v2 = vunpack.c.l.bf16 %v420_v0  ;;  %v422_v3 = vunpack.c.h.bf16 %v420_v0  ;;  %v549_v6 = vld [vmem:[%s1088_s0 + $0x18] sm:$0xff]   ;;  %v425_v8 = vunpack.c.l.bf16 %v547_v4  ;;  %v426_v9 = vunpack.c.h.bf16 %v547_v4  ;;  %v551_v33 = vld [vmem:[%s1088_s0 + $0x28] sm:$0xff]  }
   0x3   :  { %v618_v7 = vld [vmem:[%s1090_s2] ss:$0 sm:$0xff]  ;;  %v429_v10 = vunpack.c.l.bf16 %v548_v5  ;;  %v430_v11 = vunpack.c.h.bf16 %v548_v5  ;;  %v433_v14 = vunpack.c.l.bf16 %v549_v6  ;;  %v434_v15 = vunpack.c.h.bf16 %v549_v6  ;;  %v552_v34 = vld [vmem:[%s1088_s0 + $0x30] sm:$0xff]   ;;  %v553_v39 = vld [vmem:[%s1088_s0 + $0x38] sm:$0xff]  }
   0x4   :  { %v149_v12 = vmul.f32 %v421_v2, %v604_v1  ;;  %v150_v13 = vmul.f32 %v422_v3, %v604_v1  ;;  %v151_v16 = vmul.f32 %v425_v8, %v604_v1  ;;  %v152_v17 = vmul.f32 %v426_v9, %v604_v1  ;;  %v550_v28 = vld [vmem:[%s1088_s0 + $0x20] sm:$0xff]   ;;  %v555_v6 = vld [vmem:[%s1088_s0 + $0x48] sm:$0xff]   ;;  %v556_v8 = vld [vmem:[%s1088_s0 + $0x50] sm:$0xff]  }
   0x5   :  { %v153_v18 = vmul.f32 %v429_v10, %v604_v1  ;;  %v154_v19 = vmul.f32 %v430_v11, %v604_v1  ;;  %v155_v22 = vmul.f32 %v433_v14, %v604_v1  ;;  %v156_v23 = vmul.f32 %v434_v15, %v604_v1  ;;  %v554_v0 = vld [vmem:[%s1088_s0 + $0x40] sm:$0xff]  }
   0x6   :  { %v220_v20 = vadd.f32 %v618_v7, %v149_v12  ;;  %v221_v21 = vadd.f32 %v618_v7, %v150_v13  ;;  %v222_v24 = vadd.f32 %v618_v7, %v151_v16  ;;  %v223_v25 = vadd.f32 %v618_v7, %v152_v17  ;;  %v557_v13 = vld [vmem:[%s1088_s0 + $0x58] sm:$0xff]  }
   0x7   :  { %v224_v26 = vadd.f32 %v618_v7, %v153_v18  ;;  %v225_v27 = vadd.f32 %v618_v7, %v154_v19  ;;  %v226_v31 = vadd.f32 %v618_v7, %v155_v22  ;;  %v227_v32 = vadd.f32 %v618_v7, %v156_v23 }
   0x8   :  { %v284_v29 = vmax.f32 %v220_v20, 0.0  ;;  %v285_v30 = vmax.f32 %v221_v21, 0.0  ;;  %v286_v35 = vmax.f32 %v222_v24, 0.0  ;;  %v287_v36 = vmax.f32 %v223_v25, 0.0 }
   0x9   :  { %v288_v37 = vmax.f32 %v224_v26, 0.0  ;;  %v289_v38 = vmax.f32 %v225_v27, 0.0  ;;  %v290_v40 = vmax.f32 %v226_v31, 0.0  ;;  %v291_v41 = vmax.f32 %v227_v32, 0.0 }
   0xa   :  { %349 = vst.msk [vmem:[%s1091_s3] sm:$0xff] %vm348_vm0, %v284_v29  ;;  %350 = vst.msk [vmem:[%s1091_s3 + $0x8] sm:$0xff] %vm348_vm0, %v285_v30  ;;  %v437_v42 = vunpack.c.l.bf16 %v550_v28  ;;  %v438_v43 = vunpack.c.h.bf16 %v550_v28  ;;  %v441_v44 = vunpack.c.l.bf16 %v551_v33  ;;  %v442_v45 = vunpack.c.h.bf16 %v551_v33 }
   0xb   :  { %351 = vst.msk [vmem:[%s1091_s3 + $0x10] sm:$0xff] %vm348_vm0, %v286_v35  ;;  %352 = vst.msk [vmem:[%s1091_s3 + $0x18] sm:$0xff] %vm348_vm0, %v287_v36  ;;  %v445_v46 = vunpack.c.l.bf16 %v552_v34  ;;  %v446_v47 = vunpack.c.h.bf16 %v552_v34  ;;  %v449_v50 = vunpack.c.l.bf16 %v553_v39  ;;  %v450_v51 = vunpack.c.h.bf16 %v553_v39 }
   0xc   :  { %353 = vst.msk [vmem:[%s1091_s3 + $0x20] sm:$0xff] %vm348_vm0, %v288_v37  ;;  %354 = vst.msk [vmem:[%s1091_s3 + $0x28] sm:$0xff] %vm348_vm0, %v289_v38  ;;  %v157_v48 = vmul.f32 %v437_v42, %v604_v1  ;;  %v158_v49 = vmul.f32 %v438_v43, %v604_v1  ;;  %v159_v52 = vmul.f32 %v441_v44, %v604_v1  ;;  %v453_v16 = vunpack.c.l.bf16 %v554_v0  ;;  %v558_v38 = vld [vmem:[%s1088_s0 + $0x60] sm:$0xff]   ;;  %v559_v43 = vld [vmem:[%s1088_s0 + $0x68] sm:$0xff]  }
   0xd   :  { %355 = vst.msk [vmem:[%s1091_s3 + $0x30] sm:$0xff] %vm348_vm0, %v290_v40  ;;  %356 = vst.msk [vmem:[%s1091_s3 + $0x38] sm:$0xff] %vm348_vm0, %v291_v41  ;;  %v160_v53 = vmul.f32 %v442_v45, %v604_v1  ;;  %v161_v54 = vmul.f32 %v445_v46, %v604_v1  ;;  %v162_v55 = vmul.f32 %v446_v47, %v604_v1  ;;  %v454_v17 = vunpack.c.h.bf16 %v554_v0  ;;  %v560_v44 = vld [vmem:[%s1088_s0 + $0x70] sm:$0xff]  }
   0xe   :  { %v228_v56 = vadd.f32 %v618_v7, %v157_v48  ;;  %v229_v57 = vadd.f32 %v618_v7, %v158_v49  ;;  %v163_v58 = vmul.f32 %v449_v50, %v604_v1  ;;  %v164_v59 = vmul.f32 %v450_v51, %v604_v1  ;;  %v561_v49 = vld [vmem:[%s1088_s0 + $0x78] sm:$0xff]  }
   0xf   :  { %v230_v60 = vadd.f32 %v618_v7, %v159_v52  ;;  %v231_v61 = vadd.f32 %v618_v7, %v160_v53  ;;  %v232_v62 = vadd.f32 %v618_v7, %v161_v54  ;;  %v233_v63 = vadd.f32 %v618_v7, %v162_v55 }
  0x10   :  { %v292_v2 = vmax.f32 %v228_v56, 0.0  ;;  %v293_v3 = vmax.f32 %v229_v57, 0.0  ;;  %v234_v4 = vadd.f32 %v618_v7, %v163_v58  ;;  %v235_v5 = vadd.f32 %v618_v7, %v164_v59 }
  0x11   :  { %v294_v9 = vmax.f32 %v230_v60, 0.0  ;;  %v295_v10 = vmax.f32 %v231_v61, 0.0  ;;  %v296_v11 = vmax.f32 %v232_v62, 0.0  ;;  %v297_v12 = vmax.f32 %v233_v63, 0.0 }
  0x12   :  { %357 = vst.msk [vmem:[%s1091_s3 + $0x40] sm:$0xff] %vm348_vm0, %v292_v2  ;;  %358 = vst.msk [vmem:[%s1091_s3 + $0x48] sm:$0xff] %vm348_vm0, %v293_v3  ;;  %v298_v14 = vmax.f32 %v234_v4, 0.0  ;;  %v299_v15 = vmax.f32 %v235_v5, 0.0  ;;  %v457_v18 = vunpack.c.l.bf16 %v555_v6  ;;  %v458_v19 = vunpack.c.h.bf16 %v555_v6 }
  0x13   :  { %359 = vst.msk [vmem:[%s1091_s3 + $0x50] sm:$0xff] %vm348_vm0, %v294_v9  ;;  %360 = vst.msk [vmem:[%s1091_s3 + $0x58] sm:$0xff] %vm348_vm0, %v295_v10  ;;  %v461_v20 = vunpack.c.l.bf16 %v556_v8  ;;  %v462_v21 = vunpack.c.h.bf16 %v556_v8  ;;  %v165_v22 = vmul.f32 %v453_v16, %v604_v1  ;;  %v166_v23 = vmul.f32 %v454_v17, %v604_v1  ;;  %v563_v17 = vld [vmem:[%s1088_s0 + $0x88] sm:$0xff]  }
  0x14   :  { %361 = vst.msk [vmem:[%s1091_s3 + $0x60] sm:$0xff] %vm348_vm0, %v296_v11  ;;  %362 = vst.msk [vmem:[%s1091_s3 + $0x68] sm:$0xff] %vm348_vm0, %v297_v12  ;;  %v465_v24 = vunpack.c.l.bf16 %v557_v13  ;;  %v466_v25 = vunpack.c.h.bf16 %v557_v13  ;;  %v167_v26 = vmul.f32 %v457_v18, %v604_v1  ;;  %v168_v27 = vmul.f32 %v458_v19, %v604_v1  ;;  %v562_v12 = vld [vmem:[%s1088_s0 + $0x80] sm:$0xff]   ;;  %v564_v18 = vld [vmem:[%s1088_s0 + $0x90] sm:$0xff]  }
  0x15   :  { %363 = vst.msk [vmem:[%s1091_s3 + $0x70] sm:$0xff] %vm348_vm0, %v298_v14  ;;  %364 = vst.msk [vmem:[%s1091_s3 + $0x78] sm:$0xff] %vm348_vm0, %v299_v15  ;;  %v169_v28 = vmul.f32 %v461_v20, %v604_v1  ;;  %v170_v29 = vmul.f32 %v462_v21, %v604_v1  ;;  %v236_v30 = vadd.f32 %v618_v7, %v165_v22  ;;  %v469_v52 = vunpack.c.l.bf16 %v558_v38 }
  0x16   :  { %v237_v31 = vadd.f32 %v618_v7, %v166_v23  ;;  %v171_v32 = vmul.f32 %v465_v24, %v604_v1  ;;  %v172_v33 = vmul.f32 %v466_v25, %v604_v1  ;;  %v238_v34 = vadd.f32 %v618_v7, %v167_v26  ;;  %v565_v23 = vld [vmem:[%s1088_s0 + $0x98] sm:$0xff]  }
  0x17   :  { %v239_v35 = vadd.f32 %v618_v7, %v168_v27  ;;  %v240_v36 = vadd.f32 %v618_v7, %v169_v28  ;;  %v241_v37 = vadd.f32 %v618_v7, %v170_v29  ;;  %v300_v39 = vmax.f32 %v236_v30, 0.0 }
  0x18   :  { %v301_v40 = vmax.f32 %v237_v31, 0.0  ;;  %v242_v41 = vadd.f32 %v618_v7, %v171_v32  ;;  %v243_v42 = vadd.f32 %v618_v7, %v172_v33  ;;  %v302_v45 = vmax.f32 %v238_v34, 0.0 }
  0x19   :  { %v303_v46 = vmax.f32 %v239_v35, 0.0  ;;  %v304_v47 = vmax.f32 %v240_v36, 0.0  ;;  %v305_v48 = vmax.f32 %v241_v37, 0.0  ;;  %365 = vst.msk [vmem:[%s1091_s3 + $0x80] sm:$0xff] %vm348_vm0, %v300_v39  ;;  %v470_v53 = vunpack.c.h.bf16 %v558_v38 }
  0x1a   :  { %366 = vst.msk [vmem:[%s1091_s3 + $0x88] sm:$0xff] %vm348_vm0, %v301_v40  ;;  %v306_v50 = vmax.f32 %v242_v41, 0.0  ;;  %v307_v51 = vmax.f32 %v243_v42, 0.0  ;;  %367 = vst.msk [vmem:[%s1091_s3 + $0x90] sm:$0xff] %vm348_vm0, %v302_v45  ;;  %v473_v54 = vunpack.c.l.bf16 %v559_v43  ;;  %v474_v55 = vunpack.c.h.bf16 %v559_v43 }
  0x1b   :  { %368 = vst.msk [vmem:[%s1091_s3 + $0x98] sm:$0xff] %vm348_vm0, %v303_v46  ;;  %369 = vst.msk [vmem:[%s1091_s3 + $0xa0] sm:$0xff] %vm348_vm0, %v304_v47  ;;  %v477_v56 = vunpack.c.l.bf16 %v560_v44  ;;  %v478_v57 = vunpack.c.h.bf16 %v560_v44  ;;  %v173_v58 = vmul.f32 %v469_v52, %v604_v1  ;;  %v174_v59 = vmul.f32 %v470_v53, %v604_v1  ;;  %v567_v53 = vld [vmem:[%s1088_s0 + $0xa8] sm:$0xff]  }
  0x1c   :  { %370 = vst.msk [vmem:[%s1091_s3 + $0xa8] sm:$0xff] %vm348_vm0, %v305_v48  ;;  %371 = vst.msk [vmem:[%s1091_s3 + $0xb0] sm:$0xff] %vm348_vm0, %v306_v50  ;;  %v481_v60 = vunpack.c.l.bf16 %v561_v49  ;;  %v482_v61 = vunpack.c.h.bf16 %v561_v49  ;;  %v175_v62 = vmul.f32 %v473_v54, %v604_v1  ;;  %v176_v63 = vmul.f32 %v474_v55, %v604_v1  ;;  %v566_v48 = vld [vmem:[%s1088_s0 + $0xa0] sm:$0xff]   ;;  %v568_v54 = vld [vmem:[%s1088_s0 + $0xb0] sm:$0xff]  }
  0x1d   :  { %372 = vst.msk [vmem:[%s1091_s3 + $0xb8] sm:$0xff] %vm348_vm0, %v307_v51  ;;  %v177_v0 = vmul.f32 %v477_v56, %v604_v1  ;;  %v178_v2 = vmul.f32 %v478_v57, %v604_v1  ;;  %v244_v3 = vadd.f32 %v618_v7, %v173_v58  ;;  %v245_v4 = vadd.f32 %v618_v7, %v174_v59  ;;  %v569_v59 = vld [vmem:[%s1088_s0 + $0xb8] sm:$0xff]  }
  0x1e   :  { %v179_v5 = vmul.f32 %v481_v60, %v604_v1  ;;  %v180_v6 = vmul.f32 %v482_v61, %v604_v1  ;;  %v246_v8 = vadd.f32 %v618_v7, %v175_v62  ;;  %v247_v9 = vadd.f32 %v618_v7, %v176_v63 }
  0x1f   :  { %v248_v10 = vadd.f32 %v618_v7, %v177_v0  ;;  %v249_v11 = vadd.f32 %v618_v7, %v178_v2  ;;  %v308_v13 = vmax.f32 %v244_v3, 0.0  ;;  %v309_v14 = vmax.f32 %v245_v4, 0.0 }
  0x20   :  { %v250_v15 = vadd.f32 %v618_v7, %v179_v5  ;;  %v251_v16 = vadd.f32 %v618_v7, %v180_v6  ;;  %v310_v19 = vmax.f32 %v246_v8, 0.0  ;;  %v311_v20 = vmax.f32 %v247_v9, 0.0 }
  0x21   :  { %v312_v21 = vmax.f32 %v248_v10, 0.0  ;;  %v313_v22 = vmax.f32 %v249_v11, 0.0  ;;  %373 = vst.msk [vmem:[%s1091_s3 + $0xc0] sm:$0xff] %vm348_vm0, %v308_v13  ;;  %374 = vst.msk [vmem:[%s1091_s3 + $0xc8] sm:$0xff] %vm348_vm0, %v309_v14  ;;  %v485_v26 = vunpack.c.l.bf16 %v562_v12  ;;  %v486_v27 = vunpack.c.h.bf16 %v562_v12 }
  0x22   :  { %v314_v24 = vmax.f32 %v250_v15, 0.0  ;;  %v315_v25 = vmax.f32 %v251_v16, 0.0  ;;  %375 = vst.msk [vmem:[%s1091_s3 + $0xd0] sm:$0xff] %vm348_vm0, %v310_v19  ;;  %376 = vst.msk [vmem:[%s1091_s3 + $0xd8] sm:$0xff] %vm348_vm0, %v311_v20  ;;  %v489_v28 = vunpack.c.l.bf16 %v563_v17  ;;  %v490_v29 = vunpack.c.h.bf16 %v563_v17 }
  0x23   :  { %377 = vst.msk [vmem:[%s1091_s3 + $0xe0] sm:$0xff] %vm348_vm0, %v312_v21  ;;  %378 = vst.msk [vmem:[%s1091_s3 + $0xe8] sm:$0xff] %vm348_vm0, %v313_v22  ;;  %v493_v30 = vunpack.c.l.bf16 %v564_v18  ;;  %v494_v31 = vunpack.c.h.bf16 %v564_v18  ;;  %v181_v32 = vmul.f32 %v485_v26, %v604_v1  ;;  %v182_v33 = vmul.f32 %v486_v27, %v604_v1  ;;  %v570_v22 = vld [vmem:[%s1088_s0 + $0xc0] sm:$0xff]   ;;  %v571_v27 = vld [vmem:[%s1088_s0 + $0xc8] sm:$0xff]  }
  0x24   :  { %379 = vst.msk [vmem:[%s1091_s3 + $0xf0] sm:$0xff] %vm348_vm0, %v314_v24  ;;  %380 = vst.msk [vmem:[%s1091_s3 + $0xf8] sm:$0xff] %vm348_vm0, %v315_v25  ;;  %v497_v34 = vunpack.c.l.bf16 %v565_v23  ;;  %v498_v35 = vunpack.c.h.bf16 %v565_v23  ;;  %v183_v36 = vmul.f32 %v489_v28, %v604_v1  ;;  %v184_v37 = vmul.f32 %v490_v29, %v604_v1  ;;  %v572_v28 = vld [vmem:[%s1088_s0 + $0xd0] sm:$0xff]  }
  0x25   :  { %v185_v38 = vmul.f32 %v493_v30, %v604_v1  ;;  %v186_v39 = vmul.f32 %v494_v31, %v604_v1  ;;  %v252_v40 = vadd.f32 %v618_v7, %v181_v32  ;;  %v253_v41 = vadd.f32 %v618_v7, %v182_v33  ;;  %v573_v33 = vld [vmem:[%s1088_s0 + $0xd8] sm:$0xff]  }
  0x26   :  { %v187_v42 = vmul.f32 %v497_v34, %v604_v1  ;;  %v188_v43 = vmul.f32 %v498_v35, %v604_v1  ;;  %v254_v44 = vadd.f32 %v618_v7, %v183_v36  ;;  %v255_v45 = vadd.f32 %v618_v7, %v184_v37 }
  0x27   :  { %v256_v46 = vadd.f32 %v618_v7, %v185_v38  ;;  %v257_v47 = vadd.f32 %v618_v7, %v186_v39  ;;  %v316_v49 = vmax.f32 %v252_v40, 0.0  ;;  %v317_v50 = vmax.f32 %v253_v41, 0.0 }
  0x28   :  { %v258_v51 = vadd.f32 %v618_v7, %v187_v42  ;;  %v259_v52 = vadd.f32 %v618_v7, %v188_v43  ;;  %v318_v55 = vmax.f32 %v254_v44, 0.0  ;;  %v319_v56 = vmax.f32 %v255_v45, 0.0 }
  0x29   :  { %v320_v57 = vmax.f32 %v256_v46, 0.0  ;;  %v321_v58 = vmax.f32 %v257_v47, 0.0  ;;  %381 = vst.msk [vmem:[%s1091_s3 + $0x100] sm:$0xff] %vm348_vm0, %v316_v49  ;;  %382 = vst.msk [vmem:[%s1091_s3 + $0x108] sm:$0xff] %vm348_vm0, %v317_v50  ;;  %v501_v62 = vunpack.c.l.bf16 %v566_v48  ;;  %v502_v63 = vunpack.c.h.bf16 %v566_v48 }
  0x2a   :  { %v322_v60 = vmax.f32 %v258_v51, 0.0  ;;  %v323_v61 = vmax.f32 %v259_v52, 0.0  ;;  %383 = vst.msk [vmem:[%s1091_s3 + $0x110] sm:$0xff] %vm348_vm0, %v318_v55  ;;  %384 = vst.msk [vmem:[%s1091_s3 + $0x118] sm:$0xff] %vm348_vm0, %v319_v56  ;;  %v505_v0 = vunpack.c.l.bf16 %v567_v53  ;;  %v506_v2 = vunpack.c.h.bf16 %v567_v53 }
  0x2b   :  { %385 = vst.msk [vmem:[%s1091_s3 + $0x120] sm:$0xff] %vm348_vm0, %v320_v57  ;;  %386 = vst.msk [vmem:[%s1091_s3 + $0x128] sm:$0xff] %vm348_vm0, %v321_v58  ;;  %v509_v3 = vunpack.c.l.bf16 %v568_v54  ;;  %v510_v4 = vunpack.c.h.bf16 %v568_v54  ;;  %v189_v5 = vmul.f32 %v501_v62, %v604_v1  ;;  %v190_v6 = vmul.f32 %v502_v63, %v604_v1  ;;  %v574_v58 = vld [vmem:[%s1088_s0 + $0xe0] sm:$0xff]   ;;  %v575_v63 = vld [vmem:[%s1088_s0 + $0xe8] sm:$0xff]  }
  0x2c   :  { %387 = vst.msk [vmem:[%s1091_s3 + $0x130] sm:$0xff] %vm348_vm0, %v322_v60  ;;  %388 = vst.msk [vmem:[%s1091_s3 + $0x138] sm:$0xff] %vm348_vm0, %v323_v61  ;;  %v513_v8 = vunpack.c.l.bf16 %v569_v59  ;;  %v514_v9 = vunpack.c.h.bf16 %v569_v59  ;;  %v191_v10 = vmul.f32 %v505_v0, %v604_v1  ;;  %v192_v11 = vmul.f32 %v506_v2, %v604_v1  ;;  %v576_v0 = vld [vmem:[%s1088_s0 + $0xf0] sm:$0xff]  }
  0x2d   :  { %v193_v12 = vmul.f32 %v509_v3, %v604_v1  ;;  %v194_v13 = vmul.f32 %v510_v4, %v604_v1  ;;  %v260_v14 = vadd.f32 %v618_v7, %v189_v5  ;;  %v261_v15 = vadd.f32 %v618_v7, %v190_v6  ;;  %v577_v6 = vld [vmem:[%s1088_s0 + $0xf8] sm:$0xff]  }
  0x2e   :  { %v195_v16 = vmul.f32 %v513_v8, %v604_v1  ;;  %v196_v17 = vmul.f32 %v514_v9, %v604_v1  ;;  %v262_v18 = vadd.f32 %v618_v7, %v191_v10  ;;  %v263_v19 = vadd.f32 %v618_v7, %v192_v11 }
  0x2f   :  { %v264_v20 = vadd.f32 %v618_v7, %v193_v12  ;;  %v265_v21 = vadd.f32 %v618_v7, %v194_v13  ;;  %v324_v23 = vmax.f32 %v260_v14, 0.0  ;;  %v325_v24 = vmax.f32 %v261_v15, 0.0 }
  0x30   :  { %v266_v25 = vadd.f32 %v618_v7, %v195_v16  ;;  %v267_v26 = vadd.f32 %v618_v7, %v196_v17  ;;  %v326_v29 = vmax.f32 %v262_v18, 0.0  ;;  %v327_v30 = vmax.f32 %v263_v19, 0.0 }
  0x31   :  { %v328_v31 = vmax.f32 %v264_v20, 0.0  ;;  %v329_v32 = vmax.f32 %v265_v21, 0.0  ;;  %389 = vst.msk [vmem:[%s1091_s3 + $0x140] sm:$0xff] %vm348_vm0, %v324_v23  ;;  %390 = vst.msk [vmem:[%s1091_s3 + $0x148] sm:$0xff] %vm348_vm0, %v325_v24  ;;  %v517_v36 = vunpack.c.l.bf16 %v570_v22  ;;  %v518_v37 = vunpack.c.h.bf16 %v570_v22 }
  0x32   :  { %v330_v34 = vmax.f32 %v266_v25, 0.0  ;;  %v331_v35 = vmax.f32 %v267_v26, 0.0  ;;  %391 = vst.msk [vmem:[%s1091_s3 + $0x150] sm:$0xff] %vm348_vm0, %v326_v29  ;;  %392 = vst.msk [vmem:[%s1091_s3 + $0x158] sm:$0xff] %vm348_vm0, %v327_v30  ;;  %v521_v38 = vunpack.c.l.bf16 %v571_v27  ;;  %v522_v39 = vunpack.c.h.bf16 %v571_v27 }
  0x33   :  { %393 = vst.msk [vmem:[%s1091_s3 + $0x160] sm:$0xff] %vm348_vm0, %v328_v31  ;;  %394 = vst.msk [vmem:[%s1091_s3 + $0x168] sm:$0xff] %vm348_vm0, %v329_v32  ;;  %v525_v40 = vunpack.c.l.bf16 %v572_v28  ;;  %v526_v41 = vunpack.c.h.bf16 %v572_v28  ;;  %v197_v42 = vmul.f32 %v517_v36, %v604_v1  ;;  %v198_v43 = vmul.f32 %v518_v37, %v604_v1 }
  0x34   :  { %395 = vst.msk [vmem:[%s1091_s3 + $0x170] sm:$0xff] %vm348_vm0, %v330_v34  ;;  %396 = vst.msk [vmem:[%s1091_s3 + $0x178] sm:$0xff] %vm348_vm0, %v331_v35  ;;  %v529_v44 = vunpack.c.l.bf16 %v573_v33  ;;  %v530_v45 = vunpack.c.h.bf16 %v573_v33  ;;  %v199_v46 = vmul.f32 %v521_v38, %v604_v1  ;;  %v200_v47 = vmul.f32 %v522_v39, %v604_v1 }
  0x35   :  { %v201_v48 = vmul.f32 %v525_v40, %v604_v1  ;;  %v202_v49 = vmul.f32 %v526_v41, %v604_v1  ;;  %v268_v50 = vadd.f32 %v618_v7, %v197_v42  ;;  %v269_v51 = vadd.f32 %v618_v7, %v198_v43 }
  0x36   :  { %v203_v52 = vmul.f32 %v529_v44, %v604_v1  ;;  %v204_v53 = vmul.f32 %v530_v45, %v604_v1  ;;  %v270_v54 = vadd.f32 %v618_v7, %v199_v46  ;;  %v271_v55 = vadd.f32 %v618_v7, %v200_v47 }
  0x37   :  { %v272_v56 = vadd.f32 %v618_v7, %v201_v48  ;;  %v273_v57 = vadd.f32 %v618_v7, %v202_v49  ;;  %v332_v59 = vmax.f32 %v268_v50, 0.0  ;;  %v333_v60 = vmax.f32 %v269_v51, 0.0 }
  0x38   :  { %v274_v61 = vadd.f32 %v618_v7, %v203_v52  ;;  %v275_v62 = vadd.f32 %v618_v7, %v204_v53  ;;  %v334_v2 = vmax.f32 %v270_v54, 0.0  ;;  %v335_v3 = vmax.f32 %v271_v55, 0.0 }
  0x39   :  { %v336_v4 = vmax.f32 %v272_v56, 0.0  ;;  %v337_v5 = vmax.f32 %v273_v57, 0.0  ;;  %397 = vst.msk [vmem:[%s1091_s3 + $0x180] sm:$0xff] %vm348_vm0, %v332_v59  ;;  %398 = vst.msk [vmem:[%s1091_s3 + $0x188] sm:$0xff] %vm348_vm0, %v333_v60  ;;  %v533_v10 = vunpack.c.l.bf16 %v574_v58  ;;  %v534_v11 = vunpack.c.h.bf16 %v574_v58 }
  0x3a   :  { %v338_v8 = vmax.f32 %v274_v61, 0.0  ;;  %v339_v9 = vmax.f32 %v275_v62, 0.0  ;;  %399 = vst.msk [vmem:[%s1091_s3 + $0x190] sm:$0xff] %vm348_vm0, %v334_v2  ;;  %400 = vst.msk [vmem:[%s1091_s3 + $0x198] sm:$0xff] %vm348_vm0, %v335_v3  ;;  %v537_v12 = vunpack.c.l.bf16 %v575_v63  ;;  %v538_v13 = vunpack.c.h.bf16 %v575_v63 }
  0x3b   :  { %401 = vst.msk [vmem:[%s1091_s3 + $0x1a0] sm:$0xff] %vm348_vm0, %v336_v4  ;;  %402 = vst.msk [vmem:[%s1091_s3 + $0x1a8] sm:$0xff] %vm348_vm0, %v337_v5  ;;  %v541_v14 = vunpack.c.l.bf16 %v576_v0  ;;  %v542_v15 = vunpack.c.h.bf16 %v576_v0  ;;  %v205_v16 = vmul.f32 %v533_v10, %v604_v1  ;;  %v206_v17 = vmul.f32 %v534_v11, %v604_v1 }
  0x3c   :  { %403 = vst.msk [vmem:[%s1091_s3 + $0x1b0] sm:$0xff] %vm348_vm0, %v338_v8  ;;  %404 = vst.msk [vmem:[%s1091_s3 + $0x1b8] sm:$0xff] %vm348_vm0, %v339_v9  ;;  %v545_v18 = vunpack.c.l.bf16 %v577_v6  ;;  %v546_v19 = vunpack.c.h.bf16 %v577_v6  ;;  %v207_v20 = vmul.f32 %v537_v12, %v604_v1  ;;  %v208_v21 = vmul.f32 %v538_v13, %v604_v1 }
  0x3d   :  { %v209_v22 = vmul.f32 %v541_v14, %v604_v1  ;;  %v210_v23 = vmul.f32 %v542_v15, %v604_v1  ;;  %v276_v24 = vadd.f32 %v618_v7, %v205_v16  ;;  %v277_v25 = vadd.f32 %v618_v7, %v206_v17 }
  0x3e   :  { %v211_v26 = vmul.f32 %v545_v18, %v604_v1  ;;  %v212_v27 = vmul.f32 %v546_v19, %v604_v1  ;;  %v278_v28 = vadd.f32 %v618_v7, %v207_v20  ;;  %v279_v29 = vadd.f32 %v618_v7, %v208_v21 }
  0x3f   :  { %v280_v30 = vadd.f32 %v618_v7, %v209_v22  ;;  %v281_v31 = vadd.f32 %v618_v7, %v210_v23  ;;  %v340_v32 = vmax.f32 %v276_v24, 0.0  ;;  %v341_v33 = vmax.f32 %v277_v25, 0.0 }
  0x40   :  { %v282_v34 = vadd.f32 %v618_v7, %v211_v26  ;;  %v283_v35 = vadd.f32 %v618_v7, %v212_v27  ;;  %v342_v36 = vmax.f32 %v278_v28, 0.0  ;;  %v343_v37 = vmax.f32 %v279_v29, 0.0 }
  0x41   :  { %v344_v38 = vmax.f32 %v280_v30, 0.0  ;;  %v345_v39 = vmax.f32 %v281_v31, 0.0  ;;  %405 = vst.msk [vmem:[%s1091_s3 + $0x1c0] sm:$0xff] %vm348_vm0, %v340_v32  ;;  %406 = vst.msk [vmem:[%s1091_s3 + $0x1c8] sm:$0xff] %vm348_vm0, %v341_v33 }
  0x42   :  { %v346_v1 = vmax.f32 %v282_v34, 0.0  ;;  %v347_v40 = vmax.f32 %v283_v35, 0.0  ;;  %407 = vst.msk [vmem:[%s1091_s3 + $0x1d0] sm:$0xff] %vm348_vm0, %v342_v36  ;;  %408 = vst.msk [vmem:[%s1091_s3 + $0x1d8] sm:$0xff] %vm348_vm0, %v343_v37 }
  0x43   :  { %409 = vst.msk [vmem:[%s1091_s3 + $0x1e0] sm:$0xff] %vm348_vm0, %v344_v38  ;;  %410 = vst.msk [vmem:[%s1091_s3 + $0x1e8] sm:$0xff] %vm348_vm0, %v345_v39 }
  0x44   :  { %411 = vst.msk [vmem:[%s1091_s3 + $0x1f0] sm:$0xff] %vm348_vm0, %v346_v1  ;;  %412 = vst.msk [vmem:[%s1091_s3 + $0x1f8] sm:$0xff] %vm348_vm0, %v347_v40 }

// kernel: double_conv.4
= control target key start
LH: loop header
LB: loop body
LE: loop exit
PB: predicated region body
PF: predicated region fallthrough
CT: control target
= control target key end

     0   :  { %s4462_s15 = smov 0   ;;  %s5598_s0 = inlined_call_operand.vmem [shape: bf16[2,18,18,4], index: 0, kind: input, shape index: {}]   ;;  %s5599_s1 = inlined_call_operand.vmem [shape: bf16[9,4,8], index: 1, kind: input, shape index: {}]   ;;  %s5600_s2 = inlined_call_operand.vmem [shape: bf16[512,8], index: 2, kind: output, shape index: {0}]   ;;  %s5601_s3 = inlined_call_operand.vmem [shape: f32[2,1,8], index: 3, kind: output, shape index: {1}]   ;;  %s5602_s4 = inlined_call_operand.vmem [shape: f32[2,1,8], index: 4, kind: output, shape index: {2}]  }
   0x1 LB: > { %s4468_s16 = sadd.s32 4294967295, %s4435_s15   ;;  %p3377_p0 = scmp.ge.s32.totalorder %s4435_s15, 1  ;;  %s4435_s15 = sphi %s4462_s15, %s15_s15  }
   0x2   : > { %p167_p1 = scmp.lt.s32.totalorder %s4435_s15, 3 }
   0x4   : > { %p168_p2 = pnand %p3377_p0, %p167_p1 }
   0x6   : > { %171 = sbr.rel (%p168_p2) target bundleno = 571 (0x23b), region = 28 }
   0xd   : > { %v3381_v0 = vld [vmem:[%s5599_s1 + $0x2] sm:$0x3]  ;;  %vm758_vm0 = vcmask 1041408   ;;  %v3513_v1 = vld [vmem:[%s5599_s1 + $0x8] sm:$0x3]  ;;  %p199_p3 = scmp.lt.s32.totalorder %s4468_s16, 1 }
   0xe   : > { %4388 = vmatprep.subr.msk.bf16.mxu1 %vm758_vm0, %v3381_v0  ;;  %4392 = vmatprep.subr.msk.bf16.mxu0 %vm758_vm0, %v3513_v1  ;;  %v760_v2 = vsel %vm758_vm0, %v3381_v0, 0  ;;  %v4483_v3 = vsel %vm758_vm0, %v3513_v1, 0  ;;  %v271_v4 = vld [vmem:[%s5599_s1] sm:$0x3]  ;;  %v3532_v5 = vld [vmem:[%s5599_s1 + $0xa] sm:$0x3] }
   0xf   : > { %5634 = vst [vmem:[#allocation2_spill] sm:$0xff] %v4483_v3  ;;  %3825 = vmatpush3.bf16.msra.mxu1 %v760_v2  ;;  %3961 = vmatpush3.bf16.msra.mxu0 %v4483_v3  ;;  %s4487_s21 = scalar_select %p199_p3, %s4468_s16, 1  ;;  %vm272_vm1 = vsmask.f32 3328  ;;  %vm273_vm2 = vsmask.f32 7440 }
  0x10   : > { %4389 = vmatprep.subr.msk.bf16.mxu1 %vm758_vm0, %v271_v4  ;;  %4394 = vmatprep.subr.msk.bf16.mxu0 %vm758_vm0, %v3532_v5  ;;  %v4504_v6 = vsel %vm758_vm0, %v271_v4, 0  ;;  %v4507_v7 = vsel %vm758_vm0, %v3532_v5, 0  ;;  %v4512_v8 = vld [vmem:[%s5599_s1 + $0xc] sm:$0x3]  ;;  %vm709_vm3 = vcmask 31744   ;;  %vm4548_vm4 = vmor %vm272_vm1, %vm273_vm2  ;;  %vm1231_vm5 = vcmask 1042432  }
  0x11   : > { %s4398_s26 = smul.u32 216, %s4487_s21  ;;  %v4536_v20 = vsel %vm758_vm0, %v4512_v8, 0  ;;  %vm1232_vm6 = vcmask 1046532   ;;  %s3379_s18 = sshll.u32 %s4468_s16, 5  ;;  %vm3060_vm8 = vcmask 60416   ;;  %vm3093_vm9 = vcmask 64512  }
  0x12   : > { %vm4729_vm7 = vmor %vm1231_vm5, %vm1232_vm6  ;;  %p205_p4 = scmp.lt.s32.totalorder %s3379_s18, 63  ;;  %s212_s25 = scalar_lea.vmem %s5601_s3, %s4487_s21  ;;  %vm3163_vm10 = vcmask 57344  }
  0x13   : > { %s4501_s29 = scalar_lea.vmem %s5598_s0, %s4398_s26  ;;  %s215_s28 = scalar_lea.vmem %s5602_s4, %s4487_s21 }
  0x14   : > { %v4515_v9 = vld [vmem:[%s4501_s29] sm:$0xf]  ;;  %v4518_v10 = vld [vmem:[%s4501_s29 + $0x4] sm:$0xf]  ;;  %v219_v11 = vld [vmem:[%s4501_s29 + $0x8] sm:$0x1] }
  0x15   : > { %v276_v12 = vshrl.u32 %v4515_v9, 16  ;;  %v279_v13 = vshll.u32 %v4515_v9, 16  ;;  %v285_v14 = vshll.u32 %v4518_v10, 16  ;;  %v289_v15 = vshrl.u32 %v4518_v10, 16  ;;  %v4526_v16 = vld [vmem:[%s4501_s29 + $0xc] sm:$0xf] }
  0x16   : > { %v295_v17 = vshll.u32 %v219_v11, 16  ;;  %v4529_v18 = vld [vmem:[%s4501_s29 + $0x10] sm:$0xf]  ;;  %v4532_v19 = vld [vmem:[%s4501_s29 + $0x14] sm:$0x1]  ;;  %v300_v26 = vshrl.u32 %v4526_v16, 16 }
  0x17   : > { %v278_v21 = vrot.slane %v276_v12, 4  ;;  %v281_v22 = vrot.slane %v279_v13, 5  ;;  %v287_v23 = vrot.slane %v285_v14, 5  ;;  %v291_v24 = vrot.slane %v289_v15, 4  ;;  %v4544_v33 = vld [vmem:[%s4501_s29 + $0x18] sm:$0xf] }
  0x18   : > { %v297_v25 = vrot.slane %v295_v17, 5  ;;  %v303_v27 = vshll.u32 %v4526_v16, 16  ;;  %v309_v28 = vshll.u32 %v4529_v18, 16  ;;  %v313_v31 = vshrl.u32 %v4529_v18, 16  ;;  %v4557_v39 = vld [vmem:[%s4501_s29 + $0x1c] sm:$0xf] }
  0x19   : > { %v282_v29 = vor.u32 %v281_v22, %v278_v21  ;;  %v292_v30 = vor.u32 %v291_v24, %v287_v23  ;;  %v319_v32 = vshll.u32 %v4532_v19, 16  ;;  %v302_v35 = vrot.slane %v300_v26, 4  ;;  %v4561_v46 = vld [vmem:[%s4501_s29 + $0x20] sm:$0x1]  ;;  %v4571_v57 = vld [vmem:[%s4501_s29 + $0x24] sm:$0xf] }
  0x1a   : > { %v305_v36 = vrot.slane %v303_v27, 5  ;;  %v311_v37 = vrot.slane %v309_v28, 5  ;;  %v4554_v38 = vcombine.low %v4526_v16, %v4529_v18  ;;  %v315_v42 = vrot.slane %v313_v31, 4  ;;  %v4576_v62 = vld [vmem:[%s4501_s29 + $0x28] sm:$0xf]  ;;  %s5681_s18 = smov (!%p205_p4, %s3379_s18), 63 }
  0x1b   : > { %v283_v40 = vrot.slane %v282_v29, 4  ;;  %v293_v41 = vrot.slane %v292_v30, 4  ;;  %v321_v43 = vrot.slane %v319_v32, 5  ;;  %v1246_v45 = vrot.slane %v4532_v19, 5  ;;  %v4584_v4 = vld [vmem:[%s4501_s29 + $0x2c] sm:$0x1] }
  0x1c   : > { %v306_v44 = vor.u32 %v305_v36, %v302_v35  ;;  %v324_v47 = vshrl.u32 %v4544_v33, 16  ;;  %v327_v48 = vshll.u32 %v4544_v33, 16  ;;  %v316_v51 = vor.u32 %v315_v42, %v311_v37  ;;  %v4590_v14 = vld [vmem:[%s4501_s29 + $0x30] sm:$0xf]  ;;  %v4602_v28 = vld [vmem:[%s4501_s29 + $0x34] sm:$0xf] }
  0x1d   : > { %v288_v49 = vsel %vm4548_vm4, %v283_v40, %v287_v23  ;;  %v298_v50 = vsel %vm4548_vm4, %v293_v41, %v297_v25  ;;  %v333_v52 = vshll.u32 %v4557_v39, 16  ;;  %v337_v60 = vshrl.u32 %v4557_v39, 16  ;;  %v4597_v23 = vld [vmem:[%s5599_s1 + $0x4] sm:$0x3]  ;;  %v4609_v32 = vld [vmem:[%s4501_s29 + $0x38] sm:$0x1] }
  0x1e   : > { %v3382_v53 = vcombine.low %v288_v49, %v298_v50  ;;  %v307_v54 = vrot.slane %v306_v44, 4  ;;  %v326_v55 = vrot.slane %v324_v47, 4  ;;  %v329_v56 = vrot.slane %v327_v48, 5  ;;  %v4617_v48 = vld [vmem:[%s4501_s29 + $0x3c] sm:$0xf]  ;;  %s3380_s19 = sshll.u32 %s5681_s18, 2 }
  0x1f   : > { %v317_v58 = vrot.slane %v316_v51, 4  ;;  %v335_v59 = vrot.slane %v333_v52, 5  ;;  %v343_v61 = vshll.u32 %v4561_v46, 16  ;;  %v1250_v1 = vrot.slane %v4557_v39, 5  ;;  %v4625_v52 = vld [vmem:[%s4501_s29 + $0x40] sm:$0xf]  ;;  %s5449_s23 = scalar_lea.vmem %s5600_s2, %s3380_s19 }
  0x20   : > { %3826 = vmatprep.mubr.msk.bf16.mxu1 %vm709_vm3, %v3382_v53  ;;  %v312_v63 = vsel %vm4548_vm4, %v307_v54, %v311_v37  ;;  %v330_v0 = vor.u32 %v329_v56, %v326_v55  ;;  %v1253_v2 = vrot.slane %v4561_v46, 5  ;;  %v339_v11 = vrot.slane %v337_v60, 4 }
  0x21   : > { %v322_v5 = vsel %vm4548_vm4, %v317_v58, %v321_v43  ;;  %v345_v12 = vrot.slane %v343_v61, 5  ;;  %v348_v13 = vshrl.u32 %v4571_v57, 16  ;;  %v351_v21 = vshll.u32 %v4571_v57, 16 }
  0x22   : > { %v3383_v15 = vcombine.low %v312_v63, %v322_v5  ;;  %v331_v17 = vrot.slane %v330_v0, 4  ;;  %v357_v22 = vshll.u32 %v4576_v62, 16  ;;  %v340_v24 = vor.u32 %v339_v11, %v335_v59  ;;  %v4637_v5 = vld [vmem:[%s4501_s29 + $0x44] sm:$0x1] }
  0x23   : > { %v350_v25 = vrot.slane %v348_v13, 4  ;;  %v361_v26 = vshrl.u32 %v4576_v62, 16  ;;  %v367_v27 = vshll.u32 %v4584_v4, 16  ;;  %v353_v30 = vrot.slane %v351_v21, 5  ;;  %v4642_v13 = vld [vmem:[%s4501_s29 + $0x48] sm:$0xf] }
  0x24   : > { %3962 = vmatprep.mubr.msk.bf16.mxu0 %vm709_vm3, %v3383_v15  ;;  %3827 = vmatmul.mubr.msk.bf16.vlgmr.msra.gmra.mrb[0].mxu1 %vm709_vm3, %v3383_v15  ;;  %v336_v29 = vsel %vm4548_vm4, %v331_v17, %v335_v59  ;;  %v359_v31 = vrot.slane %v357_v22, 5  ;;  %v372_v35 = vshrl.u32 %v4590_v14, 16  ;;  %v341_v36 = vrot.slane %v340_v24, 4  ;;  %v4649_v24 = vld [vmem:[%s4501_s29 + $0x4c] sm:$0xf] }
  0x25   : > { %3859 = vmatpush3.bf16.msra.mxu1 %v4504_v6  ;;  %v363_v37 = vrot.slane %v361_v26, 4  ;;  %v369_v40 = vrot.slane %v367_v27, 5  ;;  %v375_v41 = vshll.u32 %v4590_v14, 16  ;;  %v354_v42 = vor.u32 %v353_v30, %v350_v25 }
  0x26   : > { %v374_v43 = vrot.slane %v372_v35, 4  ;;  %v381_v44 = vshll.u32 %v4602_v28, 16  ;;  %v385_v47 = vshrl.u32 %v4602_v28, 16  ;;  %4390 = vmatprep.subr.msk.bf16.mxu1 %vm758_vm0, %v4597_v23  ;;  %v346_v49 = vsel %vm4548_vm4, %v341_v36, %v345_v12 }
  0x27   : > { %v364_v6 = vor.u32 %v363_v37, %v359_v31  ;;  %v377_v50 = vrot.slane %v375_v41, 5  ;;  %v391_v51 = vshll.u32 %v4609_v32, 16  ;;  %v4627_v53 = vcombine.low %v336_v29, %v346_v49 }
  0x28   : > { %v355_v54 = vrot.slane %v354_v42, 4  ;;  %v383_v55 = vrot.slane %v381_v44, 5  ;;  %v387_v56 = vrot.slane %v385_v47, 4  ;;  %v396_v61 = vshrl.u32 %v4617_v48, 16  ;;  %v4671_v42 = vld [vmem:[%s4501_s29 + $0x54] sm:$0xf] }
  0x29   : > { %5637 = vst [vmem:[#allocation3_spill] sm:$0xff] %v4627_v53  ;;  %v365_v58 = vrot.slane %v364_v6, 4  ;;  %v378_v59 = vor.u32 %v377_v50, %v374_v43  ;;  %v393_v60 = vrot.slane %v391_v51, 5  ;;  %3963 = vmatmul.mubr.msk.bf16.vlgmr.msra.gmra.mrb[0].mxu0 %vm709_vm3, %v4627_v53  ;;  %3830 = vmatprep.mubr.msk.bf16.mxu1 %vm709_vm3, %v4627_v53  ;;  %v399_v11 = vshll.u32 %v4617_v48, 16  ;;  %5639 = vst [vmem:[#allocation5_spill] sm:$0xff] %v4671_v42 }
  0x2a   : > { %v360_v63 = vsel %vm4548_vm4, %v355_v54, %v359_v31  ;;  %v388_v0 = vor.u32 %v387_v56, %v383_v55  ;;  %v405_v12 = vshll.u32 %v4625_v52, 16  ;;  %3995 = vmatpush3.bf16.msra.mxu0 %v4507_v7  ;;  %v398_v21 = vrot.slane %v396_v61, 4  ;;  %v4676_v6 = vld [vmem:[%s4501_s29 + $0x58] sm:$0xf] }
  0x2b   : > { %v370_v15 = vsel %vm4548_vm4, %v365_v58, %v369_v40  ;;  %v379_v17 = vrot.slane %v378_v59, 4  ;;  %v409_v22 = vshrl.u32 %v4625_v52, 16  ;;  %v401_v27 = vrot.slane %v399_v11, 5  ;;  %4395 = vmatprep.subr.msk.bf16.mxu0 %vm758_vm0, %v4512_v8  ;;  %v4666_v8 = vld [vmem:[%s4501_s29 + $0x50] sm:$0x1] }
  0x2c   : > { %v4651_v25 = vcombine.low %v360_v63, %v370_v15  ;;  %v389_v26 = vrot.slane %v388_v0, 4  ;;  %v407_v29 = vrot.slane %v405_v12, 5  ;;  %v415_v31 = vshll.u32 %v4637_v5, 16  ;;  %v4689_v11 = vld [vmem:[%s4501_s29 + $0x5c] sm:$0x1] }
  0x2d   : > { %v384_v7 = vsel %vm4548_vm4, %v379_v17, %v383_v55  ;;  %v411_v30 = vrot.slane %v409_v22, 4  ;;  %v420_v35 = vshrl.u32 %v4642_v13, 16  ;;  %v402_v37 = vor.u32 %v401_v27, %v398_v21  ;;  %v4693_v15 = vld [vmem:[%s4501_s29 + $0x60] sm:$0xf]  ;;  %v4698_v27 = vld [vmem:[%s4501_s29 + $0x64] sm:$0xf] }
  0x2e   : > { %5638 = vst [vmem:[#allocation4_spill] sm:$0xff] %v4651_v25  ;;  %3966 = vmatprep.mubr.msk.bf16.mxu0 %vm709_vm3, %v4651_v25  ;;  %3831 = vmatmul.mubr.msk.bf16.gmra.mrb[4].mxu1 %vm709_vm3, %v4651_v25  ;;  %v394_v36 = vsel %vm4548_vm4, %v389_v26, %v393_v60  ;;  %v423_v40 = vshll.u32 %v4642_v13, 16  ;;  %v429_v41 = vshll.u32 %v4649_v24, 16  ;;  %v417_v47 = vrot.slane %v415_v31, 5  ;;  %v4910_v25 = vld [vmem:[%s4501_s29 + $0xa8] sm:$0xf] }
  0x2f   : > { %v4673_v43 = vcombine.low %v384_v7, %v394_v36  ;;  %v412_v44 = vor.u32 %v411_v30, %v407_v29  ;;  %v422_v49 = vrot.slane %v420_v35, 4  ;;  %v403_v50 = vrot.slane %v402_v37, 4 }
  0x30   : > { %v425_v51 = vrot.slane %v423_v40, 5  ;;  %v431_v54 = vrot.slane %v429_v41, 5  ;;  %v433_v55 = vshrl.u32 %v4649_v24, 16  ;;  %v439_v58 = vshll.u32 %v4666_v8, 16 }
  0x31   : > { %5640 = vst [vmem:[#allocation6_spill] sm:$0xff] %v4673_v43  ;;  %3834 = vmatprep.mubr.msk.bf16.mxu1 %vm709_vm3, %v4673_v43  ;;  %v413_v56 = vrot.slane %v412_v44, 4  ;;  %v444_v59 = vshrl.u32 %v4671_v42, 16  ;;  %v447_v60 = vshll.u32 %v4671_v42, 16  ;;  %3967 = vmatmul.mubr.msk.bf16.gmra.mrb[4].mxu0 %vm709_vm3, %v4673_v43  ;;  %v408_v61 = vsel %vm4548_vm4, %v403_v50, %v407_v29 }
  0x32   : > { %v426_v63 = vor.u32 %v425_v51, %v422_v49  ;;  %v435_v0 = vrot.slane %v433_v55, 4  ;;  %v453_v12 = vshll.u32 %v4676_v6, 16  ;;  %v441_v21 = vrot.slane %v439_v58, 5 }
  0x33   : > { %v418_v17 = vsel %vm4548_vm4, %v413_v56, %v417_v47  ;;  %v446_v22 = vrot.slane %v444_v59, 4  ;;  %v449_v26 = vrot.slane %v447_v60, 5  ;;  %v457_v36 = vshrl.u32 %v4676_v6, 16  ;;  %v4712_v47 = vld [vmem:[%s4501_s29 + $0x68] sm:$0x1] }
  0x34   : > { %v4700_v7 = vcombine.low %v408_v61, %v418_v17  ;;  %v427_v29 = vrot.slane %v426_v63, 4  ;;  %v436_v30 = vor.u32 %v435_v0, %v431_v54  ;;  %v455_v31 = vrot.slane %v453_v12, 5 }
  0x35   : > { %v450_v35 = vor.u32 %v449_v26, %v446_v22  ;;  %v463_v37 = vshll.u32 %v4689_v11, 16  ;;  %v468_v40 = vshrl.u32 %v4693_v15, 16  ;;  %v471_v49 = vshll.u32 %v4693_v15, 16 }
  0x36   : > { %5641 = vst [vmem:[#allocation7_spill] sm:$0xff] %v4700_v7  ;;  %3970 = vmatprep.mubr.msk.bf16.mxu0 %vm709_vm3, %v4700_v7  ;;  %3835 = vmatmul.mubr.msk.bf16.gmra.mrb[8].mxu1 %vm709_vm3, %v4700_v7  ;;  %v432_v41 = vsel %vm4548_vm4, %v427_v29, %v431_v54  ;;  %v437_v44 = vrot.slane %v436_v30, 4  ;;  %v477_v50 = vshll.u32 %v4698_v27, 16  ;;  %v459_v55 = vrot.slane %v457_v36, 4  ;;  %v4720_v54 = vld [vmem:[%s4501_s29 + $0x6c] sm:$0xf] }
  0x37   : > { %v451_v51 = vrot.slane %v450_v35, 4  ;;  %v465_v56 = vrot.slane %v463_v37, 5  ;;  %v470_v58 = vrot.slane %v468_v40, 4  ;;  %v473_v60 = vrot.slane %v471_v49, 5  ;;  %v4736_v36 = vld [vmem:[%s4501_s29 + $0x70] sm:$0xf] }
  0x38   : > { %v442_v59 = vsel %vm4548_vm4, %v437_v44, %v441_v21  ;;  %v479_v61 = vrot.slane %v477_v50, 5  ;;  %v481_v63 = vshrl.u32 %v4698_v27, 16  ;;  %v460_v17 = vor.u32 %v459_v55, %v455_v31  ;;  %v4887_v7 = vld [vmem:[%s4501_s29 + $0xa0] sm:$0xf] }
  0x39   : > { %v4722_v0 = vcombine.low %v432_v41, %v442_v59  ;;  %v456_v12 = vsel %vm4548_vm4, %v451_v51, %v455_v31  ;;  %v487_v22 = vshll.u32 %v4712_v47, 16  ;;  %v474_v21 = vor.u32 %v473_v60, %v470_v58  ;;  %v4749_v51 = vld [vmem:[%s4501_s29 + $0x74] sm:$0x1] }
  0x3a   : > { %v483_v29 = vrot.slane %v481_v63, 4  ;;  %v3447_v30 = vrot.slane %v4526_v16, 9  ;;  %v1243_v35 = vrot.slane %v4529_v18, 5  ;;  %v461_v31 = vrot.slane %v460_v17, 4 }
  0x3b   : > { %5642 = vst [vmem:[#allocation8_spill] sm:$0xff] %v4722_v0  ;;  %3971 = vmatmul.mubr.msk.bf16.gmra.mrb[8].mxu0 %vm709_vm3, %v4722_v0  ;;  %3838 = vmatprep.mubr.msk.bf16.mxu1 %vm709_vm3, %v4722_v0  ;;  %v489_v37 = vrot.slane %v487_v22, 5  ;;  %v492_v40 = vshrl.u32 %v4720_v54, 16  ;;  %v495_v41 = vshll.u32 %v4720_v54, 16  ;;  %v475_v44 = vrot.slane %v474_v21, 4 }
  0x3c   : > { %v484_v49 = vor.u32 %v483_v29, %v479_v61  ;;  %v1244_v16 = vsel %vm4729_vm7, %v3447_v30, %v1243_v35  ;;  %v1245_v18 = vrot.slane %v1243_v35, 4  ;;  %v466_v50 = vsel %vm4548_vm4, %v461_v31, %v465_v56  ;;  %v4761_v56 = vld [vmem:[%s4501_s29 + $0x78] sm:$0xf]  ;;  %v4777_v31 = vld [vmem:[%s4501_s29 + $0x7c] sm:$0xf] }
  0x3d   : > { %v494_v55 = vrot.slane %v492_v40, 4  ;;  %v497_v58 = vrot.slane %v495_v41, 5  ;;  %v501_v59 = vshll.u32 %v4736_v36, 16  ;;  %v4752_v60 = vcombine.low %v456_v12, %v466_v50 }
  0x3e   : > { %v480_v63 = vsel %vm4548_vm4, %v475_v44, %v479_v61  ;;  %v485_v17 = vrot.slane %v484_v49, 4  ;;  %v1247_v22 = vsel %vm4729_vm7, %v1245_v18, %v1246_v45  ;;  %v505_v35 = vshrl.u32 %v4736_v36, 16  ;;  %v4782_v49 = vld [vmem:[%s4501_s29 + $0x80] sm:$0x1] }
  0x3f   : > { %5645 = vst [vmem:[#allocation9_spill] sm:$0xff] %v4752_v60  ;;  %v4763_v21 = vcombine.low %v1244_v16, %v1247_v22  ;;  %v498_v29 = vor.u32 %v497_v58, %v494_v55  ;;  %v503_v30 = vrot.slane %v501_v59, 5  ;;  %3974 = vmatprep.mubr.msk.bf16.mxu0 %vm709_vm3, %v4752_v60  ;;  %3839 = vmatmul.mubr.msk.bf16.gmra.mrb[12].mxu1 %vm709_vm3, %v4752_v60  ;;  %v511_v45 = vshll.u32 %v4749_v51, 16  ;;  %v4880_v60 = vld [vmem:[%s4501_s29 + $0x9c] sm:$0xf] }
  0x40   : > { %v490_v19 = vsel %vm4548_vm4, %v485_v17, %v489_v37  ;;  %v3448_v61 = vrot.slane %v4544_v33, 9  ;;  %v1252_v12 = vrot.slane %v1250_v1, 4  ;;  %v507_v44 = vrot.slane %v505_v35, 4 }
  0x41   : > { %5646 = vst [vmem:[#allocation10_spill] sm:$0xff] %v4763_v21  ;;  %v4779_v40 = vcombine.low %v480_v63, %v490_v19  ;;  %v499_v41 = vrot.slane %v498_v29, 4  ;;  %v516_v16 = vshrl.u32 %v4761_v56, 16  ;;  %v513_v18 = vrot.slane %v511_v45, 5  ;;  %v4808_v29 = vld [vmem:[%s4501_s29 + $0x84] sm:$0xf] }
  0x42   : > { %v1251_v37 = vsel %vm4729_vm7, %v3448_v61, %v1250_v1  ;;  %v1254_v50 = vsel %vm4729_vm7, %v1252_v12, %v1253_v2  ;;  %v519_v55 = vshll.u32 %v4761_v56, 16  ;;  %v508_v59 = vor.u32 %v507_v44, %v503_v30 }
  0x43   : > { %5647 = vst [vmem:[#allocation11_spill] sm:$0xff] %v4779_v40  ;;  %3975 = vmatmul.mubr.msk.bf16.gmra.mrb[12].mxu0 %vm709_vm3, %v4779_v40  ;;  %3842 = vmatprep.mubr.msk.bf16.mxu1 %vm709_vm3, %v4779_v40  ;;  %v504_v58 = vsel %vm4548_vm4, %v499_v41, %v503_v30  ;;  %v4800_v63 = vcombine.low %v1251_v37, %v1254_v50  ;;  %v518_v1 = vrot.slane %v516_v16, 4  ;;  %v525_v2 = vshll.u32 %v4777_v31, 16  ;;  %v4814_v16 = vld [vmem:[%s4501_s29 + $0x88] sm:$0xf] }
  0x44   : > { %3996 = vmatprep.mubr.msk.bf16.mxu0 %vm709_vm3, %v4763_v21  ;;  %v521_v46 = vrot.slane %v519_v55, 5  ;;  %v529_v17 = vshrl.u32 %v4777_v31, 16  ;;  %v535_v22 = vshll.u32 %v4782_v49, 16  ;;  %v509_v35 = vrot.slane %v508_v59, 4 }
  0x45   : > { %5648 = vst [vmem:[#allocation12_spill] sm:$0xff] %v4800_v63  ;;  %v3449_v30 = vrot.slane %v4571_v57, 9  ;;  %v1257_v19 = vrot.slane %v4576_v62, 5  ;;  %v1260_v45 = vrot.slane %v4584_v4, 5  ;;  %v527_v12 = vrot.slane %v525_v2, 5 }
  0x46   : > { %v522_v61 = vor.u32 %v521_v46, %v518_v1  ;;  %v531_v41 = vrot.slane %v529_v17, 4  ;;  %v537_v44 = vrot.slane %v535_v22, 5  ;;  %v514_v37 = vsel %vm4548_vm4, %v509_v35, %v513_v18  ;;  %v4824_v1 = vld [vmem:[%s4501_s29 + $0x8c] sm:$0x1] }
  0x47   : > { %v1258_v50 = vsel %vm4729_vm7, %v3449_v30, %v1257_v19  ;;  %v1259_v55 = vrot.slane %v1257_v19, 4  ;;  %v540_v59 = vshrl.u32 %v4808_v29, 16  ;;  %v4821_v3 = vcombine.low %v504_v58, %v514_v37 }
  0x48   : > { %v523_v40 = vrot.slane %v522_v61, 4  ;;  %v532_v4 = vor.u32 %v531_v41, %v527_v12  ;;  %v543_v46 = vshll.u32 %v4808_v29, 16  ;;  %v549_v18 = vshll.u32 %v4814_v16, 16  ;;  %v4838_v61 = vld [vmem:[%s4501_s29 + $0x90] sm:$0xf] }
  0x49   : > { %5649 = vst [vmem:[#allocation13_spill] sm:$0xff] %v4821_v3  ;;  %v1261_v2 = vsel %vm4729_vm7, %v1259_v55, %v1260_v45  ;;  %v542_v17 = vrot.slane %v540_v59, 4  ;;  %v553_v22 = vshrl.u32 %v4814_v16, 16  ;;  %3843 = vmatmul.mubr.msk.bf16.gmra.mrb[16].mxu1 %vm709_vm3, %v4821_v3  ;;  %v4843_v45 = vld [vmem:[%s5599_s1 + $0xe] sm:$0x3]  ;;  %v1264_v59 = vrot.slane %v4602_v28, 5 }
  0x4a   : > { %v528_v58 = vsel %vm4548_vm4, %v523_v40, %v527_v12  ;;  %v533_v35 = vrot.slane %v532_v4, 4  ;;  %v4835_v30 = vcombine.low %v1258_v50, %v1261_v2  ;;  %v545_v19 = vrot.slane %v543_v46, 5  ;;  %5651 = vst [vmem:[#allocation15_spill] sm:$0xff] %v4843_v45  ;;  %v4857_v46 = vld [vmem:[%s4501_s29 + $0x94] sm:$0xf] }
  0x4b   : > { %3997 = vmatmul.mubr.msk.bf16.vlgmr.msra.gmra.mrb[0].mxu0 %vm709_vm3, %v4800_v63  ;;  %v551_v41 = vrot.slane %v549_v18, 5  ;;  %v555_v37 = vrot.slane %v553_v22, 4  ;;  %v559_v40 = vshll.u32 %v4824_v1, 16  ;;  %v3450_v12 = vrot.slane %v4590_v14, 9  ;;  %v4862_v3 = vld [vmem:[%s4501_s29 + $0x98] sm:$0x1] }
  0x4c   : > { %5650 = vst [vmem:[#allocation14_spill] sm:$0xff] %v4835_v30  ;;  %4029 = vmatpush3.bf16.msra.mxu0 %v4536_v20  ;;  %v538_v50 = vsel %vm4548_vm4, %v533_v35, %v537_v44  ;;  %4000 = vmatprep.mubr.msk.bf16.mxu0 %vm709_vm3, %v4835_v30  ;;  %v546_v55 = vor.u32 %v545_v19, %v542_v17  ;;  %v1267_v4 = vrot.slane %v4609_v32, 5  ;;  %v564_v20 = vshrl.u32 %v4838_v61, 16 }
  0x4d   : > { %v4859_v2 = vcombine.low %v528_v58, %v538_v50  ;;  %v556_v18 = vor.u32 %v555_v37, %v551_v41  ;;  %v561_v22 = vrot.slane %v559_v40, 5  ;;  %4396 = vmatprep.subr.msk.bf16.mxu0 %vm758_vm0, %v4843_v45  ;;  %v1265_v17 = vsel %vm4729_vm7, %v3450_v12, %v1264_v59 }
  0x4e   : > { %v547_v44 = vrot.slane %v546_v55, 4  ;;  %v1266_v35 = vrot.slane %v1264_v59, 4  ;;  %v567_v32 = vshll.u32 %v4838_v61, 16  ;;  %v566_v19 = vrot.slane %v564_v20, 4 }
  0x4f   : > { %5652 = vst [vmem:[#allocation16_spill] sm:$0xff] %v4859_v2  ;;  %3846 = vmatprep.mubr.msk.bf16.mxu1 %vm709_vm3, %v4859_v2  ;;  %v557_v58 = vrot.slane %v556_v18, 4  ;;  %v573_v37 = vshll.u32 %v4857_v46, 16  ;;  %v577_v40 = vshrl.u32 %v4857_v46, 16  ;;  %v583_v59 = vshll.u32 %v4862_v3, 16 }
  0x50   : > { %v552_v50 = vsel %vm4548_vm4, %v547_v44, %v551_v41  ;;  %v1268_v55 = vsel %vm4729_vm7, %v1266_v35, %v1267_v4  ;;  %v569_v12 = vrot.slane %v567_v32, 5  ;;  %v3451_v4 = vrot.slane %v4617_v48, 9 }
  0x51   : > { %v562_v2 = vsel %vm4548_vm4, %v557_v58, %v561_v22  ;;  %v4884_v18 = vcombine.low %v1265_v17, %v1268_v55  ;;  %v575_v20 = vrot.slane %v573_v37, 5  ;;  %v579_v0 = vrot.slane %v577_v40, 4  ;;  %v4900_v58 = vld [vmem:[%s4501_s29 + $0xa4] sm:$0x1] }
  0x52   : > { %v4889_v43 = vcombine.low %v552_v50, %v562_v2  ;;  %v570_v41 = vor.u32 %v569_v12, %v566_v19  ;;  %v585_v44 = vrot.slane %v583_v59, 5  ;;  %v1271_v32 = vrot.slane %v4625_v52, 5 }
  0x53   : > { %5653 = vst [vmem:[#allocation17_spill] sm:$0xff] %v4884_v18  ;;  %4001 = vmatmul.mubr.msk.bf16.gmra.mrb[4].mxu0 %vm709_vm3, %v4884_v18  ;;  %v580_v35 = vor.u32 %v579_v0, %v575_v20  ;;  %v1274_v22 = vrot.slane %v4637_v5, 5  ;;  %v588_v17 = vshrl.u32 %v4880_v60, 16  ;;  %v591_v19 = vshll.u32 %v4880_v60, 16 }
  0x54   : > { %5654 = vst [vmem:[#allocation18_spill] sm:$0xff] %v4889_v43  ;;  %3847 = vmatmul.mubr.msk.bf16.gmra.mrb[20].mxu1 %vm709_vm3, %v4889_v43  ;;  %v571_v2 = vrot.slane %v570_v41, 4  ;;  %v597_v37 = vshll.u32 %v4887_v7, 16  ;;  %v601_v0 = vshrl.u32 %v4887_v7, 16  ;;  %v1272_v5 = vsel %vm4729_vm7, %v3451_v4, %v1271_v32 }
  0x55   : > { %v581_v40 = vrot.slane %v580_v35, 4  ;;  %v1273_v50 = vrot.slane %v1271_v32, 4  ;;  %v590_v55 = vrot.slane %v588_v17, 4  ;;  %v593_v59 = vrot.slane %v591_v19, 5  ;;  %v4919_v32 = vld [vmem:[%s4501_s29 + $0xac] sm:$0xf] }
  0x56   : > { %v576_v12 = vsel %vm4548_vm4, %v571_v2, %v575_v20  ;;  %v599_v41 = vrot.slane %v597_v37, 5  ;;  %v603_v43 = vrot.slane %v601_v0, 4  ;;  %v607_v35 = vshll.u32 %v4900_v58, 16 }
  0x57   : > { %v586_v53 = vsel %vm4548_vm4, %v581_v40, %v585_v44  ;;  %v1275_v18 = vsel %vm4729_vm7, %v1273_v50, %v1274_v22  ;;  %v3452_v4 = vrot.slane %v4642_v13, 9  ;;  %v594_v2 = vor.u32 %v593_v59, %v590_v55 }
  0x58   : > { %v4921_v17 = vcombine.low %v576_v12, %v586_v53  ;;  %v4923_v20 = vcombine.low %v1272_v5, %v1275_v18  ;;  %v604_v19 = vor.u32 %v603_v43, %v599_v41  ;;  %v609_v37 = vrot.slane %v607_v35, 5  ;;  %v4933_v18 = vld [vmem:[%s4501_s29 + $0xb0] sm:$0x1] }
  0x59   : > { %v1278_v0 = vrot.slane %v4649_v24, 5  ;;  %v1281_v44 = vrot.slane %v4666_v8, 5  ;;  %v612_v22 = vshrl.u32 %v4910_v25, 16  ;;  %v595_v53 = vrot.slane %v594_v2, 4 }
  0x5a   : > { %5655 = vst [vmem:[#allocation19_spill] sm:$0xff] %v4921_v17  ;;  %5656 = vst [vmem:[#allocation20_spill] sm:$0xff] %v4923_v20  ;;  %3850 = vmatprep.mubr.msk.bf16.mxu1 %vm709_vm3, %v4921_v17  ;;  %4004 = vmatprep.mubr.msk.bf16.mxu0 %vm709_vm3, %v4923_v20  ;;  %v605_v40 = vrot.slane %v604_v19, 4  ;;  %v615_v43 = vshll.u32 %v4910_v25, 16  ;;  %v621_v5 = vshll.u32 %v4919_v32, 16  ;;  %v625_v12 = vshrl.u32 %v4919_v32, 16 }
  0x5b   : > { %v1279_v8 = vsel %vm4729_vm7, %v3452_v4, %v1278_v0  ;;  %v1280_v50 = vrot.slane %v1278_v0, 4  ;;  %v614_v55 = vrot.slane %v612_v22, 4  ;;  %v600_v59 = vsel %vm4548_vm4, %v595_v53, %v599_v41  ;;  %v4945_v17 = vld [vmem:[%s4501_s29 + $0xb4] sm:$0xf]  ;;  %v4957_v53 = vld [vmem:[%s4501_s29 + $0xb8] sm:$0xf] }
  0x5c   : > { %v610_v35 = vsel %vm4548_vm4, %v605_v40, %v609_v37  ;;  %v617_v2 = vrot.slane %v615_v43, 5  ;;  %v623_v19 = vrot.slane %v621_v5, 5  ;;  %v627_v0 = vrot.slane %v625_v12, 4 }
  0x5d   : > { %v4947_v20 = vcombine.low %v600_v59, %v610_v35  ;;  %v1282_v4 = vsel %vm4729_vm7, %v1280_v50, %v1281_v44  ;;  %v631_v22 = vshll.u32 %v4933_v18, 16  ;;  %v3453_v41 = vrot.slane %v4671_v42, 9  ;;  %v4963_v44 = vld [vmem:[%s4501_s29 + $0xbc] sm:$0x1] }
  0x5e   : > { %v4952_v30 = vcombine.low %v1279_v8, %v1282_v4  ;;  %v618_v63 = vor.u32 %v617_v2, %v614_v55  ;;  %v1285_v37 = vrot.slane %v4676_v6, 5  ;;  %v628_v40 = vor.u32 %v627_v0, %v623_v19 }
  0x5f   : > { %5657 = vst [vmem:[#allocation21_spill] sm:$0xff] %v4947_v20  ;;  %3851 = vmatmul.mubr.msk.bf16.gmra.mrb[24].mxu1 %vm709_vm3, %v4947_v20  ;;  %v633_v43 = vrot.slane %v631_v22, 5  ;;  %v1288_v5 = vrot.slane %v4689_v11, 5  ;;  %v636_v50 = vshrl.u32 %v4945_v17, 16  ;;  %v639_v59 = vshll.u32 %v4945_v17, 16 }
  0x60   : > { %5658 = vst [vmem:[#allocation22_spill] sm:$0xff] %v4952_v30  ;;  %4005 = vmatmul.mubr.msk.bf16.gmra.mrb[8].mxu0 %vm709_vm3, %v4952_v30  ;;  %v619_v8 = vrot.slane %v618_v63, 4  ;;  %v1286_v55 = vsel %vm4729_vm7, %v3453_v41, %v1285_v37  ;;  %v1287_v12 = vrot.slane %v1285_v37, 4  ;;  %v629_v35 = vrot.slane %v628_v40, 4 }
  0x61   : > { %v638_v2 = vrot.slane %v636_v50, 4  ;;  %v645_v4 = vshll.u32 %v4957_v53, 16  ;;  %v649_v11 = vshrl.u32 %v4957_v53, 16  ;;  %v641_v20 = vrot.slane %v639_v59, 5 }
  0x62   : > { %v624_v0 = vsel %vm4548_vm4, %v619_v8, %v623_v19  ;;  %v1289_v22 = vsel %vm4729_vm7, %v1287_v12, %v1288_v5  ;;  %v655_v63 = vshll.u32 %v4963_v44, 16  ;;  %v634_v41 = vsel %vm4548_vm4, %v629_v35, %v633_v43 }
  0x63   : > { %v4980_v37 = vcombine.low %v1286_v55, %v1289_v22  ;;  %v647_v40 = vrot.slane %v645_v4, 5  ;;  %v651_v50 = vrot.slane %v649_v11, 4  ;;  %v4982_v30 = vcombine.low %v624_v0, %v634_v41 }
  0x64   : > { %v642_v21 = vor.u32 %v641_v20, %v638_v2  ;;  %v657_v45 = vrot.slane %v655_v63, 5  ;;  %v3454_v42 = vrot.slane %v4693_v15, 9  ;;  %v1292_v5 = vrot.slane %v4698_v27, 5 }
  0x65   : > { %4008 = vmatprep.mubr.msk.bf16.mxu0 %vm709_vm3, %v4980_v37  ;;  %v652_v19 = vor.u32 %v651_v50, %v647_v40  ;;  %v1295_v8 = vrot.slane %v4712_v47, 5  ;;  %v3455_v43 = vrot.slane %v4720_v54, 9  ;;  %3854 = vmatprep.mubr.msk.bf16.mxu1 %vm709_vm3, %v4982_v30  ;;  %v3414_v20 = vcombine.low %v4515_v9, %v4518_v10 }
  0x66   : > { %v643_v55 = vrot.slane %v642_v21, 4  ;;  %v1299_v12 = vrot.slane %v4736_v36, 5  ;;  %v1302_v59 = vrot.slane %v4749_v51, 5  ;;  %v1293_v2 = vsel %vm4729_vm7, %v3454_v42, %v1292_v5 }
  0x67   : > { %v653_v35 = vrot.slane %v652_v19, 4  ;;  %v1294_v4 = vrot.slane %v1292_v5, 4  ;;  %v1306_v47 = vrot.slane %v4777_v31, 5  ;;  %v3456_v9 = vrot.slane %v4761_v56, 9 }
  0x68   : > { %v648_v11 = vsel %vm4548_vm4, %v643_v55, %v647_v40  ;;  %v1300_v21 = vsel %vm4729_vm7, %v3455_v43, %v1299_v12  ;;  %v1301_v0 = vrot.slane %v1299_v12, 4  ;;  %v1309_v42 = vrot.slane %v4782_v49, 5 }
  0x69   : > { %v658_v10 = vsel %vm4548_vm4, %v653_v35, %v657_v45  ;;  %v1296_v51 = vsel %vm4729_vm7, %v1294_v4, %v1295_v8  ;;  %v1308_v22 = vrot.slane %v1306_v47, 4  ;;  %v3457_v19 = vrot.slane %v4808_v29, 9 }
  0x6a   : > { %v5009_v63 = vcombine.low %v648_v11, %v658_v10  ;;  %v5011_v41 = vcombine.low %v1293_v2, %v1296_v51  ;;  %v1303_v40 = vsel %vm4729_vm7, %v1301_v0, %v1302_v59  ;;  %v1313_v5 = vrot.slane %v4814_v16, 5 }
  0x6b   : > { %v5015_v50 = vcombine.low %v1300_v21, %v1303_v40  ;;  %v1316_v49 = vrot.slane %v4824_v1, 5  ;;  %v1307_v45 = vsel %vm4729_vm7, %v3456_v9, %v1306_v47  ;;  %v1310_v8 = vsel %vm4729_vm7, %v1308_v22, %v1309_v42 }
  0x6c   : > { %3855 = vmatmul.mubr.msk.bf16.gmra.mrb[28].mxu1 %vm709_vm3, %v5009_v63  ;;  %4009 = vmatmul.mubr.msk.bf16.gmra.mrb[12].mxu0 %vm709_vm3, %v5011_v41  ;;  %v1315_v43 = vrot.slane %v1313_v5, 4  ;;  %v1320_v55 = vrot.slane %v4857_v46, 5  ;;  %v1327_v12 = vrot.slane %v4887_v7, 5  ;;  %v1314_v59 = vsel %vm4729_vm7, %v3457_v19, %v1313_v5 }
  0x6d   : > { %3860 = vmatprep.mubr.msk.bf16.mxu1 %vm709_vm3, %v3414_v20  ;;  %4012 = vmatprep.mubr.msk.bf16.mxu0 %vm709_vm3, %v5015_v50  ;;  %v5037_v20 = vcombine.low %v1307_v45, %v1310_v8  ;;  %v3458_v35 = vrot.slane %v4838_v61, 9  ;;  %v1323_v4 = vrot.slane %v4862_v3, 5  ;;  %v5043_v47 = vcombine.low %v4544_v33, %v4557_v39  ;;  %v5055_v3 = vld [vmem:[%s5599_s1 + $0x6] sm:$0x3] }
  0x6e   : > { %v1317_v1 = vsel %vm4729_vm7, %v1315_v43, %v1316_v49  ;;  %v1322_v2 = vrot.slane %v1320_v55, 4  ;;  %v3459_v11 = vrot.slane %v4880_v60, 9  ;;  %v1445_v21 = vsel %vm758_vm0, %v4597_v23, 0 }
  0x6f   : > { %v5048_v0 = vcombine.low %v1314_v59, %v1317_v1  ;;  %v1329_v9 = vrot.slane %v1327_v12, 4  ;;  %v1330_v10 = vrot.slane %v4900_v58, 5  ;;  %v1334_v51 = vrot.slane %v4919_v32, 5 }
  0x70   : > { %v1321_v33 = vsel %vm4729_vm7, %v3458_v35, %v1320_v55  ;;  %v1324_v39 = vsel %vm4729_vm7, %v1322_v2, %v1323_v4  ;;  %v5069_v23 = vcombine.low %v4571_v57, %v4576_v62  ;;  %v1328_v58 = vsel %vm4729_vm7, %v3459_v11, %v1327_v12 }
  0x71   : > { %v5075_v22 = vcombine.low %v4693_v15, %v4698_v27  ;;  %v1331_v42 = vsel %vm4729_vm7, %v1329_v9, %v1330_v10  ;;  %v3460_v40 = vrot.slane %v4910_v25, 9  ;;  %v1341_v19 = vrot.slane %v4957_v53, 5 }
  0x72   : > { %v5085_v57 = vcombine.low %v4720_v54, %v4736_v36  ;;  %v5089_v62 = vcombine.low %v1321_v33, %v1324_v39  ;;  %v1336_v15 = vrot.slane %v1334_v51, 4  ;;  %v1337_v27 = vrot.slane %v4933_v18, 5  ;;  %v267_v18 = vld [vmem:[%s4501_s29 + $0xc8] sm:$0x1] }
  0x73   : > { %v5094_v5 = vcombine.low %v4761_v56, %v4777_v31  ;;  %v5098_v49 = vcombine.low %v4808_v29, %v4814_v16  ;;  %v5102_v54 = vcombine.low %v4838_v61, %v4857_v46  ;;  %v5106_v36 = vcombine.low %v4880_v60, %v4887_v7  ;;  %v5125_v61 = vld [vmem:[%s4501_s29 + $0xc4] sm:$0xf] }
  0x74   : > { %3861 = vmatmul.mubr.msk.bf16.vlgmr.msra.gmra.mrb[0].mxu1 %vm709_vm3, %v4554_v38  ;;  %4013 = vmatmul.mubr.msk.bf16.gmra.mrb[16].mxu0 %vm709_vm3, %v5037_v20  ;;  %v5110_v45 = vcombine.low %v4910_v25, %v4919_v32  ;;  %v5114_v56 = vcombine.low %v4590_v14, %v4602_v28  ;;  %v5116_v31 = vcombine.low %v1328_v58, %v1331_v42  ;;  %v3461_v16 = vrot.slane %v4945_v17, 9  ;;  %v5659_v42 = vld [vmem:[#allocation5_spill] sm:$0xff] }
  0x75   : > { %3893 = vmatpush3.bf16.msra.mxu1 %v1445_v21  ;;  %3864 = vmatprep.mubr.msk.bf16.mxu1 %vm709_vm3, %v5043_v47  ;;  %v5120_v29 = vcombine.low %v4945_v17, %v4957_v53  ;;  %v1343_v7 = vrot.slane %v1341_v19, 4  ;;  %v1344_v60 = vrot.slane %v4963_v44, 5  ;;  %v1335_v14 = vsel %vm4729_vm7, %v3460_v40, %v1334_v51  ;;  %v5145_v17 = vld [vmem:[%s4501_s29 + $0xc0] sm:$0xf] }
  0x76   : > { %4016 = vmatprep.mubr.msk.bf16.mxu0 %vm709_vm3, %v5048_v0  ;;  %4391 = vmatprep.subr.msk.bf16.mxu1 %vm758_vm0, %v5055_v3  ;;  %v1338_v28 = vsel %vm4729_vm7, %v1336_v15, %v1337_v27  ;;  %v2077_v25 = vrot.slane %v5125_v61, 5  ;;  %v1342_v46 = vsel %vm4729_vm7, %v3461_v16, %v1341_v19  ;;  %v5150_v53 = vcombine.low %v4617_v48, %v4625_v52 }
  0x77   : > { %v1345_v32 = vsel %vm4729_vm7, %v1343_v7, %v1344_v60  ;;  %v5152_v44 = vcombine.low %v1335_v14, %v1338_v28  ;;  %v5156_v8 = vcombine.low %v4642_v13, %v4649_v24  ;;  %v1847_v43 = vshrl.u32 %v5145_v17, 16  ;;  %v3587_v60 = vld [vmem:[%s5599_s1 + $0x10] sm:$0x3]  ;;  %v4425_v14 = vld [vmem:[%s4501_s29 + $0x4] sm:$0xf] }
  0x78   : > { %v1850_v55 = vshll.u32 %v5145_v17, 16  ;;  %v1856_v12 = vshll.u32 %v5125_v61, 16  ;;  %v1860_v59 = vshrl.u32 %v5125_v61, 16  ;;  %v5162_v1 = vcombine.low %v1342_v46, %v1345_v32  ;;  %v4427_v32 = vld [vmem:[%s4501_s29] sm:$0xf] }
  0x79   : > { %v3531_v35 = vrot.slane %v5145_v17, 9  ;;  %v2079_v48 = vrot.slane %v2077_v25, 4  ;;  %v2080_v52 = vrot.slane %v267_v18, 5  ;;  %v1849_v2 = vrot.slane %v1847_v43, 4 }
  0x7a   : > { %v1852_v4 = vrot.slane %v1850_v55, 5  ;;  %v1858_v11 = vrot.slane %v1856_v12, 5  ;;  %v1862_v21 = vrot.slane %v1860_v59, 4  ;;  %v1866_v9 = vshll.u32 %v267_v18, 16 }
  0x7b   : > { %v2078_v10 = vsel %vm4729_vm7, %v3531_v35, %v2077_v25  ;;  %v2081_v51 = vsel %vm4729_vm7, %v2079_v48, %v2080_v52  ;;  %v5179_v40 = vcombine.low %v5659_v42, %v4676_v6  ;;  %v5660_v6 = vld [vmem:[#allocation15_spill] sm:$0xff]  ;;  %v1236_v28 = vrot.slane %v4425_v14, 5  ;;  %v5661_v48 = vld [vmem:[#allocation10_spill] sm:$0xff]  ;;  %v5662_v52 = vld [vmem:[#allocation12_spill] sm:$0xff] }
  0x7c   : > { %3865 = vmatmul.mubr.msk.bf16.gmra.mrb[4].mxu1 %vm709_vm3, %v5069_v23  ;;  %4017 = vmatmul.mubr.msk.bf16.gmra.mrb[20].mxu0 %vm709_vm3, %v5089_v62  ;;  %v1853_v13 = vor.u32 %v1852_v4, %v1849_v2  ;;  %v1863_v24 = vor.u32 %v1862_v21, %v1858_v11  ;;  %v1868_v58 = vrot.slane %v1866_v9, 5  ;;  %v5181_v19 = vcombine.low %v2078_v10, %v2081_v51  ;;  %v4426_v25 = vld [vmem:[%s4501_s29 + $0x8] sm:$0x1]  ;;  %v5664_v4 = vld [vmem:[#allocation17_spill] sm:$0xff]  ;;  %v5665_v21 = vld [vmem:[#allocation20_spill] sm:$0xff] }
  0x7d   : > { %3868 = vmatprep.mubr.msk.bf16.mxu1 %vm709_vm3, %v5114_v56  ;;  %4020 = vmatprep.mubr.msk.bf16.mxu0 %vm709_vm3, %v5116_v31  ;;  %v2525_v7 = vsel %vm758_vm0, %v5660_v6, 0  ;;  %v1239_v46 = vrot.slane %v4426_v25, 5  ;;  %v3446_v18 = vrot.slane %v4427_v32, 9  ;;  %v1238_v43 = vrot.slane %v1236_v28, 4  ;;  %v4428_v2 = vld [vmem:[%s5599_s1 + $0x8] sm:$0x3] }
  0x7e   : > { %v1854_v33 = vrot.slane %v1853_v13, 4  ;;  %v1864_v39 = vrot.slane %v1863_v24, 4  ;;  %v1651_v35 = vsel %vm758_vm0, %v5055_v3, 0  ;;  %v5663_v3 = vld [vmem:[#allocation14_spill] sm:$0xff]  ;;  %v5276_v24 = vld [vmem:[%s4501_s29 + $0xcc] sm:$0xf] }
  0x7f   : > { %v1237_v55 = vsel %vm4729_vm7, %v3446_v18, %v1236_v28  ;;  %v1240_v12 = vsel %vm4729_vm7, %v1238_v43, %v1239_v46  ;;  %v5666_v13 = vld [vmem:[#allocation22_spill] sm:$0xff]  ;;  %v5279_v9 = vld [vmem:[%s4501_s29 + $0xd0] sm:$0xf]  ;;  %v2737_v10 = vsel %vm758_vm0, %v3587_v60, 0  ;;  %v5672_v42 = vld [vmem:[#allocation9_spill] sm:$0xff]  ;;  %v2496_v14 = vshll.u32 %v5276_v24, 16 }
  0x80   : > { %v1859_v15 = vsel %vm4548_vm4, %v1854_v33, %v1858_v11  ;;  %v1869_v27 = vsel %vm4548_vm4, %v1864_v39, %v1868_v58  ;;  %v3463_v59 = vcombine.low %v1237_v55, %v1240_v12  ;;  %v5265_v11 = vcombine.low %v5145_v17, %v5125_v61  ;;  %v5667_v17 = vld [vmem:[#allocation3_spill] sm:$0xff]  ;;  %v5668_v51 = vld [vmem:[#allocation4_spill] sm:$0xff]  ;;  %v5669_v33 = vld [vmem:[#allocation6_spill] sm:$0xff] }
  0x81   : > { %v5187_v16 = vcombine.low %v1859_v15, %v1869_v27  ;;  %v3551_v61 = vcombine.low %v5276_v24, %v5279_v9  ;;  %v5670_v39 = vld [vmem:[#allocation7_spill] sm:$0xff]  ;;  %v5671_v58 = vld [vmem:[#allocation8_spill] sm:$0xff]  ;;  %v5674_v27 = vld [vmem:[#allocation13_spill] sm:$0xff]  ;;  %v2506_v28 = vshrl.u32 %v5279_v9, 16  ;;  %v2498_v32 = vrot.slane %v2496_v14, 5 }
  0x82   : > { %v5673_v15 = vld [vmem:[#allocation11_spill] sm:$0xff]  ;;  %v5675_v6 = vld [vmem:[#allocation16_spill] sm:$0xff]  ;;  %v5677_v25 = vld [vmem:[#allocation2_spill] sm:$0xff]  ;;  %v2723_v34 = vrot.slane %v5279_v9, 5 }
  0x83   : > { %v5678_v46 = vld [vmem:[#allocation19_spill] sm:$0xff]  ;;  %v2508_v43 = vrot.slane %v2506_v28, 4  ;;  %v270_v55 = vld [vmem:[%s4501_s29 + $0xd4] sm:$0x1]  ;;  %v5679_v12 = vld [vmem:[#allocation21_spill] sm:$0xff] }
  0x84   : > { %3869 = vmatmul.mubr.msk.bf16.gmra.mrb[8].mxu1 %vm709_vm3, %v5150_v53  ;;  %4021 = vmatmul.mubr.msk.bf16.gmra.mrb[24].mxu0 %vm709_vm3, %v5152_v44 }
  0x85   : > { %3872 = vmatprep.mubr.msk.bf16.mxu1 %vm709_vm3, %v5156_v8  ;;  %4024 = vmatprep.mubr.msk.bf16.mxu0 %vm709_vm3, %v5162_v1 }
  0x8c   : > { %3873 = vmatmul.mubr.msk.bf16.gmra.mrb[12].mxu1 %vm709_vm3, %v5179_v40  ;;  %4025 = vmatmul.mubr.msk.bf16.gmra.mrb[28].mxu0 %vm709_vm3, %v5181_v19 }
  0x8d   : > { %3876 = vmatprep.mubr.msk.bf16.mxu1 %vm709_vm3, %v5075_v22  ;;  %4030 = vmatprep.mubr.msk.bf16.mxu0 %vm709_vm3, %v5043_v47 }
  0x94   : > { %3877 = vmatmul.mubr.msk.bf16.gmra.mrb[16].mxu1 %vm709_vm3, %v5085_v57  ;;  %4031 = vmatmul.mubr.msk.bf16.vlgmr.msra.gmra.mrb[0].mxu0 %vm709_vm3, %v5069_v23 }
  0x95   : > { %4063 = vmatpush3.bf16.msra.mxu0 %v2525_v7  ;;  %3880 = vmatprep.mubr.msk.bf16.mxu1 %vm709_vm3, %v5094_v5  ;;  %v5676_v7 = vld [vmem:[#allocation18_spill] sm:$0xff] }
  0x96   : > { %4034 = vmatprep.mubr.msk.bf16.mxu0 %vm709_vm3, %v5114_v56  ;;  %4397 = vmatprep.subr.msk.bf16.mxu0 %vm758_vm0, %v3587_v60  ;;  %v2493_v60 = vshrl.u32 %v5276_v24, 16 }
  0x9c   : > { %3881 = vmatmul.mubr.msk.bf16.gmra.mrb[20].mxu1 %vm709_vm3, %v5098_v49  ;;  %4035 = vmatmul.mubr.msk.bf16.gmra.mrb[4].mxu0 %vm709_vm3, %v5150_v53 }
  0x9d   : > { %3884 = vmatprep.mubr.msk.bf16.mxu1 %vm709_vm3, %v5102_v54  ;;  %4038 = vmatprep.mubr.msk.bf16.mxu0 %vm709_vm3, %v5156_v8 }
  0xa4   : > { %3885 = vmatmul.mubr.msk.bf16.gmra.mrb[24].mxu1 %vm709_vm3, %v5106_v36  ;;  %4039 = vmatmul.mubr.msk.bf16.gmra.mrb[8].mxu0 %vm709_vm3, %v5179_v40 }
  0xa5   : > { %3888 = vmatprep.mubr.msk.bf16.mxu1 %vm709_vm3, %v5110_v45  ;;  %4042 = vmatprep.mubr.msk.bf16.mxu0 %vm709_vm3, %v5075_v22 }
  0xac   : > { %3889 = vmatmul.mubr.msk.bf16.gmra.mrb[28].mxu1 %vm709_vm3, %v5120_v29  ;;  %4043 = vmatmul.mubr.msk.bf16.gmra.mrb[12].mxu0 %vm709_vm3, %v5085_v57 }
  0xad   : > { %3894 = vmatprep.mubr.msk.bf16.mxu1 %vm709_vm3, %v3463_v59  ;;  %4046 = vmatprep.mubr.msk.bf16.mxu0 %vm709_vm3, %v5094_v5 }
  0xb4   : > { %3895 = vmatmul.mubr.msk.bf16.vlgmr.msra.gmra.mrb[0].mxu1 %vm709_vm3, %v5661_v48  ;;  %4047 = vmatmul.mubr.msk.bf16.gmra.mrb[16].mxu0 %vm709_vm3, %v5098_v49 }
  0xb5   : > { %3927 = vmatpush3.bf16.msra.mxu1 %v1651_v35  ;;  %3898 = vmatprep.mubr.msk.bf16.mxu1 %vm709_vm3, %v5662_v52  ;;  %v2512_v35 = vshll.u32 %v270_v55, 16 }
  0xb6   : > { %4050 = vmatprep.mubr.msk.bf16.mxu0 %vm709_vm3, %v5102_v54  ;;  %4393 = vmatprep.subr.msk.bf16.mxu1 %vm758_vm0, %v4428_v2 }
  0xbc   : > { %3899 = vmatmul.mubr.msk.bf16.gmra.mrb[4].mxu1 %vm709_vm3, %v5663_v3  ;;  %4051 = vmatmul.mubr.msk.bf16.gmra.mrb[20].mxu0 %vm709_vm3, %v5106_v36 }
  0xbd   : > { %3902 = vmatprep.mubr.msk.bf16.mxu1 %vm709_vm3, %v5664_v4  ;;  %4054 = vmatprep.mubr.msk.bf16.mxu0 %vm709_vm3, %v5110_v45 }
  0xc4   : > { %3903 = vmatmul.mubr.msk.bf16.gmra.mrb[8].mxu1 %vm709_vm3, %v5665_v21  ;;  %4055 = vmatmul.mubr.msk.bf16.gmra.mrb[24].mxu0 %vm709_vm3, %v5120_v29 }
  0xc5   : > { %3906 = vmatprep.mubr.msk.bf16.mxu1 %vm709_vm3, %v5666_v13  ;;  %4058 = vmatprep.mubr.msk.bf16.mxu0 %vm709_vm3, %v5265_v11 }
  0xcc   : > { %3907 = vmatmul.mubr.msk.bf16.gmra.mrb[12].mxu1 %vm709_vm3, %v4980_v37  ;;  %4059 = vmatmul.mubr.msk.bf16.gmra.mrb[28].mxu0 %vm709_vm3, %v3551_v61  ;;  %v2514_v61 = vrot.slane %v2512_v35, 5 }
  0xcd   : > { %3910 = vmatprep.mubr.msk.bf16.mxu1 %vm709_vm3, %v5011_v41  ;;  %4064 = vmatprep.mubr.msk.bf16.mxu0 %vm709_vm3, %v5667_v17 }
  0xd4   : > { %3911 = vmatmul.mubr.msk.bf16.gmra.mrb[16].mxu1 %vm709_vm3, %v5015_v50  ;;  %4065 = vmatmul.mubr.msk.bf16.vlgmr.msra.gmra.mrb[0].mxu0 %vm709_vm3, %v5668_v51 }
  0xd5   : > { %4097 = vmatpush3.bf16.msra.mxu0 %v2737_v10  ;;  %3914 = vmatprep.mubr.msk.bf16.mxu1 %vm709_vm3, %v5037_v20 }
  0xd6   : > { %4068 = vmatprep.mubr.msk.bf16.mxu0 %vm709_vm3, %v5669_v33 }
  0xdc   : > { %3915 = vmatmul.mubr.msk.bf16.gmra.mrb[20].mxu1 %vm709_vm3, %v5048_v0  ;;  %4069 = vmatmul.mubr.msk.bf16.gmra.mrb[4].mxu0 %vm709_vm3, %v5670_v39 }
  0xdd   : > { %3918 = vmatprep.mubr.msk.bf16.mxu1 %vm709_vm3, %v5089_v62  ;;  %4072 = vmatprep.mubr.msk.bf16.mxu0 %vm709_vm3, %v5671_v58 }
  0xe4   : > { %3919 = vmatmul.mubr.msk.bf16.gmra.mrb[24].mxu1 %vm709_vm3, %v5116_v31  ;;  %4073 = vmatmul.mubr.msk.bf16.gmra.mrb[8].mxu0 %vm709_vm3, %v5672_v42 }
  0xe5   : > { %3922 = vmatprep.mubr.msk.bf16.mxu1 %vm709_vm3, %v5152_v44  ;;  %4076 = vmatprep.mubr.msk.bf16.mxu0 %vm709_vm3, %v5673_v15 }
  0xec   : > { %3923 = vmatmul.mubr.msk.bf16.gmra.mrb[28].mxu1 %vm709_vm3, %v5162_v1  ;;  %4077 = vmatmul.mubr.msk.bf16.gmra.mrb[12].mxu0 %vm709_vm3, %v5674_v27 }
  0xed   : > { %3928 = vmatprep.mubr.msk.bf16.mxu1 %vm709_vm3, %v4554_v38  ;;  %4080 = vmatprep.mubr.msk.bf16.mxu0 %vm709_vm3, %v5675_v6  ;;  %v2502_v38 = vshll.u32 %v5279_v9, 16 }
  0xef   : > { %v2504_v18 = vrot.slane %v2502_v38, 5 }
  0xf1   : > { %v2509_v59 = vor.u32 %v2508_v43, %v2504_v18 }
  0xf3   : > { %v2510_v2 = vrot.slane %v2509_v59, 4 }
  0xf4   : > { %3929 = vmatmul.mubr.msk.bf16.vlgmr.msra.gmra.mrb[0].mxu1 %vm709_vm3, %v5043_v47  ;;  %4081 = vmatmul.mubr.msk.bf16.gmra.mrb[16].mxu0 %vm709_vm3, %v5676_v7  ;;  %v2495_v47 = vrot.slane %v2493_v60, 4 }
  0xf5   : > { %4131 = vmatpush3.bf16.msra.mxu1 %v5677_v25  ;;  %3932 = vmatprep.mubr.msk.bf16.mxu1 %vm709_vm3, %v5069_v23 }
  0xf6   : > { %4084 = vmatprep.mubr.msk.bf16.mxu0 %vm709_vm3, %v5678_v46  ;;  %v2499_v23 = vor.u32 %v2498_v32, %v2495_v47 }
  0xf8   : > { %v2500_v48 = vrot.slane %v2499_v23, 4 }
  0xfc   : > { %3933 = vmatmul.mubr.msk.bf16.gmra.mrb[4].mxu1 %vm709_vm3, %v5114_v56  ;;  %4085 = vmatmul.mubr.msk.bf16.gmra.mrb[20].mxu0 %vm709_vm3, %v5679_v12  ;;  %v2505_v56 = vsel %vm4548_vm4, %v2500_v48, %v2504_v18 }
  0xfd   : > { %3936 = vmatprep.mubr.msk.bf16.mxu1 %vm709_vm3, %v5150_v53  ;;  %4088 = vmatprep.mubr.msk.bf16.mxu0 %vm709_vm3, %v4982_v30  ;;  %v2515_v53 = vsel %vm4548_vm4, %v2510_v2, %v2514_v61 }
  0xfe   : > { %v3569_v17 = vcombine.low %v2505_v56, %v2515_v53 }
 0x104   : > { %3937 = vmatmul.mubr.msk.bf16.gmra.mrb[8].mxu1 %vm709_vm3, %v5156_v8  ;;  %4089 = vmatmul.mubr.msk.bf16.gmra.mrb[24].mxu0 %vm709_vm3, %v5009_v63 }
 0x105   : > { %3940 = vmatprep.mubr.msk.bf16.mxu1 %vm709_vm3, %v5179_v40  ;;  %4092 = vmatprep.mubr.msk.bf16.mxu0 %vm709_vm3, %v5187_v16 }
 0x10c   : > { %3941 = vmatmul.mubr.msk.bf16.gmra.mrb[12].mxu1 %vm709_vm3, %v5075_v22  ;;  %4093 = vmatmul.mubr.msk.bf16.gmra.mrb[28].mxu0 %vm709_vm3, %v3569_v17 }
 0x10d   : > { %3944 = vmatprep.mubr.msk.bf16.mxu1 %vm709_vm3, %v5085_v57  ;;  %4098 = vmatprep.mubr.msk.bf16.mxu0 %vm709_vm3, %v5662_v52 }
 0x114   : > { %3945 = vmatmul.mubr.msk.bf16.gmra.mrb[16].mxu1 %vm709_vm3, %v5094_v5  ;;  %4099 = vmatmul.mubr.msk.bf16.vlgmr.msra.gmra.mrb[0].mxu0 %vm709_vm3, %v5663_v3 }
 0x115   : > { %3948 = vmatprep.mubr.msk.bf16.mxu1 %vm709_vm3, %v5098_v49  ;;  %4102 = vmatprep.mubr.msk.bf16.mxu0 %vm709_vm3, %v5664_v4 }
 0x11c   : > { %3949 = vmatmul.mubr.msk.bf16.gmra.mrb[20].mxu1 %vm709_vm3, %v5102_v54  ;;  %4103 = vmatmul.mubr.msk.bf16.gmra.mrb[4].mxu0 %vm709_vm3, %v5665_v21 }
 0x11d   : > { %3952 = vmatprep.mubr.msk.bf16.mxu1 %vm709_vm3, %v5106_v36  ;;  %4106 = vmatprep.mubr.msk.bf16.mxu0 %vm709_vm3, %v5666_v13 }
 0x124   : > { %3953 = vmatmul.mubr.msk.bf16.gmra.mrb[24].mxu1 %vm709_vm3, %v5110_v45  ;;  %4107 = vmatmul.mubr.msk.bf16.gmra.mrb[8].mxu0 %vm709_vm3, %v4980_v37  ;;  %v3586_v37 = vrot.slane %v5276_v24, 9 }
 0x125   : > { %3956 = vmatprep.mubr.msk.bf16.mxu1 %vm709_vm3, %v5120_v29  ;;  %4110 = vmatprep.mubr.msk.bf16.mxu0 %vm709_vm3, %v5011_v41  ;;  %v2725_v41 = vrot.slane %v2723_v34, 4 }
 0x12c   : > { %3957 = vmatmul.mubr.msk.bf16.gmra.mrb[28].mxu1 %vm709_vm3, %v5265_v11  ;;  %4111 = vmatmul.mubr.msk.bf16.gmra.mrb[12].mxu0 %vm709_vm3, %v5015_v50  ;;  %v2726_v50 = vrot.slane %v270_v55, 5 }
 0x12d   : > { %3978 = vmatprep.mubr.msk.bf16.mxu1 %vm709_vm3, %v5674_v27  ;;  %4114 = vmatprep.mubr.msk.bf16.mxu0 %vm709_vm3, %v5037_v20  ;;  %v2724_v20 = vsel %vm4729_vm7, %v3586_v37, %v2723_v34 }
 0x134   : > { %3979 = vmatmul.mubr.msk.bf16.vlgmr.msra.gmra.mrb[16].mxu1 %vm709_vm3, %v5675_v6  ;;  %4115 = vmatmul.mubr.msk.bf16.gmra.mrb[16].mxu0 %vm709_vm3, %v5048_v0  ;;  %v2727_v0 = vsel %vm4729_vm7, %v2725_v41, %v2726_v50 }
 0x135   : > { %3982 = vmatprep.mubr.msk.bf16.mxu1 %vm709_vm3, %v5676_v7  ;;  %4118 = vmatprep.mubr.msk.bf16.mxu0 %vm709_vm3, %v5089_v62  ;;  %v3588_v22 = vcombine.low %v2724_v20, %v2727_v0 }
 0x13c   : > { %3983 = vmatmul.mubr.msk.bf16.gmra.mrb[20].mxu1 %vm709_vm3, %v5678_v46  ;;  %4119 = vmatmul.mubr.msk.bf16.gmra.mrb[20].mxu0 %vm709_vm3, %v5116_v31 }
 0x13d   : > { %3986 = vmatprep.mubr.msk.bf16.mxu1 %vm709_vm3, %v5679_v12  ;;  %4122 = vmatprep.mubr.msk.bf16.mxu0 %vm709_vm3, %v5152_v44 }
 0x144   : > { %3987 = vmatmul.mubr.msk.bf16.gmra.mrb[24].mxu1 %vm709_vm3, %v4982_v30  ;;  %4123 = vmatmul.mubr.msk.bf16.gmra.mrb[24].mxu0 %vm709_vm3, %v5162_v1 }
 0x145   : > { %3990 = vmatprep.mubr.msk.bf16.mxu1 %vm709_vm3, %v5009_v63  ;;  %4126 = vmatprep.mubr.msk.bf16.mxu0 %vm709_vm3, %v5181_v19 }
 0x14c   : > { %3991 = vmatmul.mubr.msk.bf16.gmra.mrb[28].mxu1 %vm709_vm3, %v5187_v16  ;;  %4127 = vmatmul.mubr.msk.bf16.gmra.mrb[28].mxu0 %vm709_vm3, %v3588_v22 }
 0x1c7   : > { %v3930_v30 = vpop.f32.mrb[0].mxu1 }
 0x1c8   : > { %v1687_v57 = vpop.f32.mrb[1].mxu1 }
 0x1c9   : > { %v3931_v62 = vpop.f32.mrb[2].mxu1 }
 0x1ca   : > { %v1690_v63 = vpop.f32.mrb[3].mxu1 }
 0x1cf   : > { %v3934_v5 = vpop.f32.mrb[4].mxu1 }
 0x1d0   : > { %v1703_v49 = vpop.f32.mrb[5].mxu1 }
 0x1d1   : > { %v3935_v54 = vpop.f32.mrb[6].mxu1 }
 0x1d2   : > { %v1706_v36 = vpop.f32.mrb[7].mxu1 }
 0x1d7   : > { %v5429_v45 = vpop.f32.mrb[8].mxu1 }
 0x1d8   : > { %v5431_v31 = vpop.f32.mrb[9].mxu1 }
 0x1d9   : > { %v5433_v26 = vpop.f32.mrb[10].mxu1 }
 0x1da   : > { %v5435_v29 = vpop.f32.mrb[11].mxu1 }
 0x1df   : > { %v5438_v44 = vpop.f32.mrb[12].mxu1 }
 0x1e0   : > { %v5440_v8 = vpop.f32.mrb[13].mxu1 }
 0x1e1   : > { %v5442_v1 = vpop.f32.mrb[14].mxu1 }
 0x1e2   : > { %v5444_v40 = vpop.f32.mrb[15].mxu1 }
 0x1e7   : > { %v4100_v19 = vpop.f32.mrb[0].mxu0 }
 0x1e8   : > { %v4132_v16 = vadd.f32 %v4100_v19, %v3930_v30  ;;  %v2773_v52 = vpop.f32.mrb[1].mxu0 }
 0x1e9   : > { %v4133_v3 = vadd.f32 %v2773_v52, %v1687_v57  ;;  %v4101_v4 = vpop.f32.mrb[2].mxu0 }
 0x1ea   : > { %v3641_v11 = vpack.c.bf16 %v4132_v16, %v4132_v16  ;;  %v4134_v21 = vadd.f32 %v4101_v4, %v3931_v62  ;;  %v2776_v13 = vpop.f32.mrb[3].mxu0  ;;  %v3167_v51 = vmul.f32 %v4132_v16, %v4132_v16  ;;  %v3097_v7 = vsel %vm3093_vm9, %v4132_v16, 0.0 }
 0x1eb   : > { %v3639_v24 = vpack.c.bf16 %v4133_v3, %v4133_v3  ;;  %v3165_v9 = vmul.f32 %v4133_v3, %v4133_v3  ;;  %v4135_v10 = vadd.f32 %v2776_v13, %v1690_v63  ;;  %v3094_v39 = vsel %vm3093_vm9, %v4133_v3, 0.0 }
 0x1ec   : > { %3063 = vst.msk [vmem:[%s5449_s23 + $0x8] sm:$0xf] %vm3060_vm8, %v3641_v11  ;;  %v3642_v33 = vpack.c.bf16 %v4134_v21, %v4134_v21  ;;  %v3168_v27 = vmul.f32 %v4134_v21, %v4134_v21  ;;  %v3200_v32 = vsel %vm3093_vm9, %v3167_v51, 0.0  ;;  %v3099_v55 = vsel %vm3093_vm9, %v4134_v21, 0.0 }
 0x1ed   : > { %3061 = vst.msk [vmem:[%s5449_s23] sm:$0xf] %vm3060_vm8, %v3639_v24  ;;  %v3640_v58 = vpack.c.bf16 %v4135_v10, %v4135_v10  ;;  %v3095_v42 = vsel %vm3093_vm9, %v4135_v10, 0.0  ;;  %v3166_v15 = vmul.f32 %v4135_v10, %v4135_v10  ;;  %v3197_v60 = vsel %vm3093_vm9, %v3165_v9, 0.0 }
 0x1ee   : > { %3064 = vst.msk [vmem:[%s5449_s23 + $0xc] sm:$0xf] %vm3060_vm8, %v3642_v33  ;;  %v3096_v6 = vadd.f32 %v3095_v42, %v3094_v39  ;;  %v3202_v12 = vsel %vm3093_vm9, %v3168_v27, 0.0 }
 0x1ef   : > { %3062 = vst.msk [vmem:[%s5449_s23 + $0x4] sm:$0xf] %vm3060_vm8, %v3640_v58  ;;  %v3198_v14 = vsel %vm3093_vm9, %v3166_v15, 0.0  ;;  %v4104_v28 = vpop.f32.mrb[4].mxu0 }
 0x1f0   : > { %v3098_v25 = vadd.f32 %v3097_v7, %v3096_v6  ;;  %v3199_v38 = vadd.f32 %v3198_v14, %v3197_v60  ;;  %v4136_v46 = vadd.f32 %v4104_v28, %v3934_v5  ;;  %v2789_v47 = vpop.f32.mrb[5].mxu0 }
 0x1f1   : > { %v4137_v18 = vadd.f32 %v2789_v47, %v1703_v49  ;;  %v4105_v43 = vpop.f32.mrb[6].mxu0 }
 0x1f2   : > { %v3201_v23 = vadd.f32 %v3200_v32, %v3199_v38  ;;  %v3645_v59 = vpack.c.bf16 %v4136_v46, %v4136_v46  ;;  %v2792_v35 = vpop.f32.mrb[7].mxu0  ;;  %v3100_v2 = vadd.f32 %v3099_v55, %v3098_v25  ;;  %v4138_v17 = vadd.f32 %v4105_v43, %v3935_v54 }
 0x1f3   : > { %v3643_v48 = vpack.c.bf16 %v4137_v18, %v4137_v18  ;;  %v3101_v61 = vsel %vm3093_vm9, %v4137_v18, 0.0  ;;  %v3169_v56 = vmul.f32 %v4137_v18, %v4137_v18  ;;  %v4139_v34 = vadd.f32 %v2792_v35, %v1706_v36 }
 0x1f4   : > { %3067 = vst.msk [vmem:[%s5449_s23 + $0x18] sm:$0xf] %vm3060_vm8, %v3645_v59  ;;  %v3203_v53 = vadd.f32 %v3202_v12, %v3201_v23  ;;  %v3102_v37 = vadd.f32 %v3101_v61, %v3100_v2  ;;  %v3171_v50 = vmul.f32 %v4136_v46, %v4136_v46  ;;  %v3646_v0 = vpack.c.bf16 %v4138_v17, %v4138_v17 }
 0x1f5   : > { %3065 = vst.msk [vmem:[%s5449_s23 + $0x10] sm:$0xf] %vm3060_vm8, %v3643_v48  ;;  %v3204_v41 = vsel %vm3093_vm9, %v3169_v56, 0.0  ;;  %v3644_v22 = vpack.c.bf16 %v4139_v34, %v4139_v34  ;;  %v3103_v30 = vsel %vm3093_vm9, %v4139_v34, 0.0  ;;  %v3170_v57 = vmul.f32 %v4139_v34, %v4139_v34 }
 0x1f6   : > { %v3205_v20 = vadd.f32 %v3204_v41, %v3203_v53  ;;  %3068 = vst.msk [vmem:[%s5449_s23 + $0x1c] sm:$0xf] %vm3060_vm8, %v3646_v0  ;;  %v3104_v63 = vadd.f32 %v3103_v30, %v3102_v37  ;;  %v3105_v54 = vsel %vm3093_vm9, %v4136_v46, 0.0  ;;  %v3172_v36 = vmul.f32 %v4138_v17, %v4138_v17 }
 0x1f7   : > { %v4108_v62 = vpop.f32.mrb[8].mxu0  ;;  %3066 = vst.msk [vmem:[%s5449_s23 + $0x14] sm:$0xf] %vm3060_vm8, %v3644_v22  ;;  %v3206_v19 = vsel %vm3093_vm9, %v3170_v57, 0.0  ;;  %v3208_v3 = vsel %vm3093_vm9, %v3171_v50, 0.0 }
 0x1f8   : > { %v4140_v5 = vadd.f32 %v4108_v62, %v5429_v45  ;;  %v2805_v49 = vpop.f32.mrb[9].mxu0  ;;  %v3106_v4 = vadd.f32 %v3105_v54, %v3104_v63  ;;  %v3207_v11 = vadd.f32 %v3206_v19, %v3205_v20  ;;  %v3107_v45 = vsel %vm3093_vm9, %v4138_v17, 0.0 }
 0x1f9   : > { %v4141_v16 = vadd.f32 %v2805_v49, %v5431_v31  ;;  %v4109_v52 = vpop.f32.mrb[10].mxu0  ;;  %v3210_v58 = vsel %vm3093_vm9, %v3172_v36, 0.0 }
 0x1fa   : > { %v3649_v21 = vpack.c.bf16 %v4140_v5, %v4140_v5  ;;  %v2808_v13 = vpop.f32.mrb[11].mxu0  ;;  %v3209_v51 = vadd.f32 %v3208_v3, %v3207_v11  ;;  %v3108_v33 = vadd.f32 %v3107_v45, %v3106_v4  ;;  %v4142_v31 = vadd.f32 %v4109_v52, %v5433_v26 }
 0x1fb   : > { %v3647_v24 = vpack.c.bf16 %v4141_v16, %v4141_v16  ;;  %v3109_v9 = vsel %vm3093_vm9, %v4141_v16, 0.0  ;;  %v3173_v10 = vmul.f32 %v4141_v16, %v4141_v16  ;;  %v4143_v39 = vadd.f32 %v2808_v13, %v5435_v29 }
 0x1fc   : > { %3071 = vst.msk [vmem:[%s5449_s23 + $0x28] sm:$0xf] %vm3060_vm8, %v3649_v21  ;;  %v3175_v15 = vmul.f32 %v4140_v5, %v4140_v5  ;;  %v3110_v27 = vadd.f32 %v3109_v9, %v3108_v33  ;;  %v3211_v6 = vadd.f32 %v3210_v58, %v3209_v51  ;;  %v3650_v7 = vpack.c.bf16 %v4142_v31, %v4142_v31 }
 0x1fd   : > { %3069 = vst.msk [vmem:[%s5449_s23 + $0x20] sm:$0xf] %vm3060_vm8, %v3647_v24  ;;  %v3212_v42 = vsel %vm3093_vm9, %v3173_v10, 0.0  ;;  %v3648_v60 = vpack.c.bf16 %v4143_v39, %v4143_v39  ;;  %v3111_v14 = vsel %vm3093_vm9, %v4143_v39, 0.0  ;;  %v3174_v28 = vmul.f32 %v4143_v39, %v4143_v39 }
 0x1fe   : > { %v3213_v38 = vadd.f32 %v3212_v42, %v3211_v6  ;;  %3072 = vst.msk [vmem:[%s5449_s23 + $0x2c] sm:$0xf] %vm3060_vm8, %v3650_v7  ;;  %v3112_v26 = vadd.f32 %v3111_v14, %v3110_v27  ;;  %v3113_v47 = vsel %vm3093_vm9, %v4140_v5, 0.0  ;;  %v3176_v32 = vmul.f32 %v4142_v31, %v4142_v31 }
 0x1ff   : > { %v4112_v25 = vpop.f32.mrb[12].mxu0  ;;  %3070 = vst.msk [vmem:[%s5449_s23 + $0x24] sm:$0xf] %vm3060_vm8, %v3648_v60  ;;  %v3214_v18 = vsel %vm3093_vm9, %v3174_v28, 0.0  ;;  %v3216_v12 = vsel %vm3093_vm9, %v3175_v15, 0.0 }
 0x200   : > { %v4144_v29 = vadd.f32 %v4112_v25, %v5438_v44  ;;  %v2821_v46 = vpop.f32.mrb[13].mxu0  ;;  %v3114_v23 = vadd.f32 %v3113_v47, %v3112_v26  ;;  %v3215_v59 = vadd.f32 %v3214_v18, %v3213_v38  ;;  %v3115_v44 = vsel %vm3093_vm9, %v4142_v31, 0.0 }
 0x201   : > { %v4145_v43 = vadd.f32 %v2821_v46, %v5440_v8  ;;  %v4113_v55 = vpop.f32.mrb[14].mxu0  ;;  %v3218_v37 = vsel %vm3093_vm9, %v3176_v32, 0.0 }
 0x202   : > { %v3653_v35 = vpack.c.bf16 %v4144_v29, %v4144_v29  ;;  %v2824_v48 = vpop.f32.mrb[15].mxu0  ;;  %v3217_v53 = vadd.f32 %v3216_v12, %v3215_v59  ;;  %v3116_v17 = vadd.f32 %v3115_v44, %v3114_v23  ;;  %v4146_v8 = vadd.f32 %v4113_v55, %v5442_v1 }
 0x203   : > { %v3651_v2 = vpack.c.bf16 %v4145_v43, %v4145_v43  ;;  %v3117_v61 = vsel %vm3093_vm9, %v4145_v43, 0.0  ;;  %v3177_v56 = vmul.f32 %v4145_v43, %v4145_v43  ;;  %v4147_v34 = vadd.f32 %v2824_v48, %v5444_v40 }
 0x204   : > { %3075 = vst.msk [vmem:[%s5449_s23 + $0x38] sm:$0xf] %vm3060_vm8, %v3653_v35  ;;  %v3179_v50 = vmul.f32 %v4144_v29, %v4144_v29  ;;  %v3118_v20 = vadd.f32 %v3117_v61, %v3116_v17  ;;  %v3219_v0 = vadd.f32 %v3218_v37, %v3217_v53  ;;  %v3654_v22 = vpack.c.bf16 %v4146_v8, %v4146_v8 }
 0x205   : > { %3073 = vst.msk [vmem:[%s5449_s23 + $0x30] sm:$0xf] %vm3060_vm8, %v3651_v2  ;;  %v3220_v41 = vsel %vm3093_vm9, %v3177_v56, 0.0  ;;  %v3652_v30 = vpack.c.bf16 %v4147_v34, %v4147_v34  ;;  %v3119_v57 = vsel %vm3093_vm9, %v4147_v34, 0.0  ;;  %v3178_v62 = vmul.f32 %v4147_v34, %v4147_v34 }
 0x206   : > { %v3221_v1 = vadd.f32 %v3220_v41, %v3219_v0  ;;  %3076 = vst.msk [vmem:[%s5449_s23 + $0x3c] sm:$0xf] %vm3060_vm8, %v3654_v22  ;;  %v3120_v40 = vadd.f32 %v3119_v57, %v3118_v20  ;;  %v3121_v19 = vsel %vm3093_vm9, %v4144_v29, 0.0  ;;  %v3180_v16 = vmul.f32 %v4146_v8, %v4146_v8 }
 0x207   : > { %v3980_v63 = vpop.f32.mrb[16].mxu1  ;;  %v4116_v5 = vpop.f32.mrb[16].mxu0  ;;  %3074 = vst.msk [vmem:[%s5449_s23 + $0x34] sm:$0xf] %vm3060_vm8, %v3652_v30  ;;  %v3222_v52 = vsel %vm3093_vm9, %v3178_v62, 0.0  ;;  %v3224_v21 = vsel %vm3093_vm9, %v3179_v50, 0.0 }
 0x208   : > { %v4148_v49 = vadd.f32 %v4116_v5, %v3980_v63  ;;  %v1979_v54 = vpop.f32.mrb[17].mxu1  ;;  %v2837_v36 = vpop.f32.mrb[17].mxu0  ;;  %v3122_v13 = vadd.f32 %v3121_v19, %v3120_v40  ;;  %v3223_v45 = vadd.f32 %v3222_v52, %v3221_v1  ;;  %v3123_v51 = vsel %vm3093_vm9, %v4146_v8, 0.0 }
 0x209   : > { %v4149_v3 = vadd.f32 %v2837_v36, %v1979_v54  ;;  %v3981_v4 = vpop.f32.mrb[18].mxu1  ;;  %v4117_v11 = vpop.f32.mrb[18].mxu0  ;;  %v3226_v6 = vsel %vm3093_vm9, %v3180_v16, 0.0 }
 0x20a   : > { %v3657_v24 = vpack.c.bf16 %v4148_v49, %v4148_v49  ;;  %v1982_v9 = vpop.f32.mrb[19].mxu1  ;;  %v2840_v10 = vpop.f32.mrb[19].mxu0  ;;  %v3225_v58 = vadd.f32 %v3224_v21, %v3223_v45  ;;  %v3124_v42 = vadd.f32 %v3123_v51, %v3122_v13  ;;  %v4150_v15 = vadd.f32 %v4117_v11, %v3981_v4 }
 0x20b   : > { %v3655_v33 = vpack.c.bf16 %v4149_v3, %v4149_v3  ;;  %v3125_v31 = vsel %vm3093_vm9, %v4149_v3, 0.0  ;;  %v3181_v39 = vmul.f32 %v4149_v3, %v4149_v3  ;;  %v4151_v27 = vadd.f32 %v2840_v10, %v1982_v9 }
 0x20c   : > { %3079 = vst.msk [vmem:[%s5449_s23 + $0x48] sm:$0xf] %vm3060_vm8, %v3657_v24  ;;  %v3183_v60 = vmul.f32 %v4148_v49, %v4148_v49  ;;  %v3126_v14 = vadd.f32 %v3125_v31, %v3124_v42  ;;  %v3227_v28 = vadd.f32 %v3226_v6, %v3225_v58  ;;  %v3658_v25 = vpack.c.bf16 %v4150_v15, %v4150_v15 }
 0x20d   : > { %3077 = vst.msk [vmem:[%s5449_s23 + $0x40] sm:$0xf] %vm3060_vm8, %v3655_v33  ;;  %v3228_v7 = vsel %vm3093_vm9, %v3181_v39, 0.0  ;;  %v3656_v38 = vpack.c.bf16 %v4151_v27, %v4151_v27  ;;  %v3127_v26 = vsel %vm3093_vm9, %v4151_v27, 0.0  ;;  %v3182_v29 = vmul.f32 %v4151_v27, %v4151_v27 }
 0x20e   : > { %v3229_v32 = vadd.f32 %v3228_v7, %v3227_v28  ;;  %3080 = vst.msk [vmem:[%s5449_s23 + $0x4c] sm:$0xf] %vm3060_vm8, %v3658_v25  ;;  %v3128_v18 = vadd.f32 %v3127_v26, %v3126_v14  ;;  %v3129_v23 = vsel %vm3093_vm9, %v4148_v49, 0.0  ;;  %v3184_v59 = vmul.f32 %v4150_v15, %v4150_v15 }
 0x20f   : > { %v3984_v46 = vpop.f32.mrb[20].mxu1  ;;  %v4120_v47 = vpop.f32.mrb[20].mxu0  ;;  %3078 = vst.msk [vmem:[%s5449_s23 + $0x44] sm:$0xf] %vm3060_vm8, %v3656_v38  ;;  %v3230_v35 = vsel %vm3093_vm9, %v3182_v29, 0.0  ;;  %v3232_v61 = vsel %vm3093_vm9, %v3183_v60, 0.0 }
 0x210   : > { %v4152_v43 = vadd.f32 %v4120_v47, %v3984_v46  ;;  %v1995_v55 = vpop.f32.mrb[21].mxu1  ;;  %v2853_v12 = vpop.f32.mrb[21].mxu0  ;;  %v3130_v56 = vadd.f32 %v3129_v23, %v3128_v18  ;;  %v3231_v53 = vadd.f32 %v3230_v35, %v3229_v32  ;;  %v3131_v37 = vsel %vm3093_vm9, %v4150_v15, 0.0 }
 0x211   : > { %v4153_v48 = vadd.f32 %v2853_v12, %v1995_v55  ;;  %v3985_v44 = vpop.f32.mrb[22].mxu1  ;;  %v4121_v2 = vpop.f32.mrb[22].mxu0  ;;  %v3234_v62 = vsel %vm3093_vm9, %v3184_v59, 0.0 }
 0x212   : > { %v3661_v17 = vpack.c.bf16 %v4152_v43, %v4152_v43  ;;  %v1998_v8 = vpop.f32.mrb[23].mxu1  ;;  %v2856_v34 = vpop.f32.mrb[23].mxu0  ;;  %v3233_v0 = vadd.f32 %v3232_v61, %v3231_v53  ;;  %v3132_v22 = vadd.f32 %v3131_v37, %v3130_v56  ;;  %v4154_v30 = vadd.f32 %v4121_v2, %v3985_v44 }
 0x213   : > { %v3659_v41 = vpack.c.bf16 %v4153_v48, %v4153_v48  ;;  %v3133_v50 = vsel %vm3093_vm9, %v4153_v48, 0.0  ;;  %v3185_v20 = vmul.f32 %v4153_v48, %v4153_v48  ;;  %v4155_v57 = vadd.f32 %v2856_v34, %v1998_v8 }
 0x214   : > { %3083 = vst.msk [vmem:[%s5449_s23 + $0x58] sm:$0xf] %vm3060_vm8, %v3661_v17  ;;  %v3187_v5 = vmul.f32 %v4152_v43, %v4152_v43  ;;  %v3134_v1 = vadd.f32 %v3133_v50, %v3132_v22  ;;  %v3235_v40 = vadd.f32 %v3234_v62, %v3233_v0  ;;  %v3662_v49 = vpack.c.bf16 %v4154_v30, %v4154_v30 }
 0x215   : > { %3081 = vst.msk [vmem:[%s5449_s23 + $0x50] sm:$0xf] %vm3060_vm8, %v3659_v41  ;;  %v3236_v63 = vsel %vm3093_vm9, %v3185_v20, 0.0  ;;  %v3660_v54 = vpack.c.bf16 %v4155_v57, %v4155_v57  ;;  %v3135_v36 = vsel %vm3093_vm9, %v4155_v57, 0.0  ;;  %v3186_v19 = vmul.f32 %v4155_v57, %v4155_v57 }
 0x216   : > { %v3237_v3 = vadd.f32 %v3236_v63, %v3235_v40  ;;  %3084 = vst.msk [vmem:[%s5449_s23 + $0x5c] sm:$0xf] %vm3060_vm8, %v3662_v49  ;;  %v3136_v4 = vadd.f32 %v3135_v36, %v3134_v1  ;;  %v3137_v45 = vsel %vm3093_vm9, %v4152_v43, 0.0  ;;  %v3188_v24 = vmul.f32 %v4154_v30, %v4154_v30 }
 0x217   : > { %v3988_v16 = vpop.f32.mrb[24].mxu1  ;;  %v4124_v52 = vpop.f32.mrb[24].mxu0  ;;  %3082 = vst.msk [vmem:[%s5449_s23 + $0x54] sm:$0xf] %vm3060_vm8, %v3660_v54  ;;  %v3238_v9 = vsel %vm3093_vm9, %v3186_v19, 0.0  ;;  %v3240_v31 = vsel %vm3093_vm9, %v3187_v5, 0.0 }
 0x218   : > { %v4156_v11 = vadd.f32 %v4124_v52, %v3988_v16  ;;  %v2011_v21 = vpop.f32.mrb[25].mxu1  ;;  %v2869_v13 = vpop.f32.mrb[25].mxu0  ;;  %v3138_v39 = vadd.f32 %v3137_v45, %v3136_v4  ;;  %v3239_v58 = vadd.f32 %v3238_v9, %v3237_v3  ;;  %v3139_v6 = vsel %vm3093_vm9, %v4154_v30, 0.0 }
 0x219   : > { %v4157_v10 = vadd.f32 %v2869_v13, %v2011_v21  ;;  %v3989_v51 = vpop.f32.mrb[26].mxu1  ;;  %v4125_v33 = vpop.f32.mrb[26].mxu0  ;;  %v3242_v29 = vsel %vm3093_vm9, %v3188_v24, 0.0 }
 0x21a   : > { %v3665_v42 = vpack.c.bf16 %v4156_v11, %v4156_v11  ;;  %v2014_v15 = vpop.f32.mrb[27].mxu1  ;;  %v2872_v27 = vpop.f32.mrb[27].mxu0  ;;  %v3241_v28 = vadd.f32 %v3240_v31, %v3239_v58  ;;  %v3140_v25 = vadd.f32 %v3139_v6, %v3138_v39  ;;  %v4158_v38 = vadd.f32 %v4125_v33, %v3989_v51 }
 0x21b   : > { %v3663_v7 = vpack.c.bf16 %v4157_v10, %v4157_v10  ;;  %v3141_v60 = vsel %vm3093_vm9, %v4157_v10, 0.0  ;;  %v3189_v14 = vmul.f32 %v4157_v10, %v4157_v10  ;;  %v4159_v26 = vadd.f32 %v2872_v27, %v2014_v15 }
 0x21c   : > { %3087 = vst.msk [vmem:[%s5449_s23 + $0x68] sm:$0xf] %vm3060_vm8, %v3665_v42  ;;  %v3191_v47 = vmul.f32 %v4156_v11, %v4156_v11  ;;  %v3142_v32 = vadd.f32 %v3141_v60, %v3140_v25  ;;  %v3243_v18 = vadd.f32 %v3242_v29, %v3241_v28  ;;  %v3666_v43 = vpack.c.bf16 %v4158_v38, %v4158_v38 }
 0x21d   : > { %3085 = vst.msk [vmem:[%s5449_s23 + $0x60] sm:$0xf] %vm3060_vm8, %v3663_v7  ;;  %v3244_v46 = vsel %vm3093_vm9, %v3189_v14, 0.0  ;;  %v3664_v55 = vpack.c.bf16 %v4159_v26, %v4159_v26  ;;  %v3143_v12 = vsel %vm3093_vm9, %v4159_v26, 0.0  ;;  %v3190_v23 = vmul.f32 %v4159_v26, %v4159_v26 }
 0x21e   : > { %v3245_v48 = vadd.f32 %v3244_v46, %v3243_v18  ;;  %3088 = vst.msk [vmem:[%s5449_s23 + $0x6c] sm:$0xf] %vm3060_vm8, %v3666_v43  ;;  %v3144_v44 = vadd.f32 %v3143_v12, %v3142_v32  ;;  %v3145_v53 = vsel %vm3093_vm9, %v4156_v11, 0.0  ;;  %v3192_v17 = vmul.f32 %v4158_v38, %v4158_v38 }
 0x21f   : > { %v3992_v59 = vpop.f32.mrb[28].mxu1  ;;  %v4128_v35 = vpop.f32.mrb[28].mxu0  ;;  %3086 = vst.msk [vmem:[%s5449_s23 + $0x64] sm:$0xf] %vm3060_vm8, %v3664_v55  ;;  %v3246_v8 = vsel %vm3093_vm9, %v3190_v23, 0.0  ;;  %v3248_v50 = vsel %vm3093_vm9, %v3191_v47, 0.0 }
 0x220   : > { %v4160_v2 = vadd.f32 %v4128_v35, %v3992_v59  ;;  %v2027_v61 = vpop.f32.mrb[29].mxu1  ;;  %v2885_v56 = vpop.f32.mrb[29].mxu0  ;;  %v3146_v20 = vadd.f32 %v3145_v53, %v3144_v44  ;;  %v3247_v0 = vadd.f32 %v3246_v8, %v3245_v48  ;;  %v3147_v62 = vsel %vm3093_vm9, %v4158_v38, 0.0 }
 0x221   : > { %v4161_v34 = vadd.f32 %v2885_v56, %v2027_v61  ;;  %v3993_v37 = vpop.f32.mrb[30].mxu1  ;;  %v4129_v41 = vpop.f32.mrb[30].mxu0  ;;  %v3250_v19 = vsel %vm3093_vm9, %v3192_v17, 0.0 }
 0x222   : > { %v3669_v22 = vpack.c.bf16 %v4160_v2, %v4160_v2  ;;  %v2030_v30 = vpop.f32.mrb[31].mxu1  ;;  %v2888_v57 = vpop.f32.mrb[31].mxu0  ;;  %v3249_v40 = vadd.f32 %v3248_v50, %v3247_v0  ;;  %v3148_v49 = vadd.f32 %v3147_v62, %v3146_v20  ;;  %v4162_v54 = vadd.f32 %v4129_v41, %v3993_v37 }
 0x223   : > { %v3667_v63 = vpack.c.bf16 %v4161_v34, %v4161_v34  ;;  %v3149_v5 = vsel %vm3093_vm9, %v4161_v34, 0.0  ;;  %v3193_v1 = vmul.f32 %v4161_v34, %v4161_v34  ;;  %v4163_v36 = vadd.f32 %v2888_v57, %v2030_v30 }
 0x224   : > { %3091 = vst.msk [vmem:[%s5449_s23 + $0x78] sm:$0xf] %vm3060_vm8, %v3669_v22  ;;  %v3150_v52 = vadd.f32 %v3149_v5, %v3148_v49  ;;  %v3251_v3 = vadd.f32 %v3250_v19, %v3249_v40  ;;  %v3670_v4 = vpack.c.bf16 %v4162_v54, %v4162_v54  ;;  %v3195_v11 = vmul.f32 %v4160_v2, %v4160_v2 }
 0x225   : > { %3089 = vst.msk [vmem:[%s5449_s23 + $0x70] sm:$0xf] %vm3060_vm8, %v3667_v63  ;;  %v3252_v16 = vsel %vm3093_vm9, %v3193_v1, 0.0  ;;  %v3668_v21 = vpack.c.bf16 %v4163_v36, %v4163_v36  ;;  %v3151_v13 = vsel %vm3093_vm9, %v4163_v36, 0.0  ;;  %v3194_v45 = vmul.f32 %v4163_v36, %v4163_v36 }
 0x226   : > { %v3253_v24 = vadd.f32 %v3252_v16, %v3251_v3  ;;  %3092 = vst.msk [vmem:[%s5449_s23 + $0x7c] sm:$0xf] %vm3060_vm8, %v3670_v4  ;;  %v3152_v9 = vadd.f32 %v3151_v13, %v3150_v52  ;;  %v3153_v10 = vsel %vm3093_vm9, %v4160_v2, 0.0  ;;  %v3196_v51 = vmul.f32 %v4162_v54, %v4162_v54 }
 0x227   : > { %3090 = vst.msk [vmem:[%s5449_s23 + $0x74] sm:$0xf] %vm3060_vm8, %v3668_v21  ;;  %v3254_v33 = vsel %vm3093_vm9, %v3194_v45, 0.0  ;;  %v3256_v58 = vsel %vm3093_vm9, %v3195_v11, 0.0  ;;  %v3155_v42 = vsel %vm3093_vm9, %v4162_v54, 0.0 }
 0x228   : > { %v3154_v31 = vadd.f32 %v3153_v10, %v3152_v9  ;;  %v3255_v39 = vadd.f32 %v3254_v33, %v3253_v24  ;;  %v3258_v6 = vsel %vm3093_vm9, %v3196_v51, 0.0 }
 0x22a   : > { %v3156_v15 = vadd.f32 %v3155_v42, %v3154_v31  ;;  %v3257_v27 = vadd.f32 %v3256_v58, %v3255_v39 }
 0x22c   : > { %v3157_v7 = vrot.slane %v3156_v15, 4  ;;  %v3259_v60 = vadd.f32 %v3258_v6, %v3257_v27 }
 0x22e   : > { %v3158_v14 = vadd.f32 %v3157_v7, %v3156_v15  ;;  %v3260_v28 = vrot.slane %v3259_v60, 4 }
 0x230   : > { %v3159_v25 = vrot.slane %v3158_v14, 2  ;;  %v3261_v38 = vadd.f32 %v3260_v28, %v3259_v60 }
 0x232   : > { %v3160_v26 = vadd.f32 %v3159_v25, %v3158_v14  ;;  %v3262_v29 = vrot.slane %v3261_v38, 2 }
 0x234   : > { %v3161_v46 = vrot.slane %v3160_v26, 1  ;;  %v3263_v47 = vadd.f32 %v3262_v29, %v3261_v38 }
 0x236   : > { %v3162_v32 = vadd.f32 %v3161_v46, %v3160_v26  ;;  %v3264_v18 = vrot.slane %v3263_v47, 1 }
 0x238   : > { %3164 = vst.msk [vmem:[%s212_s25] sm:$0x1] %vm3163_vm10, %v3162_v32  ;;  %v3265_v43 = vadd.f32 %v3264_v18, %v3263_v47 }
 0x23a   : > { %3266 = vst.msk [vmem:[%s215_s28] sm:$0x1] %vm3163_vm10, %v3265_v43 }
 0x23b PF: > { %s15_s15 = sadd.s32 1, %s4435_s15  }
 0x23c   : > { %p12_p5 = scmp.ge.s32.totalorder %s15_s15, 4  }
 0x23e   :  { %14 = sbr.rel (!%p12_p5) target bundleno = 1 (0x1), region = 90 }

// kernel: double_conv.6
= control target key start
LH: loop header
LB: loop body
LE: loop exit
PB: predicated region body
PF: predicated region fallthrough
CT: control target
= control target key end

     0   :  { %s4461_s15 = smov 0   ;;  %s5597_s0 = inlined_call_operand.vmem [shape: bf16[2,18,18,8], index: 0, kind: input, shape index: {}]   ;;  %s5598_s1 = inlined_call_operand.vmem [shape: bf16[9,8,8], index: 1, kind: input, shape index: {}]   ;;  %s5599_s2 = inlined_call_operand.vmem [shape: bf16[512,8], index: 2, kind: output, shape index: {0}]   ;;  %s5600_s3 = inlined_call_operand.vmem [shape: f32[2,1,8], index: 3, kind: output, shape index: {1}]   ;;  %s5601_s4 = inlined_call_operand.vmem [shape: f32[2,1,8], index: 4, kind: output, shape index: {2}]  }
   0x1 LB: > { %s4467_s16 = sadd.s32 4294967295, %s4434_s15   ;;  %p3376_p0 = scmp.ge.s32.totalorder %s4434_s15, 1  ;;  %s4434_s15 = sphi %s4461_s15, %s15_s15  }
   0x2   : > { %p167_p1 = scmp.lt.s32.totalorder %s4434_s15, 3 }
   0x4   : > { %p168_p2 = pnand %p3376_p0, %p167_p1 }
   0x6   : > { %171 = sbr.rel (%p168_p2) target bundleno = 571 (0x23b), region = 28 }
   0xd   : > { %v3380_v0 = vld [vmem:[%s5598_s1 + $0x4] sm:$0xf]  ;;  %vm758_vm0 = vcmask 1043456   ;;  %v3512_v1 = vld [vmem:[%s5598_s1 + $0x10] sm:$0xf]  ;;  %p199_p3 = scmp.lt.s32.totalorder %s4467_s16, 1 }
   0xe   : > { %4387 = vmatprep.subr.msk.bf16.mxu1 %vm758_vm0, %v3380_v0  ;;  %4391 = vmatprep.subr.msk.bf16.mxu0 %vm758_vm0, %v3512_v1  ;;  %v760_v2 = vsel %vm758_vm0, %v3380_v0, 0  ;;  %v4482_v3 = vsel %vm758_vm0, %v3512_v1, 0  ;;  %v271_v4 = vld [vmem:[%s5598_s1] sm:$0xf]  ;;  %v3531_v5 = vld [vmem:[%s5598_s1 + $0x14] sm:$0xf] }
   0xf   : > { %5633 = vst [vmem:[#allocation2_spill] sm:$0xff] %v4482_v3  ;;  %3824 = vmatpush3.bf16.msra.mxu1 %v760_v2  ;;  %3960 = vmatpush3.bf16.msra.mxu0 %v4482_v3  ;;  %s4486_s21 = scalar_select %p199_p3, %s4467_s16, 1  ;;  %vm272_vm1 = vsmask.f32 3328  ;;  %vm273_vm2 = vsmask.f32 7440 }
  0x10   : > { %4388 = vmatprep.subr.msk.bf16.mxu1 %vm758_vm0, %v271_v4  ;;  %4393 = vmatprep.subr.msk.bf16.mxu0 %vm758_vm0, %v3531_v5  ;;  %v4503_v6 = vsel %vm758_vm0, %v271_v4, 0  ;;  %v4506_v7 = vsel %vm758_vm0, %v3531_v5, 0  ;;  %v4511_v8 = vld [vmem:[%s5598_s1 + $0x18] sm:$0xf]  ;;  %vm709_vm3 = vcmask 64512   ;;  %vm4547_vm4 = vmor %vm272_vm1, %vm273_vm2  ;;  %vm1231_vm5 = vcmask 1042432  }
  0x11   : > { %s4397_s26 = smul.u32 216, %s4486_s21  ;;  %v4535_v20 = vsel %vm758_vm0, %v4511_v8, 0  ;;  %vm1232_vm6 = vcmask 1046532   ;;  %s3378_s18 = sshll.u32 %s4467_s16, 5  ;;  %vm3060_vm8 = vcmask 60416   ;;  %vm3162_vm9 = vcmask 57344  }
  0x12   : > { %vm4728_vm7 = vmor %vm1231_vm5, %vm1232_vm6  ;;  %p205_p4 = scmp.lt.s32.totalorder %s3378_s18, 63  ;;  %s212_s25 = scalar_lea.vmem %s5600_s3, %s4486_s21 }
  0x13   : > { %s4500_s29 = scalar_lea.vmem %s5597_s0, %s4397_s26  ;;  %s215_s28 = scalar_lea.vmem %s5601_s4, %s4486_s21 }
  0x14   : > { %v4514_v9 = vld [vmem:[%s4500_s29] sm:$0xf]  ;;  %v4517_v10 = vld [vmem:[%s4500_s29 + $0x4] sm:$0xf]  ;;  %v219_v11 = vld [vmem:[%s4500_s29 + $0x8] sm:$0x1] }
  0x15   : > { %v276_v12 = vshrl.u32 %v4514_v9, 16  ;;  %v279_v13 = vshll.u32 %v4514_v9, 16  ;;  %v285_v14 = vshll.u32 %v4517_v10, 16  ;;  %v289_v15 = vshrl.u32 %v4517_v10, 16  ;;  %v4525_v16 = vld [vmem:[%s4500_s29 + $0xc] sm:$0xf] }
  0x16   : > { %v295_v17 = vshll.u32 %v219_v11, 16  ;;  %v4528_v18 = vld [vmem:[%s4500_s29 + $0x10] sm:$0xf]  ;;  %v4531_v19 = vld [vmem:[%s4500_s29 + $0x14] sm:$0x1]  ;;  %v300_v26 = vshrl.u32 %v4525_v16, 16 }
  0x17   : > { %v278_v21 = vrot.slane %v276_v12, 4  ;;  %v281_v22 = vrot.slane %v279_v13, 5  ;;  %v287_v23 = vrot.slane %v285_v14, 5  ;;  %v291_v24 = vrot.slane %v289_v15, 4  ;;  %v4543_v33 = vld [vmem:[%s4500_s29 + $0x18] sm:$0xf] }
  0x18   : > { %v297_v25 = vrot.slane %v295_v17, 5  ;;  %v303_v27 = vshll.u32 %v4525_v16, 16  ;;  %v309_v28 = vshll.u32 %v4528_v18, 16  ;;  %v313_v31 = vshrl.u32 %v4528_v18, 16  ;;  %v4556_v39 = vld [vmem:[%s4500_s29 + $0x1c] sm:$0xf] }
  0x19   : > { %v282_v29 = vor.u32 %v281_v22, %v278_v21  ;;  %v292_v30 = vor.u32 %v291_v24, %v287_v23  ;;  %v319_v32 = vshll.u32 %v4531_v19, 16  ;;  %v302_v35 = vrot.slane %v300_v26, 4  ;;  %v4560_v46 = vld [vmem:[%s4500_s29 + $0x20] sm:$0x1]  ;;  %v4570_v57 = vld [vmem:[%s4500_s29 + $0x24] sm:$0xf] }
  0x1a   : > { %v305_v36 = vrot.slane %v303_v27, 5  ;;  %v311_v37 = vrot.slane %v309_v28, 5  ;;  %v4553_v38 = vcombine.low %v4525_v16, %v4528_v18  ;;  %v315_v42 = vrot.slane %v313_v31, 4  ;;  %v4575_v62 = vld [vmem:[%s4500_s29 + $0x28] sm:$0xf]  ;;  %s5680_s18 = smov (!%p205_p4, %s3378_s18), 63 }
  0x1b   : > { %v283_v40 = vrot.slane %v282_v29, 4  ;;  %v293_v41 = vrot.slane %v292_v30, 4  ;;  %v321_v43 = vrot.slane %v319_v32, 5  ;;  %v1246_v45 = vrot.slane %v4531_v19, 5  ;;  %v4583_v4 = vld [vmem:[%s4500_s29 + $0x2c] sm:$0x1] }
  0x1c   : > { %v306_v44 = vor.u32 %v305_v36, %v302_v35  ;;  %v324_v47 = vshrl.u32 %v4543_v33, 16  ;;  %v327_v48 = vshll.u32 %v4543_v33, 16  ;;  %v316_v51 = vor.u32 %v315_v42, %v311_v37  ;;  %v4589_v14 = vld [vmem:[%s4500_s29 + $0x30] sm:$0xf]  ;;  %v4601_v28 = vld [vmem:[%s4500_s29 + $0x34] sm:$0xf] }
  0x1d   : > { %v288_v49 = vsel %vm4547_vm4, %v283_v40, %v287_v23  ;;  %v298_v50 = vsel %vm4547_vm4, %v293_v41, %v297_v25  ;;  %v333_v52 = vshll.u32 %v4556_v39, 16  ;;  %v337_v60 = vshrl.u32 %v4556_v39, 16  ;;  %v4596_v23 = vld [vmem:[%s5598_s1 + $0x8] sm:$0xf]  ;;  %v4608_v32 = vld [vmem:[%s4500_s29 + $0x38] sm:$0x1] }
  0x1e   : > { %v3381_v53 = vcombine.low %v288_v49, %v298_v50  ;;  %v307_v54 = vrot.slane %v306_v44, 4  ;;  %v326_v55 = vrot.slane %v324_v47, 4  ;;  %v329_v56 = vrot.slane %v327_v48, 5  ;;  %v4616_v48 = vld [vmem:[%s4500_s29 + $0x3c] sm:$0xf]  ;;  %s3379_s19 = sshll.u32 %s5680_s18, 2 }
  0x1f   : > { %v317_v58 = vrot.slane %v316_v51, 4  ;;  %v335_v59 = vrot.slane %v333_v52, 5  ;;  %v343_v61 = vshll.u32 %v4560_v46, 16  ;;  %v1250_v1 = vrot.slane %v4556_v39, 5  ;;  %v4624_v52 = vld [vmem:[%s4500_s29 + $0x40] sm:$0xf]  ;;  %s5448_s23 = scalar_lea.vmem %s5599_s2, %s3379_s19 }
  0x20   : > { %3825 = vmatprep.mubr.msk.bf16.mxu1 %vm709_vm3, %v3381_v53  ;;  %v312_v63 = vsel %vm4547_vm4, %v307_v54, %v311_v37  ;;  %v330_v0 = vor.u32 %v329_v56, %v326_v55  ;;  %v1253_v2 = vrot.slane %v4560_v46, 5  ;;  %v339_v11 = vrot.slane %v337_v60, 4 }
  0x21   : > { %v322_v5 = vsel %vm4547_vm4, %v317_v58, %v321_v43  ;;  %v345_v12 = vrot.slane %v343_v61, 5  ;;  %v348_v13 = vshrl.u32 %v4570_v57, 16  ;;  %v351_v21 = vshll.u32 %v4570_v57, 16 }
  0x22   : > { %v3382_v15 = vcombine.low %v312_v63, %v322_v5  ;;  %v331_v17 = vrot.slane %v330_v0, 4  ;;  %v357_v22 = vshll.u32 %v4575_v62, 16  ;;  %v340_v24 = vor.u32 %v339_v11, %v335_v59  ;;  %v4636_v5 = vld [vmem:[%s4500_s29 + $0x44] sm:$0x1] }
  0x23   : > { %v350_v25 = vrot.slane %v348_v13, 4  ;;  %v361_v26 = vshrl.u32 %v4575_v62, 16  ;;  %v367_v27 = vshll.u32 %v4583_v4, 16  ;;  %v353_v30 = vrot.slane %v351_v21, 5  ;;  %v4641_v13 = vld [vmem:[%s4500_s29 + $0x48] sm:$0xf] }
  0x24   : > { %3961 = vmatprep.mubr.msk.bf16.mxu0 %vm709_vm3, %v3382_v15  ;;  %3826 = vmatmul.mubr.msk.bf16.vlgmr.msra.gmra.mrb[0].mxu1 %vm709_vm3, %v3382_v15  ;;  %v336_v29 = vsel %vm4547_vm4, %v331_v17, %v335_v59  ;;  %v359_v31 = vrot.slane %v357_v22, 5  ;;  %v372_v35 = vshrl.u32 %v4589_v14, 16  ;;  %v341_v36 = vrot.slane %v340_v24, 4  ;;  %v4648_v24 = vld [vmem:[%s4500_s29 + $0x4c] sm:$0xf] }
  0x25   : > { %3858 = vmatpush3.bf16.msra.mxu1 %v4503_v6  ;;  %v363_v37 = vrot.slane %v361_v26, 4  ;;  %v369_v40 = vrot.slane %v367_v27, 5  ;;  %v375_v41 = vshll.u32 %v4589_v14, 16  ;;  %v354_v42 = vor.u32 %v353_v30, %v350_v25 }
  0x26   : > { %v374_v43 = vrot.slane %v372_v35, 4  ;;  %v381_v44 = vshll.u32 %v4601_v28, 16  ;;  %v385_v47 = vshrl.u32 %v4601_v28, 16  ;;  %4389 = vmatprep.subr.msk.bf16.mxu1 %vm758_vm0, %v4596_v23  ;;  %v346_v49 = vsel %vm4547_vm4, %v341_v36, %v345_v12 }
  0x27   : > { %v364_v6 = vor.u32 %v363_v37, %v359_v31  ;;  %v377_v50 = vrot.slane %v375_v41, 5  ;;  %v391_v51 = vshll.u32 %v4608_v32, 16  ;;  %v4626_v53 = vcombine.low %v336_v29, %v346_v49 }
  0x28   : > { %v355_v54 = vrot.slane %v354_v42, 4  ;;  %v383_v55 = vrot.slane %v381_v44, 5  ;;  %v387_v56 = vrot.slane %v385_v47, 4  ;;  %v396_v61 = vshrl.u32 %v4616_v48, 16  ;;  %v4670_v42 = vld [vmem:[%s4500_s29 + $0x54] sm:$0xf] }
  0x29   : > { %5636 = vst [vmem:[#allocation3_spill] sm:$0xff] %v4626_v53  ;;  %v365_v58 = vrot.slane %v364_v6, 4  ;;  %v378_v59 = vor.u32 %v377_v50, %v374_v43  ;;  %v393_v60 = vrot.slane %v391_v51, 5  ;;  %3962 = vmatmul.mubr.msk.bf16.vlgmr.msra.gmra.mrb[0].mxu0 %vm709_vm3, %v4626_v53  ;;  %3829 = vmatprep.mubr.msk.bf16.mxu1 %vm709_vm3, %v4626_v53  ;;  %v399_v11 = vshll.u32 %v4616_v48, 16  ;;  %5638 = vst [vmem:[#allocation5_spill] sm:$0xff] %v4670_v42 }
  0x2a   : > { %v360_v63 = vsel %vm4547_vm4, %v355_v54, %v359_v31  ;;  %v388_v0 = vor.u32 %v387_v56, %v383_v55  ;;  %v405_v12 = vshll.u32 %v4624_v52, 16  ;;  %3994 = vmatpush3.bf16.msra.mxu0 %v4506_v7  ;;  %v398_v21 = vrot.slane %v396_v61, 4  ;;  %v4675_v6 = vld [vmem:[%s4500_s29 + $0x58] sm:$0xf] }
  0x2b   : > { %v370_v15 = vsel %vm4547_vm4, %v365_v58, %v369_v40  ;;  %v379_v17 = vrot.slane %v378_v59, 4  ;;  %v409_v22 = vshrl.u32 %v4624_v52, 16  ;;  %v401_v27 = vrot.slane %v399_v11, 5  ;;  %4394 = vmatprep.subr.msk.bf16.mxu0 %vm758_vm0, %v4511_v8  ;;  %v4665_v8 = vld [vmem:[%s4500_s29 + $0x50] sm:$0x1] }
  0x2c   : > { %v4650_v25 = vcombine.low %v360_v63, %v370_v15  ;;  %v389_v26 = vrot.slane %v388_v0, 4  ;;  %v407_v29 = vrot.slane %v405_v12, 5  ;;  %v415_v31 = vshll.u32 %v4636_v5, 16  ;;  %v4688_v11 = vld [vmem:[%s4500_s29 + $0x5c] sm:$0x1] }
  0x2d   : > { %v384_v7 = vsel %vm4547_vm4, %v379_v17, %v383_v55  ;;  %v411_v30 = vrot.slane %v409_v22, 4  ;;  %v420_v35 = vshrl.u32 %v4641_v13, 16  ;;  %v402_v37 = vor.u32 %v401_v27, %v398_v21  ;;  %v4692_v15 = vld [vmem:[%s4500_s29 + $0x60] sm:$0xf]  ;;  %v4697_v27 = vld [vmem:[%s4500_s29 + $0x64] sm:$0xf] }
  0x2e   : > { %5637 = vst [vmem:[#allocation4_spill] sm:$0xff] %v4650_v25  ;;  %3965 = vmatprep.mubr.msk.bf16.mxu0 %vm709_vm3, %v4650_v25  ;;  %3830 = vmatmul.mubr.msk.bf16.gmra.mrb[4].mxu1 %vm709_vm3, %v4650_v25  ;;  %v394_v36 = vsel %vm4547_vm4, %v389_v26, %v393_v60  ;;  %v423_v40 = vshll.u32 %v4641_v13, 16  ;;  %v429_v41 = vshll.u32 %v4648_v24, 16  ;;  %v417_v47 = vrot.slane %v415_v31, 5  ;;  %v4909_v25 = vld [vmem:[%s4500_s29 + $0xa8] sm:$0xf] }
  0x2f   : > { %v4672_v43 = vcombine.low %v384_v7, %v394_v36  ;;  %v412_v44 = vor.u32 %v411_v30, %v407_v29  ;;  %v422_v49 = vrot.slane %v420_v35, 4  ;;  %v403_v50 = vrot.slane %v402_v37, 4 }
  0x30   : > { %v425_v51 = vrot.slane %v423_v40, 5  ;;  %v431_v54 = vrot.slane %v429_v41, 5  ;;  %v433_v55 = vshrl.u32 %v4648_v24, 16  ;;  %v439_v58 = vshll.u32 %v4665_v8, 16 }
  0x31   : > { %5639 = vst [vmem:[#allocation6_spill] sm:$0xff] %v4672_v43  ;;  %3833 = vmatprep.mubr.msk.bf16.mxu1 %vm709_vm3, %v4672_v43  ;;  %v413_v56 = vrot.slane %v412_v44, 4  ;;  %v444_v59 = vshrl.u32 %v4670_v42, 16  ;;  %v447_v60 = vshll.u32 %v4670_v42, 16  ;;  %3966 = vmatmul.mubr.msk.bf16.gmra.mrb[4].mxu0 %vm709_vm3, %v4672_v43  ;;  %v408_v61 = vsel %vm4547_vm4, %v403_v50, %v407_v29 }
  0x32   : > { %v426_v63 = vor.u32 %v425_v51, %v422_v49  ;;  %v435_v0 = vrot.slane %v433_v55, 4  ;;  %v453_v12 = vshll.u32 %v4675_v6, 16  ;;  %v441_v21 = vrot.slane %v439_v58, 5 }
  0x33   : > { %v418_v17 = vsel %vm4547_vm4, %v413_v56, %v417_v47  ;;  %v446_v22 = vrot.slane %v444_v59, 4  ;;  %v449_v26 = vrot.slane %v447_v60, 5  ;;  %v457_v36 = vshrl.u32 %v4675_v6, 16  ;;  %v4711_v47 = vld [vmem:[%s4500_s29 + $0x68] sm:$0x1] }
  0x34   : > { %v4699_v7 = vcombine.low %v408_v61, %v418_v17  ;;  %v427_v29 = vrot.slane %v426_v63, 4  ;;  %v436_v30 = vor.u32 %v435_v0, %v431_v54  ;;  %v455_v31 = vrot.slane %v453_v12, 5 }
  0x35   : > { %v450_v35 = vor.u32 %v449_v26, %v446_v22  ;;  %v463_v37 = vshll.u32 %v4688_v11, 16  ;;  %v468_v40 = vshrl.u32 %v4692_v15, 16  ;;  %v471_v49 = vshll.u32 %v4692_v15, 16 }
  0x36   : > { %5640 = vst [vmem:[#allocation7_spill] sm:$0xff] %v4699_v7  ;;  %3969 = vmatprep.mubr.msk.bf16.mxu0 %vm709_vm3, %v4699_v7  ;;  %3834 = vmatmul.mubr.msk.bf16.gmra.mrb[8].mxu1 %vm709_vm3, %v4699_v7  ;;  %v432_v41 = vsel %vm4547_vm4, %v427_v29, %v431_v54  ;;  %v437_v44 = vrot.slane %v436_v30, 4  ;;  %v477_v50 = vshll.u32 %v4697_v27, 16  ;;  %v459_v55 = vrot.slane %v457_v36, 4  ;;  %v4719_v54 = vld [vmem:[%s4500_s29 + $0x6c] sm:$0xf] }
  0x37   : > { %v451_v51 = vrot.slane %v450_v35, 4  ;;  %v465_v56 = vrot.slane %v463_v37, 5  ;;  %v470_v58 = vrot.slane %v468_v40, 4  ;;  %v473_v60 = vrot.slane %v471_v49, 5  ;;  %v4735_v36 = vld [vmem:[%s4500_s29 + $0x70] sm:$0xf] }
  0x38   : > { %v442_v59 = vsel %vm4547_vm4, %v437_v44, %v441_v21  ;;  %v479_v61 = vrot.slane %v477_v50, 5  ;;  %v481_v63 = vshrl.u32 %v4697_v27, 16  ;;  %v460_v17 = vor.u32 %v459_v55, %v455_v31  ;;  %v4886_v7 = vld [vmem:[%s4500_s29 + $0xa0] sm:$0xf] }
  0x39   : > { %v4721_v0 = vcombine.low %v432_v41, %v442_v59  ;;  %v456_v12 = vsel %vm4547_vm4, %v451_v51, %v455_v31  ;;  %v487_v22 = vshll.u32 %v4711_v47, 16  ;;  %v474_v21 = vor.u32 %v473_v60, %v470_v58  ;;  %v4748_v51 = vld [vmem:[%s4500_s29 + $0x74] sm:$0x1] }
  0x3a   : > { %v483_v29 = vrot.slane %v481_v63, 4  ;;  %v3446_v30 = vrot.slane %v4525_v16, 9  ;;  %v1243_v35 = vrot.slane %v4528_v18, 5  ;;  %v461_v31 = vrot.slane %v460_v17, 4 }
  0x3b   : > { %5641 = vst [vmem:[#allocation8_spill] sm:$0xff] %v4721_v0  ;;  %3970 = vmatmul.mubr.msk.bf16.gmra.mrb[8].mxu0 %vm709_vm3, %v4721_v0  ;;  %3837 = vmatprep.mubr.msk.bf16.mxu1 %vm709_vm3, %v4721_v0  ;;  %v489_v37 = vrot.slane %v487_v22, 5  ;;  %v492_v40 = vshrl.u32 %v4719_v54, 16  ;;  %v495_v41 = vshll.u32 %v4719_v54, 16  ;;  %v475_v44 = vrot.slane %v474_v21, 4 }
  0x3c   : > { %v484_v49 = vor.u32 %v483_v29, %v479_v61  ;;  %v1244_v16 = vsel %vm4728_vm7, %v3446_v30, %v1243_v35  ;;  %v1245_v18 = vrot.slane %v1243_v35, 4  ;;  %v466_v50 = vsel %vm4547_vm4, %v461_v31, %v465_v56  ;;  %v4760_v56 = vld [vmem:[%s4500_s29 + $0x78] sm:$0xf]  ;;  %v4776_v31 = vld [vmem:[%s4500_s29 + $0x7c] sm:$0xf] }
  0x3d   : > { %v494_v55 = vrot.slane %v492_v40, 4  ;;  %v497_v58 = vrot.slane %v495_v41, 5  ;;  %v501_v59 = vshll.u32 %v4735_v36, 16  ;;  %v4751_v60 = vcombine.low %v456_v12, %v466_v50 }
  0x3e   : > { %v480_v63 = vsel %vm4547_vm4, %v475_v44, %v479_v61  ;;  %v485_v17 = vrot.slane %v484_v49, 4  ;;  %v1247_v22 = vsel %vm4728_vm7, %v1245_v18, %v1246_v45  ;;  %v505_v35 = vshrl.u32 %v4735_v36, 16  ;;  %v4781_v49 = vld [vmem:[%s4500_s29 + $0x80] sm:$0x1] }
  0x3f   : > { %5644 = vst [vmem:[#allocation9_spill] sm:$0xff] %v4751_v60  ;;  %v4762_v21 = vcombine.low %v1244_v16, %v1247_v22  ;;  %v498_v29 = vor.u32 %v497_v58, %v494_v55  ;;  %v503_v30 = vrot.slane %v501_v59, 5  ;;  %3973 = vmatprep.mubr.msk.bf16.mxu0 %vm709_vm3, %v4751_v60  ;;  %3838 = vmatmul.mubr.msk.bf16.gmra.mrb[12].mxu1 %vm709_vm3, %v4751_v60  ;;  %v511_v45 = vshll.u32 %v4748_v51, 16  ;;  %v4879_v60 = vld [vmem:[%s4500_s29 + $0x9c] sm:$0xf] }
  0x40   : > { %v490_v19 = vsel %vm4547_vm4, %v485_v17, %v489_v37  ;;  %v3447_v61 = vrot.slane %v4543_v33, 9  ;;  %v1252_v12 = vrot.slane %v1250_v1, 4  ;;  %v507_v44 = vrot.slane %v505_v35, 4 }
  0x41   : > { %5645 = vst [vmem:[#allocation10_spill] sm:$0xff] %v4762_v21  ;;  %v4778_v40 = vcombine.low %v480_v63, %v490_v19  ;;  %v499_v41 = vrot.slane %v498_v29, 4  ;;  %v516_v16 = vshrl.u32 %v4760_v56, 16  ;;  %v513_v18 = vrot.slane %v511_v45, 5  ;;  %v4807_v29 = vld [vmem:[%s4500_s29 + $0x84] sm:$0xf] }
  0x42   : > { %v1251_v37 = vsel %vm4728_vm7, %v3447_v61, %v1250_v1  ;;  %v1254_v50 = vsel %vm4728_vm7, %v1252_v12, %v1253_v2  ;;  %v519_v55 = vshll.u32 %v4760_v56, 16  ;;  %v508_v59 = vor.u32 %v507_v44, %v503_v30 }
  0x43   : > { %5646 = vst [vmem:[#allocation11_spill] sm:$0xff] %v4778_v40  ;;  %3974 = vmatmul.mubr.msk.bf16.gmra.mrb[12].mxu0 %vm709_vm3, %v4778_v40  ;;  %3841 = vmatprep.mubr.msk.bf16.mxu1 %vm709_vm3, %v4778_v40  ;;  %v504_v58 = vsel %vm4547_vm4, %v499_v41, %v503_v30  ;;  %v4799_v63 = vcombine.low %v1251_v37, %v1254_v50  ;;  %v518_v1 = vrot.slane %v516_v16, 4  ;;  %v525_v2 = vshll.u32 %v4776_v31, 16  ;;  %v4813_v16 = vld [vmem:[%s4500_s29 + $0x88] sm:$0xf] }
  0x44   : > { %3995 = vmatprep.mubr.msk.bf16.mxu0 %vm709_vm3, %v4762_v21  ;;  %v521_v46 = vrot.slane %v519_v55, 5  ;;  %v529_v17 = vshrl.u32 %v4776_v31, 16  ;;  %v535_v22 = vshll.u32 %v4781_v49, 16  ;;  %v509_v35 = vrot.slane %v508_v59, 4 }
  0x45   : > { %5647 = vst [vmem:[#allocation12_spill] sm:$0xff] %v4799_v63  ;;  %v3448_v30 = vrot.slane %v4570_v57, 9  ;;  %v1257_v19 = vrot.slane %v4575_v62, 5  ;;  %v1260_v45 = vrot.slane %v4583_v4, 5  ;;  %v527_v12 = vrot.slane %v525_v2, 5 }
  0x46   : > { %v522_v61 = vor.u32 %v521_v46, %v518_v1  ;;  %v531_v41 = vrot.slane %v529_v17, 4  ;;  %v537_v44 = vrot.slane %v535_v22, 5  ;;  %v514_v37 = vsel %vm4547_vm4, %v509_v35, %v513_v18  ;;  %v4823_v1 = vld [vmem:[%s4500_s29 + $0x8c] sm:$0x1] }
  0x47   : > { %v1258_v50 = vsel %vm4728_vm7, %v3448_v30, %v1257_v19  ;;  %v1259_v55 = vrot.slane %v1257_v19, 4  ;;  %v540_v59 = vshrl.u32 %v4807_v29, 16  ;;  %v4820_v3 = vcombine.low %v504_v58, %v514_v37 }
  0x48   : > { %v523_v40 = vrot.slane %v522_v61, 4  ;;  %v532_v4 = vor.u32 %v531_v41, %v527_v12  ;;  %v543_v46 = vshll.u32 %v4807_v29, 16  ;;  %v549_v18 = vshll.u32 %v4813_v16, 16  ;;  %v4837_v61 = vld [vmem:[%s4500_s29 + $0x90] sm:$0xf] }
  0x49   : > { %5648 = vst [vmem:[#allocation13_spill] sm:$0xff] %v4820_v3  ;;  %v1261_v2 = vsel %vm4728_vm7, %v1259_v55, %v1260_v45  ;;  %v542_v17 = vrot.slane %v540_v59, 4  ;;  %v553_v22 = vshrl.u32 %v4813_v16, 16  ;;  %3842 = vmatmul.mubr.msk.bf16.gmra.mrb[16].mxu1 %vm709_vm3, %v4820_v3  ;;  %v4842_v45 = vld [vmem:[%s5598_s1 + $0x1c] sm:$0xf]  ;;  %v1264_v59 = vrot.slane %v4601_v28, 5 }
  0x4a   : > { %v528_v58 = vsel %vm4547_vm4, %v523_v40, %v527_v12  ;;  %v533_v35 = vrot.slane %v532_v4, 4  ;;  %v4834_v30 = vcombine.low %v1258_v50, %v1261_v2  ;;  %v545_v19 = vrot.slane %v543_v46, 5  ;;  %5650 = vst [vmem:[#allocation15_spill] sm:$0xff] %v4842_v45  ;;  %v4856_v46 = vld [vmem:[%s4500_s29 + $0x94] sm:$0xf] }
  0x4b   : > { %3996 = vmatmul.mubr.msk.bf16.vlgmr.msra.gmra.mrb[0].mxu0 %vm709_vm3, %v4799_v63  ;;  %v551_v41 = vrot.slane %v549_v18, 5  ;;  %v555_v37 = vrot.slane %v553_v22, 4  ;;  %v559_v40 = vshll.u32 %v4823_v1, 16  ;;  %v3449_v12 = vrot.slane %v4589_v14, 9  ;;  %v4861_v3 = vld [vmem:[%s4500_s29 + $0x98] sm:$0x1] }
  0x4c   : > { %5649 = vst [vmem:[#allocation14_spill] sm:$0xff] %v4834_v30  ;;  %4028 = vmatpush3.bf16.msra.mxu0 %v4535_v20  ;;  %v538_v50 = vsel %vm4547_vm4, %v533_v35, %v537_v44  ;;  %3999 = vmatprep.mubr.msk.bf16.mxu0 %vm709_vm3, %v4834_v30  ;;  %v546_v55 = vor.u32 %v545_v19, %v542_v17  ;;  %v1267_v4 = vrot.slane %v4608_v32, 5  ;;  %v564_v20 = vshrl.u32 %v4837_v61, 16 }
  0x4d   : > { %v4858_v2 = vcombine.low %v528_v58, %v538_v50  ;;  %v556_v18 = vor.u32 %v555_v37, %v551_v41  ;;  %v561_v22 = vrot.slane %v559_v40, 5  ;;  %4395 = vmatprep.subr.msk.bf16.mxu0 %vm758_vm0, %v4842_v45  ;;  %v1265_v17 = vsel %vm4728_vm7, %v3449_v12, %v1264_v59 }
  0x4e   : > { %v547_v44 = vrot.slane %v546_v55, 4  ;;  %v1266_v35 = vrot.slane %v1264_v59, 4  ;;  %v567_v32 = vshll.u32 %v4837_v61, 16  ;;  %v566_v19 = vrot.slane %v564_v20, 4 }
  0x4f   : > { %5651 = vst [vmem:[#allocation16_spill] sm:$0xff] %v4858_v2  ;;  %3845 = vmatprep.mubr.msk.bf16.mxu1 %vm709_vm3, %v4858_v2  ;;  %v557_v58 = vrot.slane %v556_v18, 4  ;;  %v573_v37 = vshll.u32 %v4856_v46, 16  ;;  %v577_v40 = vshrl.u32 %v4856_v46, 16  ;;  %v583_v59 = vshll.u32 %v4861_v3, 16 }
  0x50   : > { %v552_v50 = vsel %vm4547_vm4, %v547_v44, %v551_v41  ;;  %v1268_v55 = vsel %vm4728_vm7, %v1266_v35, %v1267_v4  ;;  %v569_v12 = vrot.slane %v567_v32, 5  ;;  %v3450_v4 = vrot.slane %v4616_v48, 9 }
  0x51   : > { %v562_v2 = vsel %vm4547_vm4, %v557_v58, %v561_v22  ;;  %v4883_v18 = vcombine.low %v1265_v17, %v1268_v55  ;;  %v575_v20 = vrot.slane %v573_v37, 5  ;;  %v579_v0 = vrot.slane %v577_v40, 4  ;;  %v4899_v58 = vld [vmem:[%s4500_s29 + $0xa4] sm:$0x1] }
  0x52   : > { %v4888_v43 = vcombine.low %v552_v50, %v562_v2  ;;  %v570_v41 = vor.u32 %v569_v12, %v566_v19  ;;  %v585_v44 = vrot.slane %v583_v59, 5  ;;  %v1271_v32 = vrot.slane %v4624_v52, 5 }
  0x53   : > { %5652 = vst [vmem:[#allocation17_spill] sm:$0xff] %v4883_v18  ;;  %4000 = vmatmul.mubr.msk.bf16.gmra.mrb[4].mxu0 %vm709_vm3, %v4883_v18  ;;  %v580_v35 = vor.u32 %v579_v0, %v575_v20  ;;  %v1274_v22 = vrot.slane %v4636_v5, 5  ;;  %v588_v17 = vshrl.u32 %v4879_v60, 16  ;;  %v591_v19 = vshll.u32 %v4879_v60, 16 }
  0x54   : > { %5653 = vst [vmem:[#allocation18_spill] sm:$0xff] %v4888_v43  ;;  %3846 = vmatmul.mubr.msk.bf16.gmra.mrb[20].mxu1 %vm709_vm3, %v4888_v43  ;;  %v571_v2 = vrot.slane %v570_v41, 4  ;;  %v597_v37 = vshll.u32 %v4886_v7, 16  ;;  %v601_v0 = vshrl.u32 %v4886_v7, 16  ;;  %v1272_v5 = vsel %vm4728_vm7, %v3450_v4, %v1271_v32 }
  0x55   : > { %v581_v40 = vrot.slane %v580_v35, 4  ;;  %v1273_v50 = vrot.slane %v1271_v32, 4  ;;  %v590_v55 = vrot.slane %v588_v17, 4  ;;  %v593_v59 = vrot.slane %v591_v19, 5  ;;  %v4918_v32 = vld [vmem:[%s4500_s29 + $0xac] sm:$0xf] }
  0x56   : > { %v576_v12 = vsel %vm4547_vm4, %v571_v2, %v575_v20  ;;  %v599_v41 = vrot.slane %v597_v37, 5  ;;  %v603_v43 = vrot.slane %v601_v0, 4  ;;  %v607_v35 = vshll.u32 %v4899_v58, 16 }
  0x57   : > { %v586_v53 = vsel %vm4547_vm4, %v581_v40, %v585_v44  ;;  %v1275_v18 = vsel %vm4728_vm7, %v1273_v50, %v1274_v22  ;;  %v3451_v4 = vrot.slane %v4641_v13, 9  ;;  %v594_v2 = vor.u32 %v593_v59, %v590_v55 }
  0x58   : > { %v4920_v17 = vcombine.low %v576_v12, %v586_v53  ;;  %v4922_v20 = vcombine.low %v1272_v5, %v1275_v18  ;;  %v604_v19 = vor.u32 %v603_v43, %v599_v41  ;;  %v609_v37 = vrot.slane %v607_v35, 5  ;;  %v4932_v18 = vld [vmem:[%s4500_s29 + $0xb0] sm:$0x1] }
  0x59   : > { %v1278_v0 = vrot.slane %v4648_v24, 5  ;;  %v1281_v44 = vrot.slane %v4665_v8, 5  ;;  %v612_v22 = vshrl.u32 %v4909_v25, 16  ;;  %v595_v53 = vrot.slane %v594_v2, 4 }
  0x5a   : > { %5654 = vst [vmem:[#allocation19_spill] sm:$0xff] %v4920_v17  ;;  %5655 = vst [vmem:[#allocation20_spill] sm:$0xff] %v4922_v20  ;;  %3849 = vmatprep.mubr.msk.bf16.mxu1 %vm709_vm3, %v4920_v17  ;;  %4003 = vmatprep.mubr.msk.bf16.mxu0 %vm709_vm3, %v4922_v20  ;;  %v605_v40 = vrot.slane %v604_v19, 4  ;;  %v615_v43 = vshll.u32 %v4909_v25, 16  ;;  %v621_v5 = vshll.u32 %v4918_v32, 16  ;;  %v625_v12 = vshrl.u32 %v4918_v32, 16 }
  0x5b   : > { %v1279_v8 = vsel %vm4728_vm7, %v3451_v4, %v1278_v0  ;;  %v1280_v50 = vrot.slane %v1278_v0, 4  ;;  %v614_v55 = vrot.slane %v612_v22, 4  ;;  %v600_v59 = vsel %vm4547_vm4, %v595_v53, %v599_v41  ;;  %v4944_v17 = vld [vmem:[%s4500_s29 + $0xb4] sm:$0xf]  ;;  %v4956_v53 = vld [vmem:[%s4500_s29 + $0xb8] sm:$0xf] }
  0x5c   : > { %v610_v35 = vsel %vm4547_vm4, %v605_v40, %v609_v37  ;;  %v617_v2 = vrot.slane %v615_v43, 5  ;;  %v623_v19 = vrot.slane %v621_v5, 5  ;;  %v627_v0 = vrot.slane %v625_v12, 4 }
  0x5d   : > { %v4946_v20 = vcombine.low %v600_v59, %v610_v35  ;;  %v1282_v4 = vsel %vm4728_vm7, %v1280_v50, %v1281_v44  ;;  %v631_v22 = vshll.u32 %v4932_v18, 16  ;;  %v3452_v41 = vrot.slane %v4670_v42, 9  ;;  %v4962_v44 = vld [vmem:[%s4500_s29 + $0xbc] sm:$0x1] }
  0x5e   : > { %v4951_v30 = vcombine.low %v1279_v8, %v1282_v4  ;;  %v618_v63 = vor.u32 %v617_v2, %v614_v55  ;;  %v1285_v37 = vrot.slane %v4675_v6, 5  ;;  %v628_v40 = vor.u32 %v627_v0, %v623_v19 }
  0x5f   : > { %5656 = vst [vmem:[#allocation21_spill] sm:$0xff] %v4946_v20  ;;  %3850 = vmatmul.mubr.msk.bf16.gmra.mrb[24].mxu1 %vm709_vm3, %v4946_v20  ;;  %v633_v43 = vrot.slane %v631_v22, 5  ;;  %v1288_v5 = vrot.slane %v4688_v11, 5  ;;  %v636_v50 = vshrl.u32 %v4944_v17, 16  ;;  %v639_v59 = vshll.u32 %v4944_v17, 16 }
  0x60   : > { %5657 = vst [vmem:[#allocation22_spill] sm:$0xff] %v4951_v30  ;;  %4004 = vmatmul.mubr.msk.bf16.gmra.mrb[8].mxu0 %vm709_vm3, %v4951_v30  ;;  %v619_v8 = vrot.slane %v618_v63, 4  ;;  %v1286_v55 = vsel %vm4728_vm7, %v3452_v41, %v1285_v37  ;;  %v1287_v12 = vrot.slane %v1285_v37, 4  ;;  %v629_v35 = vrot.slane %v628_v40, 4 }
  0x61   : > { %v638_v2 = vrot.slane %v636_v50, 4  ;;  %v645_v4 = vshll.u32 %v4956_v53, 16  ;;  %v649_v11 = vshrl.u32 %v4956_v53, 16  ;;  %v641_v20 = vrot.slane %v639_v59, 5 }
  0x62   : > { %v624_v0 = vsel %vm4547_vm4, %v619_v8, %v623_v19  ;;  %v1289_v22 = vsel %vm4728_vm7, %v1287_v12, %v1288_v5  ;;  %v655_v63 = vshll.u32 %v4962_v44, 16  ;;  %v634_v41 = vsel %vm4547_vm4, %v629_v35, %v633_v43 }
  0x63   : > { %v4979_v37 = vcombine.low %v1286_v55, %v1289_v22  ;;  %v647_v40 = vrot.slane %v645_v4, 5  ;;  %v651_v50 = vrot.slane %v649_v11, 4  ;;  %v4981_v30 = vcombine.low %v624_v0, %v634_v41 }
  0x64   : > { %v642_v21 = vor.u32 %v641_v20, %v638_v2  ;;  %v657_v45 = vrot.slane %v655_v63, 5  ;;  %v3453_v42 = vrot.slane %v4692_v15, 9  ;;  %v1292_v5 = vrot.slane %v4697_v27, 5 }
  0x65   : > { %4007 = vmatprep.mubr.msk.bf16.mxu0 %vm709_vm3, %v4979_v37  ;;  %v652_v19 = vor.u32 %v651_v50, %v647_v40  ;;  %v1295_v8 = vrot.slane %v4711_v47, 5  ;;  %v3454_v43 = vrot.slane %v4719_v54, 9  ;;  %3853 = vmatprep.mubr.msk.bf16.mxu1 %vm709_vm3, %v4981_v30  ;;  %v3413_v20 = vcombine.low %v4514_v9, %v4517_v10 }
  0x66   : > { %v643_v55 = vrot.slane %v642_v21, 4  ;;  %v1299_v12 = vrot.slane %v4735_v36, 5  ;;  %v1302_v59 = vrot.slane %v4748_v51, 5  ;;  %v1293_v2 = vsel %vm4728_vm7, %v3453_v42, %v1292_v5 }
  0x67   : > { %v653_v35 = vrot.slane %v652_v19, 4  ;;  %v1294_v4 = vrot.slane %v1292_v5, 4  ;;  %v1306_v47 = vrot.slane %v4776_v31, 5  ;;  %v3455_v9 = vrot.slane %v4760_v56, 9 }
  0x68   : > { %v648_v11 = vsel %vm4547_vm4, %v643_v55, %v647_v40  ;;  %v1300_v21 = vsel %vm4728_vm7, %v3454_v43, %v1299_v12  ;;  %v1301_v0 = vrot.slane %v1299_v12, 4  ;;  %v1309_v42 = vrot.slane %v4781_v49, 5 }
  0x69   : > { %v658_v10 = vsel %vm4547_vm4, %v653_v35, %v657_v45  ;;  %v1296_v51 = vsel %vm4728_vm7, %v1294_v4, %v1295_v8  ;;  %v1308_v22 = vrot.slane %v1306_v47, 4  ;;  %v3456_v19 = vrot.slane %v4807_v29, 9 }
  0x6a   : > { %v5008_v63 = vcombine.low %v648_v11, %v658_v10  ;;  %v5010_v41 = vcombine.low %v1293_v2, %v1296_v51  ;;  %v1303_v40 = vsel %vm4728_vm7, %v1301_v0, %v1302_v59  ;;  %v1313_v5 = vrot.slane %v4813_v16, 5 }
  0x6b   : > { %v5014_v50 = vcombine.low %v1300_v21, %v1303_v40  ;;  %v1316_v49 = vrot.slane %v4823_v1, 5  ;;  %v1307_v45 = vsel %vm4728_vm7, %v3455_v9, %v1306_v47  ;;  %v1310_v8 = vsel %vm4728_vm7, %v1308_v22, %v1309_v42 }
  0x6c   : > { %3854 = vmatmul.mubr.msk.bf16.gmra.mrb[28].mxu1 %vm709_vm3, %v5008_v63  ;;  %4008 = vmatmul.mubr.msk.bf16.gmra.mrb[12].mxu0 %vm709_vm3, %v5010_v41  ;;  %v1315_v43 = vrot.slane %v1313_v5, 4  ;;  %v1320_v55 = vrot.slane %v4856_v46, 5  ;;  %v1327_v12 = vrot.slane %v4886_v7, 5  ;;  %v1314_v59 = vsel %vm4728_vm7, %v3456_v19, %v1313_v5 }
  0x6d   : > { %3859 = vmatprep.mubr.msk.bf16.mxu1 %vm709_vm3, %v3413_v20  ;;  %4011 = vmatprep.mubr.msk.bf16.mxu0 %vm709_vm3, %v5014_v50  ;;  %v5036_v20 = vcombine.low %v1307_v45, %v1310_v8  ;;  %v3457_v35 = vrot.slane %v4837_v61, 9  ;;  %v1323_v4 = vrot.slane %v4861_v3, 5  ;;  %v5042_v47 = vcombine.low %v4543_v33, %v4556_v39  ;;  %v5054_v3 = vld [vmem:[%s5598_s1 + $0xc] sm:$0xf] }
  0x6e   : > { %v1317_v1 = vsel %vm4728_vm7, %v1315_v43, %v1316_v49  ;;  %v1322_v2 = vrot.slane %v1320_v55, 4  ;;  %v3458_v11 = vrot.slane %v4879_v60, 9  ;;  %v1445_v21 = vsel %vm758_vm0, %v4596_v23, 0 }
  0x6f   : > { %v5047_v0 = vcombine.low %v1314_v59, %v1317_v1  ;;  %v1329_v9 = vrot.slane %v1327_v12, 4  ;;  %v1330_v10 = vrot.slane %v4899_v58, 5  ;;  %v1334_v51 = vrot.slane %v4918_v32, 5 }
  0x70   : > { %v1321_v33 = vsel %vm4728_vm7, %v3457_v35, %v1320_v55  ;;  %v1324_v39 = vsel %vm4728_vm7, %v1322_v2, %v1323_v4  ;;  %v5068_v23 = vcombine.low %v4570_v57, %v4575_v62  ;;  %v1328_v58 = vsel %vm4728_vm7, %v3458_v11, %v1327_v12 }
  0x71   : > { %v5074_v22 = vcombine.low %v4692_v15, %v4697_v27  ;;  %v1331_v42 = vsel %vm4728_vm7, %v1329_v9, %v1330_v10  ;;  %v3459_v40 = vrot.slane %v4909_v25, 9  ;;  %v1341_v19 = vrot.slane %v4956_v53, 5 }
  0x72   : > { %v5084_v57 = vcombine.low %v4719_v54, %v4735_v36  ;;  %v5088_v62 = vcombine.low %v1321_v33, %v1324_v39  ;;  %v1336_v15 = vrot.slane %v1334_v51, 4  ;;  %v1337_v27 = vrot.slane %v4932_v18, 5  ;;  %v267_v18 = vld [vmem:[%s4500_s29 + $0xc8] sm:$0x1] }
  0x73   : > { %v5093_v5 = vcombine.low %v4760_v56, %v4776_v31  ;;  %v5097_v49 = vcombine.low %v4807_v29, %v4813_v16  ;;  %v5101_v54 = vcombine.low %v4837_v61, %v4856_v46  ;;  %v5105_v36 = vcombine.low %v4879_v60, %v4886_v7  ;;  %v5124_v61 = vld [vmem:[%s4500_s29 + $0xc4] sm:$0xf] }
  0x74   : > { %3860 = vmatmul.mubr.msk.bf16.vlgmr.msra.gmra.mrb[0].mxu1 %vm709_vm3, %v4553_v38  ;;  %4012 = vmatmul.mubr.msk.bf16.gmra.mrb[16].mxu0 %vm709_vm3, %v5036_v20  ;;  %v5109_v45 = vcombine.low %v4909_v25, %v4918_v32  ;;  %v5113_v56 = vcombine.low %v4589_v14, %v4601_v28  ;;  %v5115_v31 = vcombine.low %v1328_v58, %v1331_v42  ;;  %v3460_v16 = vrot.slane %v4944_v17, 9  ;;  %v5658_v42 = vld [vmem:[#allocation5_spill] sm:$0xff] }
  0x75   : > { %3892 = vmatpush3.bf16.msra.mxu1 %v1445_v21  ;;  %3863 = vmatprep.mubr.msk.bf16.mxu1 %vm709_vm3, %v5042_v47  ;;  %v5119_v29 = vcombine.low %v4944_v17, %v4956_v53  ;;  %v1343_v7 = vrot.slane %v1341_v19, 4  ;;  %v1344_v60 = vrot.slane %v4962_v44, 5  ;;  %v1335_v14 = vsel %vm4728_vm7, %v3459_v40, %v1334_v51  ;;  %v5144_v17 = vld [vmem:[%s4500_s29 + $0xc0] sm:$0xf] }
  0x76   : > { %4015 = vmatprep.mubr.msk.bf16.mxu0 %vm709_vm3, %v5047_v0  ;;  %4390 = vmatprep.subr.msk.bf16.mxu1 %vm758_vm0, %v5054_v3  ;;  %v1338_v28 = vsel %vm4728_vm7, %v1336_v15, %v1337_v27  ;;  %v2077_v25 = vrot.slane %v5124_v61, 5  ;;  %v1342_v46 = vsel %vm4728_vm7, %v3460_v16, %v1341_v19  ;;  %v5149_v53 = vcombine.low %v4616_v48, %v4624_v52 }
  0x77   : > { %v1345_v32 = vsel %vm4728_vm7, %v1343_v7, %v1344_v60  ;;  %v5151_v44 = vcombine.low %v1335_v14, %v1338_v28  ;;  %v5155_v8 = vcombine.low %v4641_v13, %v4648_v24  ;;  %v1847_v43 = vshrl.u32 %v5144_v17, 16  ;;  %v3586_v60 = vld [vmem:[%s5598_s1 + $0x20] sm:$0xf]  ;;  %v4424_v14 = vld [vmem:[%s4500_s29 + $0x4] sm:$0xf] }
  0x78   : > { %v1850_v55 = vshll.u32 %v5144_v17, 16  ;;  %v1856_v12 = vshll.u32 %v5124_v61, 16  ;;  %v1860_v59 = vshrl.u32 %v5124_v61, 16  ;;  %v5161_v1 = vcombine.low %v1342_v46, %v1345_v32  ;;  %v4426_v32 = vld [vmem:[%s4500_s29] sm:$0xf] }
  0x79   : > { %v3530_v35 = vrot.slane %v5144_v17, 9  ;;  %v2079_v48 = vrot.slane %v2077_v25, 4  ;;  %v2080_v52 = vrot.slane %v267_v18, 5  ;;  %v1849_v2 = vrot.slane %v1847_v43, 4 }
  0x7a   : > { %v1852_v4 = vrot.slane %v1850_v55, 5  ;;  %v1858_v11 = vrot.slane %v1856_v12, 5  ;;  %v1862_v21 = vrot.slane %v1860_v59, 4  ;;  %v1866_v9 = vshll.u32 %v267_v18, 16 }
  0x7b   : > { %v2078_v10 = vsel %vm4728_vm7, %v3530_v35, %v2077_v25  ;;  %v2081_v51 = vsel %vm4728_vm7, %v2079_v48, %v2080_v52  ;;  %v5178_v40 = vcombine.low %v5658_v42, %v4675_v6  ;;  %v5659_v6 = vld [vmem:[#allocation15_spill] sm:$0xff]  ;;  %v1236_v28 = vrot.slane %v4424_v14, 5  ;;  %v5660_v48 = vld [vmem:[#allocation10_spill] sm:$0xff]  ;;  %v5661_v52 = vld [vmem:[#allocation12_spill] sm:$0xff] }
  0x7c   : > { %3864 = vmatmul.mubr.msk.bf16.gmra.mrb[4].mxu1 %vm709_vm3, %v5068_v23  ;;  %4016 = vmatmul.mubr.msk.bf16.gmra.mrb[20].mxu0 %vm709_vm3, %v5088_v62  ;;  %v1853_v13 = vor.u32 %v1852_v4, %v1849_v2  ;;  %v1863_v24 = vor.u32 %v1862_v21, %v1858_v11  ;;  %v1868_v58 = vrot.slane %v1866_v9, 5  ;;  %v5180_v19 = vcombine.low %v2078_v10, %v2081_v51  ;;  %v4425_v25 = vld [vmem:[%s4500_s29 + $0x8] sm:$0x1]  ;;  %v4427_v2 = vld [vmem:[%s5598_s1 + $0x10] sm:$0xf]  ;;  %v5663_v4 = vld [vmem:[#allocation17_spill] sm:$0xff] }
  0x7d   : > { %3867 = vmatprep.mubr.msk.bf16.mxu1 %vm709_vm3, %v5113_v56  ;;  %4019 = vmatprep.mubr.msk.bf16.mxu0 %vm709_vm3, %v5115_v31  ;;  %v2525_v7 = vsel %vm758_vm0, %v5659_v6, 0  ;;  %v1239_v46 = vrot.slane %v4425_v25, 5  ;;  %v3445_v18 = vrot.slane %v4426_v32, 9  ;;  %v1238_v43 = vrot.slane %v1236_v28, 4  ;;  %v5664_v21 = vld [vmem:[#allocation20_spill] sm:$0xff]  ;;  %v5671_v42 = vld [vmem:[#allocation9_spill] sm:$0xff] }
  0x7e   : > { %v1854_v33 = vrot.slane %v1853_v13, 4  ;;  %v1864_v39 = vrot.slane %v1863_v24, 4  ;;  %v1651_v35 = vsel %vm758_vm0, %v5054_v3, 0  ;;  %v5662_v3 = vld [vmem:[#allocation14_spill] sm:$0xff]  ;;  %v5275_v24 = vld [vmem:[%s4500_s29 + $0xcc] sm:$0xf] }
  0x7f   : > { %v1237_v55 = vsel %vm4728_vm7, %v3445_v18, %v1236_v28  ;;  %v1240_v12 = vsel %vm4728_vm7, %v1238_v43, %v1239_v46  ;;  %v5665_v13 = vld [vmem:[#allocation22_spill] sm:$0xff]  ;;  %v5278_v9 = vld [vmem:[%s4500_s29 + $0xd0] sm:$0xf]  ;;  %v2737_v10 = vsel %vm758_vm0, %v3586_v60, 0  ;;  %v2496_v14 = vshll.u32 %v5275_v24, 16  ;;  %v5677_v46 = vld [vmem:[#allocation19_spill] sm:$0xff] }
  0x80   : > { %v1859_v15 = vsel %vm4547_vm4, %v1854_v33, %v1858_v11  ;;  %v1869_v27 = vsel %vm4547_vm4, %v1864_v39, %v1868_v58  ;;  %v3462_v59 = vcombine.low %v1237_v55, %v1240_v12  ;;  %v5264_v11 = vcombine.low %v5144_v17, %v5124_v61  ;;  %v5666_v17 = vld [vmem:[#allocation3_spill] sm:$0xff]  ;;  %v5667_v51 = vld [vmem:[#allocation4_spill] sm:$0xff]  ;;  %v5668_v33 = vld [vmem:[#allocation6_spill] sm:$0xff] }
  0x81   : > { %v5186_v16 = vcombine.low %v1859_v15, %v1869_v27  ;;  %v3550_v61 = vcombine.low %v5275_v24, %v5278_v9  ;;  %v5669_v39 = vld [vmem:[#allocation7_spill] sm:$0xff]  ;;  %v5670_v58 = vld [vmem:[#allocation8_spill] sm:$0xff]  ;;  %v5673_v27 = vld [vmem:[#allocation13_spill] sm:$0xff]  ;;  %v2506_v28 = vshrl.u32 %v5278_v9, 16  ;;  %v2498_v32 = vrot.slane %v2496_v14, 5 }
  0x82   : > { %v5672_v15 = vld [vmem:[#allocation11_spill] sm:$0xff]  ;;  %v5674_v6 = vld [vmem:[#allocation16_spill] sm:$0xff]  ;;  %v5676_v25 = vld [vmem:[#allocation2_spill] sm:$0xff]  ;;  %v2723_v34 = vrot.slane %v5278_v9, 5 }
  0x83   : > { %v2508_v43 = vrot.slane %v2506_v28, 4  ;;  %v270_v55 = vld [vmem:[%s4500_s29 + $0xd4] sm:$0x1]  ;;  %v5678_v12 = vld [vmem:[#allocation21_spill] sm:$0xff] }
  0x84   : > { %3868 = vmatmul.mubr.msk.bf16.gmra.mrb[8].mxu1 %vm709_vm3, %v5149_v53  ;;  %4020 = vmatmul.mubr.msk.bf16.gmra.mrb[24].mxu0 %vm709_vm3, %v5151_v44 }
  0x85   : > { %3871 = vmatprep.mubr.msk.bf16.mxu1 %vm709_vm3, %v5155_v8  ;;  %4023 = vmatprep.mubr.msk.bf16.mxu0 %vm709_vm3, %v5161_v1 }
  0x8c   : > { %3872 = vmatmul.mubr.msk.bf16.gmra.mrb[12].mxu1 %vm709_vm3, %v5178_v40  ;;  %4024 = vmatmul.mubr.msk.bf16.gmra.mrb[28].mxu0 %vm709_vm3, %v5180_v19 }
  0x8d   : > { %3875 = vmatprep.mubr.msk.bf16.mxu1 %vm709_vm3, %v5074_v22  ;;  %4029 = vmatprep.mubr.msk.bf16.mxu0 %vm709_vm3, %v5042_v47 }
  0x94   : > { %3876 = vmatmul.mubr.msk.bf16.gmra.mrb[16].mxu1 %vm709_vm3, %v5084_v57  ;;  %4030 = vmatmul.mubr.msk.bf16.vlgmr.msra.gmra.mrb[0].mxu0 %vm709_vm3, %v5068_v23 }
  0x95   : > { %4062 = vmatpush3.bf16.msra.mxu0 %v2525_v7  ;;  %3879 = vmatprep.mubr.msk.bf16.mxu1 %vm709_vm3, %v5093_v5  ;;  %v5675_v7 = vld [vmem:[#allocation18_spill] sm:$0xff] }
  0x96   : > { %4033 = vmatprep.mubr.msk.bf16.mxu0 %vm709_vm3, %v5113_v56  ;;  %4396 = vmatprep.subr.msk.bf16.mxu0 %vm758_vm0, %v3586_v60  ;;  %v2493_v60 = vshrl.u32 %v5275_v24, 16 }
  0x9c   : > { %3880 = vmatmul.mubr.msk.bf16.gmra.mrb[20].mxu1 %vm709_vm3, %v5097_v49  ;;  %4034 = vmatmul.mubr.msk.bf16.gmra.mrb[4].mxu0 %vm709_vm3, %v5149_v53 }
  0x9d   : > { %3883 = vmatprep.mubr.msk.bf16.mxu1 %vm709_vm3, %v5101_v54  ;;  %4037 = vmatprep.mubr.msk.bf16.mxu0 %vm709_vm3, %v5155_v8 }
  0xa4   : > { %3884 = vmatmul.mubr.msk.bf16.gmra.mrb[24].mxu1 %vm709_vm3, %v5105_v36  ;;  %4038 = vmatmul.mubr.msk.bf16.gmra.mrb[8].mxu0 %vm709_vm3, %v5178_v40 }
  0xa5   : > { %3887 = vmatprep.mubr.msk.bf16.mxu1 %vm709_vm3, %v5109_v45  ;;  %4041 = vmatprep.mubr.msk.bf16.mxu0 %vm709_vm3, %v5074_v22 }
  0xac   : > { %3888 = vmatmul.mubr.msk.bf16.gmra.mrb[28].mxu1 %vm709_vm3, %v5119_v29  ;;  %4042 = vmatmul.mubr.msk.bf16.gmra.mrb[12].mxu0 %vm709_vm3, %v5084_v57 }
  0xad   : > { %3893 = vmatprep.mubr.msk.bf16.mxu1 %vm709_vm3, %v3462_v59  ;;  %4045 = vmatprep.mubr.msk.bf16.mxu0 %vm709_vm3, %v5093_v5 }
  0xb4   : > { %3894 = vmatmul.mubr.msk.bf16.vlgmr.msra.gmra.mrb[0].mxu1 %vm709_vm3, %v5660_v48  ;;  %4046 = vmatmul.mubr.msk.bf16.gmra.mrb[16].mxu0 %vm709_vm3, %v5097_v49 }
  0xb5   : > { %3926 = vmatpush3.bf16.msra.mxu1 %v1651_v35  ;;  %3897 = vmatprep.mubr.msk.bf16.mxu1 %vm709_vm3, %v5661_v52  ;;  %v2512_v35 = vshll.u32 %v270_v55, 16 }
  0xb6   : > { %4049 = vmatprep.mubr.msk.bf16.mxu0 %vm709_vm3, %v5101_v54  ;;  %4392 = vmatprep.subr.msk.bf16.mxu1 %vm758_vm0, %v4427_v2 }
  0xbc   : > { %3898 = vmatmul.mubr.msk.bf16.gmra.mrb[4].mxu1 %vm709_vm3, %v5662_v3  ;;  %4050 = vmatmul.mubr.msk.bf16.gmra.mrb[20].mxu0 %vm709_vm3, %v5105_v36 }
  0xbd   : > { %3901 = vmatprep.mubr.msk.bf16.mxu1 %vm709_vm3, %v5663_v4  ;;  %4053 = vmatprep.mubr.msk.bf16.mxu0 %vm709_vm3, %v5109_v45 }
  0xc4   : > { %3902 = vmatmul.mubr.msk.bf16.gmra.mrb[8].mxu1 %vm709_vm3, %v5664_v21  ;;  %4054 = vmatmul.mubr.msk.bf16.gmra.mrb[24].mxu0 %vm709_vm3, %v5119_v29 }
  0xc5   : > { %3905 = vmatprep.mubr.msk.bf16.mxu1 %vm709_vm3, %v5665_v13  ;;  %4057 = vmatprep.mubr.msk.bf16.mxu0 %vm709_vm3, %v5264_v11 }
  0xcc   : > { %3906 = vmatmul.mubr.msk.bf16.gmra.mrb[12].mxu1 %vm709_vm3, %v4979_v37  ;;  %4058 = vmatmul.mubr.msk.bf16.gmra.mrb[28].mxu0 %vm709_vm3, %v3550_v61  ;;  %v2514_v61 = vrot.slane %v2512_v35, 5 }
  0xcd   : > { %3909 = vmatprep.mubr.msk.bf16.mxu1 %vm709_vm3, %v5010_v41  ;;  %4063 = vmatprep.mubr.msk.bf16.mxu0 %vm709_vm3, %v5666_v17 }
  0xd4   : > { %3910 = vmatmul.mubr.msk.bf16.gmra.mrb[16].mxu1 %vm709_vm3, %v5014_v50  ;;  %4064 = vmatmul.mubr.msk.bf16.vlgmr.msra.gmra.mrb[0].mxu0 %vm709_vm3, %v5667_v51 }
  0xd5   : > { %4096 = vmatpush3.bf16.msra.mxu0 %v2737_v10  ;;  %3913 = vmatprep.mubr.msk.bf16.mxu1 %vm709_vm3, %v5036_v20 }
  0xd6   : > { %4067 = vmatprep.mubr.msk.bf16.mxu0 %vm709_vm3, %v5668_v33 }
  0xdc   : > { %3914 = vmatmul.mubr.msk.bf16.gmra.mrb[20].mxu1 %vm709_vm3, %v5047_v0  ;;  %4068 = vmatmul.mubr.msk.bf16.gmra.mrb[4].mxu0 %vm709_vm3, %v5669_v39 }
  0xdd   : > { %3917 = vmatprep.mubr.msk.bf16.mxu1 %vm709_vm3, %v5088_v62  ;;  %4071 = vmatprep.mubr.msk.bf16.mxu0 %vm709_vm3, %v5670_v58 }
  0xe4   : > { %3918 = vmatmul.mubr.msk.bf16.gmra.mrb[24].mxu1 %vm709_vm3, %v5115_v31  ;;  %4072 = vmatmul.mubr.msk.bf16.gmra.mrb[8].mxu0 %vm709_vm3, %v5671_v42 }
  0xe5   : > { %3921 = vmatprep.mubr.msk.bf16.mxu1 %vm709_vm3, %v5151_v44  ;;  %4075 = vmatprep.mubr.msk.bf16.mxu0 %vm709_vm3, %v5672_v15 }
  0xec   : > { %3922 = vmatmul.mubr.msk.bf16.gmra.mrb[28].mxu1 %vm709_vm3, %v5161_v1  ;;  %4076 = vmatmul.mubr.msk.bf16.gmra.mrb[12].mxu0 %vm709_vm3, %v5673_v27 }
  0xed   : > { %3927 = vmatprep.mubr.msk.bf16.mxu1 %vm709_vm3, %v4553_v38  ;;  %4079 = vmatprep.mubr.msk.bf16.mxu0 %vm709_vm3, %v5674_v6  ;;  %v2502_v38 = vshll.u32 %v5278_v9, 16 }
  0xef   : > { %v2504_v18 = vrot.slane %v2502_v38, 5 }
  0xf1   : > { %v2509_v59 = vor.u32 %v2508_v43, %v2504_v18 }
  0xf3   : > { %v2510_v2 = vrot.slane %v2509_v59, 4 }
  0xf4   : > { %3928 = vmatmul.mubr.msk.bf16.vlgmr.msra.gmra.mrb[0].mxu1 %vm709_vm3, %v5042_v47  ;;  %4080 = vmatmul.mubr.msk.bf16.gmra.mrb[16].mxu0 %vm709_vm3, %v5675_v7  ;;  %v2495_v47 = vrot.slane %v2493_v60, 4 }
  0xf5   : > { %4130 = vmatpush3.bf16.msra.mxu1 %v5676_v25  ;;  %3931 = vmatprep.mubr.msk.bf16.mxu1 %vm709_vm3, %v5068_v23 }
  0xf6   : > { %4083 = vmatprep.mubr.msk.bf16.mxu0 %vm709_vm3, %v5677_v46  ;;  %v2499_v23 = vor.u32 %v2498_v32, %v2495_v47 }
  0xf8   : > { %v2500_v48 = vrot.slane %v2499_v23, 4 }
  0xfc   : > { %3932 = vmatmul.mubr.msk.bf16.gmra.mrb[4].mxu1 %vm709_vm3, %v5113_v56  ;;  %4084 = vmatmul.mubr.msk.bf16.gmra.mrb[20].mxu0 %vm709_vm3, %v5678_v12  ;;  %v2505_v56 = vsel %vm4547_vm4, %v2500_v48, %v2504_v18 }
  0xfd   : > { %3935 = vmatprep.mubr.msk.bf16.mxu1 %vm709_vm3, %v5149_v53  ;;  %4087 = vmatprep.mubr.msk.bf16.mxu0 %vm709_vm3, %v4981_v30  ;;  %v2515_v53 = vsel %vm4547_vm4, %v2510_v2, %v2514_v61 }
  0xfe   : > { %v3568_v17 = vcombine.low %v2505_v56, %v2515_v53 }
 0x104   : > { %3936 = vmatmul.mubr.msk.bf16.gmra.mrb[8].mxu1 %vm709_vm3, %v5155_v8  ;;  %4088 = vmatmul.mubr.msk.bf16.gmra.mrb[24].mxu0 %vm709_vm3, %v5008_v63 }
 0x105   : > { %3939 = vmatprep.mubr.msk.bf16.mxu1 %vm709_vm3, %v5178_v40  ;;  %4091 = vmatprep.mubr.msk.bf16.mxu0 %vm709_vm3, %v5186_v16 }
 0x10c   : > { %3940 = vmatmul.mubr.msk.bf16.gmra.mrb[12].mxu1 %vm709_vm3, %v5074_v22  ;;  %4092 = vmatmul.mubr.msk.bf16.gmra.mrb[28].mxu0 %vm709_vm3, %v3568_v17 }
 0x10d   : > { %3943 = vmatprep.mubr.msk.bf16.mxu1 %vm709_vm3, %v5084_v57  ;;  %4097 = vmatprep.mubr.msk.bf16.mxu0 %vm709_vm3, %v5661_v52 }
 0x114   : > { %3944 = vmatmul.mubr.msk.bf16.gmra.mrb[16].mxu1 %vm709_vm3, %v5093_v5  ;;  %4098 = vmatmul.mubr.msk.bf16.vlgmr.msra.gmra.mrb[0].mxu0 %vm709_vm3, %v5662_v3 }
 0x115   : > { %3947 = vmatprep.mubr.msk.bf16.mxu1 %vm709_vm3, %v5097_v49  ;;  %4101 = vmatprep.mubr.msk.bf16.mxu0 %vm709_vm3, %v5663_v4 }
 0x11c   : > { %3948 = vmatmul.mubr.msk.bf16.gmra.mrb[20].mxu1 %vm709_vm3, %v5101_v54  ;;  %4102 = vmatmul.mubr.msk.bf16.gmra.mrb[4].mxu0 %vm709_vm3, %v5664_v21 }
 0x11d   : > { %3951 = vmatprep.mubr.msk.bf16.mxu1 %vm709_vm3, %v5105_v36  ;;  %4105 = vmatprep.mubr.msk.bf16.mxu0 %vm709_vm3, %v5665_v13 }
 0x124   : > { %3952 = vmatmul.mubr.msk.bf16.gmra.mrb[24].mxu1 %vm709_vm3, %v5109_v45  ;;  %4106 = vmatmul.mubr.msk.bf16.gmra.mrb[8].mxu0 %vm709_vm3, %v4979_v37  ;;  %v3585_v37 = vrot.slane %v5275_v24, 9 }
 0x125   : > { %3955 = vmatprep.mubr.msk.bf16.mxu1 %vm709_vm3, %v5119_v29  ;;  %4109 = vmatprep.mubr.msk.bf16.mxu0 %vm709_vm3, %v5010_v41  ;;  %v2725_v41 = vrot.slane %v2723_v34, 4 }
 0x12c   : > { %3956 = vmatmul.mubr.msk.bf16.gmra.mrb[28].mxu1 %vm709_vm3, %v5264_v11  ;;  %4110 = vmatmul.mubr.msk.bf16.gmra.mrb[12].mxu0 %vm709_vm3, %v5014_v50  ;;  %v2726_v50 = vrot.slane %v270_v55, 5 }
 0x12d   : > { %3977 = vmatprep.mubr.msk.bf16.mxu1 %vm709_vm3, %v5673_v27  ;;  %4113 = vmatprep.mubr.msk.bf16.mxu0 %vm709_vm3, %v5036_v20  ;;  %v2724_v20 = vsel %vm4728_vm7, %v3585_v37, %v2723_v34 }
 0x134   : > { %3978 = vmatmul.mubr.msk.bf16.vlgmr.msra.gmra.mrb[16].mxu1 %vm709_vm3, %v5674_v6  ;;  %4114 = vmatmul.mubr.msk.bf16.gmra.mrb[16].mxu0 %vm709_vm3, %v5047_v0  ;;  %v2727_v0 = vsel %vm4728_vm7, %v2725_v41, %v2726_v50 }
 0x135   : > { %3981 = vmatprep.mubr.msk.bf16.mxu1 %vm709_vm3, %v5675_v7  ;;  %4117 = vmatprep.mubr.msk.bf16.mxu0 %vm709_vm3, %v5088_v62  ;;  %v3587_v22 = vcombine.low %v2724_v20, %v2727_v0 }
 0x13c   : > { %3982 = vmatmul.mubr.msk.bf16.gmra.mrb[20].mxu1 %vm709_vm3, %v5677_v46  ;;  %4118 = vmatmul.mubr.msk.bf16.gmra.mrb[20].mxu0 %vm709_vm3, %v5115_v31 }
 0x13d   : > { %3985 = vmatprep.mubr.msk.bf16.mxu1 %vm709_vm3, %v5678_v12  ;;  %4121 = vmatprep.mubr.msk.bf16.mxu0 %vm709_vm3, %v5151_v44 }
 0x144   : > { %3986 = vmatmul.mubr.msk.bf16.gmra.mrb[24].mxu1 %vm709_vm3, %v4981_v30  ;;  %4122 = vmatmul.mubr.msk.bf16.gmra.mrb[24].mxu0 %vm709_vm3, %v5161_v1 }
 0x145   : > { %3989 = vmatprep.mubr.msk.bf16.mxu1 %vm709_vm3, %v5008_v63  ;;  %4125 = vmatprep.mubr.msk.bf16.mxu0 %vm709_vm3, %v5180_v19 }
 0x14c   : > { %3990 = vmatmul.mubr.msk.bf16.gmra.mrb[28].mxu1 %vm709_vm3, %v5186_v16  ;;  %4126 = vmatmul.mubr.msk.bf16.gmra.mrb[28].mxu0 %vm709_vm3, %v3587_v22 }
 0x1c7   : > { %v3929_v30 = vpop.f32.mrb[0].mxu1 }
 0x1c8   : > { %v1687_v57 = vpop.f32.mrb[1].mxu1 }
 0x1c9   : > { %v3930_v62 = vpop.f32.mrb[2].mxu1 }
 0x1ca   : > { %v1690_v63 = vpop.f32.mrb[3].mxu1 }
 0x1cf   : > { %v3933_v5 = vpop.f32.mrb[4].mxu1 }
 0x1d0   : > { %v1703_v49 = vpop.f32.mrb[5].mxu1 }
 0x1d1   : > { %v3934_v54 = vpop.f32.mrb[6].mxu1 }
 0x1d2   : > { %v1706_v36 = vpop.f32.mrb[7].mxu1 }
 0x1d7   : > { %v5428_v45 = vpop.f32.mrb[8].mxu1 }
 0x1d8   : > { %v5430_v31 = vpop.f32.mrb[9].mxu1 }
 0x1d9   : > { %v5432_v26 = vpop.f32.mrb[10].mxu1 }
 0x1da   : > { %v5434_v29 = vpop.f32.mrb[11].mxu1 }
 0x1df   : > { %v5437_v44 = vpop.f32.mrb[12].mxu1 }
 0x1e0   : > { %v5439_v8 = vpop.f32.mrb[13].mxu1 }
 0x1e1   : > { %v5441_v1 = vpop.f32.mrb[14].mxu1 }
 0x1e2   : > { %v5443_v40 = vpop.f32.mrb[15].mxu1 }
 0x1e7   : > { %v4099_v19 = vpop.f32.mrb[0].mxu0 }
 0x1e8   : > { %v4131_v16 = vadd.f32 %v4099_v19, %v3929_v30  ;;  %v2773_v52 = vpop.f32.mrb[1].mxu0 }
 0x1e9   : > { %v4132_v3 = vadd.f32 %v2773_v52, %v1687_v57  ;;  %v4100_v4 = vpop.f32.mrb[2].mxu0 }
 0x1ea   : > { %v3640_v11 = vpack.c.bf16 %v4131_v16, %v4131_v16  ;;  %v4133_v21 = vadd.f32 %v4100_v4, %v3930_v62  ;;  %v2776_v13 = vpop.f32.mrb[3].mxu0  ;;  %v3166_v51 = vmul.f32 %v4131_v16, %v4131_v16  ;;  %v3096_v7 = vsel %vm709_vm3, %v4131_v16, 0.0 }
 0x1eb   : > { %v3638_v24 = vpack.c.bf16 %v4132_v3, %v4132_v3  ;;  %v3164_v9 = vmul.f32 %v4132_v3, %v4132_v3  ;;  %v4134_v10 = vadd.f32 %v2776_v13, %v1690_v63  ;;  %v3093_v39 = vsel %vm709_vm3, %v4132_v3, 0.0 }
 0x1ec   : > { %3063 = vst.msk [vmem:[%s5448_s23 + $0x8] sm:$0xf] %vm3060_vm8, %v3640_v11  ;;  %v3641_v33 = vpack.c.bf16 %v4133_v21, %v4133_v21  ;;  %v3167_v27 = vmul.f32 %v4133_v21, %v4133_v21  ;;  %v3199_v32 = vsel %vm709_vm3, %v3166_v51, 0.0  ;;  %v3098_v55 = vsel %vm709_vm3, %v4133_v21, 0.0 }
 0x1ed   : > { %3061 = vst.msk [vmem:[%s5448_s23] sm:$0xf] %vm3060_vm8, %v3638_v24  ;;  %v3639_v58 = vpack.c.bf16 %v4134_v10, %v4134_v10  ;;  %v3094_v42 = vsel %vm709_vm3, %v4134_v10, 0.0  ;;  %v3165_v15 = vmul.f32 %v4134_v10, %v4134_v10  ;;  %v3196_v60 = vsel %vm709_vm3, %v3164_v9, 0.0 }
 0x1ee   : > { %3064 = vst.msk [vmem:[%s5448_s23 + $0xc] sm:$0xf] %vm3060_vm8, %v3641_v33  ;;  %v3095_v6 = vadd.f32 %v3094_v42, %v3093_v39  ;;  %v3201_v12 = vsel %vm709_vm3, %v3167_v27, 0.0 }
 0x1ef   : > { %3062 = vst.msk [vmem:[%s5448_s23 + $0x4] sm:$0xf] %vm3060_vm8, %v3639_v58  ;;  %v3197_v14 = vsel %vm709_vm3, %v3165_v15, 0.0  ;;  %v4103_v28 = vpop.f32.mrb[4].mxu0 }
 0x1f0   : > { %v3097_v25 = vadd.f32 %v3096_v7, %v3095_v6  ;;  %v3198_v38 = vadd.f32 %v3197_v14, %v3196_v60  ;;  %v4135_v46 = vadd.f32 %v4103_v28, %v3933_v5  ;;  %v2789_v47 = vpop.f32.mrb[5].mxu0 }
 0x1f1   : > { %v4136_v18 = vadd.f32 %v2789_v47, %v1703_v49  ;;  %v4104_v43 = vpop.f32.mrb[6].mxu0 }
 0x1f2   : > { %v3200_v23 = vadd.f32 %v3199_v32, %v3198_v38  ;;  %v3644_v59 = vpack.c.bf16 %v4135_v46, %v4135_v46  ;;  %v2792_v35 = vpop.f32.mrb[7].mxu0  ;;  %v3099_v2 = vadd.f32 %v3098_v55, %v3097_v25  ;;  %v4137_v17 = vadd.f32 %v4104_v43, %v3934_v54 }
 0x1f3   : > { %v3642_v48 = vpack.c.bf16 %v4136_v18, %v4136_v18  ;;  %v3100_v61 = vsel %vm709_vm3, %v4136_v18, 0.0  ;;  %v3168_v56 = vmul.f32 %v4136_v18, %v4136_v18  ;;  %v4138_v34 = vadd.f32 %v2792_v35, %v1706_v36 }
 0x1f4   : > { %3067 = vst.msk [vmem:[%s5448_s23 + $0x18] sm:$0xf] %vm3060_vm8, %v3644_v59  ;;  %v3202_v53 = vadd.f32 %v3201_v12, %v3200_v23  ;;  %v3101_v37 = vadd.f32 %v3100_v61, %v3099_v2  ;;  %v3170_v50 = vmul.f32 %v4135_v46, %v4135_v46  ;;  %v3645_v0 = vpack.c.bf16 %v4137_v17, %v4137_v17 }
 0x1f5   : > { %3065 = vst.msk [vmem:[%s5448_s23 + $0x10] sm:$0xf] %vm3060_vm8, %v3642_v48  ;;  %v3203_v41 = vsel %vm709_vm3, %v3168_v56, 0.0  ;;  %v3643_v22 = vpack.c.bf16 %v4138_v34, %v4138_v34  ;;  %v3102_v30 = vsel %vm709_vm3, %v4138_v34, 0.0  ;;  %v3169_v57 = vmul.f32 %v4138_v34, %v4138_v34 }
 0x1f6   : > { %v3204_v20 = vadd.f32 %v3203_v41, %v3202_v53  ;;  %3068 = vst.msk [vmem:[%s5448_s23 + $0x1c] sm:$0xf] %vm3060_vm8, %v3645_v0  ;;  %v3103_v63 = vadd.f32 %v3102_v30, %v3101_v37  ;;  %v3104_v54 = vsel %vm709_vm3, %v4135_v46, 0.0  ;;  %v3171_v36 = vmul.f32 %v4137_v17, %v4137_v17 }
 0x1f7   : > { %v4107_v62 = vpop.f32.mrb[8].mxu0  ;;  %3066 = vst.msk [vmem:[%s5448_s23 + $0x14] sm:$0xf] %vm3060_vm8, %v3643_v22  ;;  %v3205_v19 = vsel %vm709_vm3, %v3169_v57, 0.0  ;;  %v3207_v3 = vsel %vm709_vm3, %v3170_v50, 0.0 }
 0x1f8   : > { %v4139_v5 = vadd.f32 %v4107_v62, %v5428_v45  ;;  %v2805_v49 = vpop.f32.mrb[9].mxu0  ;;  %v3105_v4 = vadd.f32 %v3104_v54, %v3103_v63  ;;  %v3206_v11 = vadd.f32 %v3205_v19, %v3204_v20  ;;  %v3106_v45 = vsel %vm709_vm3, %v4137_v17, 0.0 }
 0x1f9   : > { %v4140_v16 = vadd.f32 %v2805_v49, %v5430_v31  ;;  %v4108_v52 = vpop.f32.mrb[10].mxu0  ;;  %v3209_v58 = vsel %vm709_vm3, %v3171_v36, 0.0 }
 0x1fa   : > { %v3648_v21 = vpack.c.bf16 %v4139_v5, %v4139_v5  ;;  %v2808_v13 = vpop.f32.mrb[11].mxu0  ;;  %v3208_v51 = vadd.f32 %v3207_v3, %v3206_v11  ;;  %v3107_v33 = vadd.f32 %v3106_v45, %v3105_v4  ;;  %v4141_v31 = vadd.f32 %v4108_v52, %v5432_v26 }
 0x1fb   : > { %v3646_v24 = vpack.c.bf16 %v4140_v16, %v4140_v16  ;;  %v3108_v9 = vsel %vm709_vm3, %v4140_v16, 0.0  ;;  %v3172_v10 = vmul.f32 %v4140_v16, %v4140_v16  ;;  %v4142_v39 = vadd.f32 %v2808_v13, %v5434_v29 }
 0x1fc   : > { %3071 = vst.msk [vmem:[%s5448_s23 + $0x28] sm:$0xf] %vm3060_vm8, %v3648_v21  ;;  %v3174_v15 = vmul.f32 %v4139_v5, %v4139_v5  ;;  %v3109_v27 = vadd.f32 %v3108_v9, %v3107_v33  ;;  %v3210_v6 = vadd.f32 %v3209_v58, %v3208_v51  ;;  %v3649_v7 = vpack.c.bf16 %v4141_v31, %v4141_v31 }
 0x1fd   : > { %3069 = vst.msk [vmem:[%s5448_s23 + $0x20] sm:$0xf] %vm3060_vm8, %v3646_v24  ;;  %v3211_v42 = vsel %vm709_vm3, %v3172_v10, 0.0  ;;  %v3647_v60 = vpack.c.bf16 %v4142_v39, %v4142_v39  ;;  %v3110_v14 = vsel %vm709_vm3, %v4142_v39, 0.0  ;;  %v3173_v28 = vmul.f32 %v4142_v39, %v4142_v39 }
 0x1fe   : > { %v3212_v38 = vadd.f32 %v3211_v42, %v3210_v6  ;;  %3072 = vst.msk [vmem:[%s5448_s23 + $0x2c] sm:$0xf] %vm3060_vm8, %v3649_v7  ;;  %v3111_v26 = vadd.f32 %v3110_v14, %v3109_v27  ;;  %v3112_v47 = vsel %vm709_vm3, %v4139_v5, 0.0  ;;  %v3175_v32 = vmul.f32 %v4141_v31, %v4141_v31 }
 0x1ff   : > { %v4111_v25 = vpop.f32.mrb[12].mxu0  ;;  %3070 = vst.msk [vmem:[%s5448_s23 + $0x24] sm:$0xf] %vm3060_vm8, %v3647_v60  ;;  %v3213_v18 = vsel %vm709_vm3, %v3173_v28, 0.0  ;;  %v3215_v12 = vsel %vm709_vm3, %v3174_v15, 0.0 }
 0x200   : > { %v4143_v29 = vadd.f32 %v4111_v25, %v5437_v44  ;;  %v2821_v46 = vpop.f32.mrb[13].mxu0  ;;  %v3113_v23 = vadd.f32 %v3112_v47, %v3111_v26  ;;  %v3214_v59 = vadd.f32 %v3213_v18, %v3212_v38  ;;  %v3114_v44 = vsel %vm709_vm3, %v4141_v31, 0.0 }
 0x201   : > { %v4144_v43 = vadd.f32 %v2821_v46, %v5439_v8  ;;  %v4112_v55 = vpop.f32.mrb[14].mxu0  ;;  %v3217_v37 = vsel %vm709_vm3, %v3175_v32, 0.0 }
 0x202   : > { %v3652_v35 = vpack.c.bf16 %v4143_v29, %v4143_v29  ;;  %v2824_v48 = vpop.f32.mrb[15].mxu0  ;;  %v3216_v53 = vadd.f32 %v3215_v12, %v3214_v59  ;;  %v3115_v17 = vadd.f32 %v3114_v44, %v3113_v23  ;;  %v4145_v8 = vadd.f32 %v4112_v55, %v5441_v1 }
 0x203   : > { %v3650_v2 = vpack.c.bf16 %v4144_v43, %v4144_v43  ;;  %v3116_v61 = vsel %vm709_vm3, %v4144_v43, 0.0  ;;  %v3176_v56 = vmul.f32 %v4144_v43, %v4144_v43  ;;  %v4146_v34 = vadd.f32 %v2824_v48, %v5443_v40 }
 0x204   : > { %3075 = vst.msk [vmem:[%s5448_s23 + $0x38] sm:$0xf] %vm3060_vm8, %v3652_v35  ;;  %v3178_v50 = vmul.f32 %v4143_v29, %v4143_v29  ;;  %v3117_v20 = vadd.f32 %v3116_v61, %v3115_v17  ;;  %v3218_v0 = vadd.f32 %v3217_v37, %v3216_v53  ;;  %v3653_v22 = vpack.c.bf16 %v4145_v8, %v4145_v8 }
 0x205   : > { %3073 = vst.msk [vmem:[%s5448_s23 + $0x30] sm:$0xf] %vm3060_vm8, %v3650_v2  ;;  %v3219_v41 = vsel %vm709_vm3, %v3176_v56, 0.0  ;;  %v3651_v30 = vpack.c.bf16 %v4146_v34, %v4146_v34  ;;  %v3118_v57 = vsel %vm709_vm3, %v4146_v34, 0.0  ;;  %v3177_v62 = vmul.f32 %v4146_v34, %v4146_v34 }
 0x206   : > { %v3220_v1 = vadd.f32 %v3219_v41, %v3218_v0  ;;  %3076 = vst.msk [vmem:[%s5448_s23 + $0x3c] sm:$0xf] %vm3060_vm8, %v3653_v22  ;;  %v3119_v40 = vadd.f32 %v3118_v57, %v3117_v20  ;;  %v3120_v19 = vsel %vm709_vm3, %v4143_v29, 0.0  ;;  %v3179_v16 = vmul.f32 %v4145_v8, %v4145_v8 }
 0x207   : > { %v3979_v63 = vpop.f32.mrb[16].mxu1  ;;  %v4115_v5 = vpop.f32.mrb[16].mxu0  ;;  %3074 = vst.msk [vmem:[%s5448_s23 + $0x34] sm:$0xf] %vm3060_vm8, %v3651_v30  ;;  %v3221_v52 = vsel %vm709_vm3, %v3177_v62, 0.0  ;;  %v3223_v21 = vsel %vm709_vm3, %v3178_v50, 0.0 }
 0x208   : > { %v4147_v49 = vadd.f32 %v4115_v5, %v3979_v63  ;;  %v1979_v54 = vpop.f32.mrb[17].mxu1  ;;  %v2837_v36 = vpop.f32.mrb[17].mxu0  ;;  %v3121_v13 = vadd.f32 %v3120_v19, %v3119_v40  ;;  %v3222_v45 = vadd.f32 %v3221_v52, %v3220_v1  ;;  %v3122_v51 = vsel %vm709_vm3, %v4145_v8, 0.0 }
 0x209   : > { %v4148_v3 = vadd.f32 %v2837_v36, %v1979_v54  ;;  %v3980_v4 = vpop.f32.mrb[18].mxu1  ;;  %v4116_v11 = vpop.f32.mrb[18].mxu0  ;;  %v3225_v6 = vsel %vm709_vm3, %v3179_v16, 0.0 }
 0x20a   : > { %v3656_v24 = vpack.c.bf16 %v4147_v49, %v4147_v49  ;;  %v1982_v9 = vpop.f32.mrb[19].mxu1  ;;  %v2840_v10 = vpop.f32.mrb[19].mxu0  ;;  %v3224_v58 = vadd.f32 %v3223_v21, %v3222_v45  ;;  %v3123_v42 = vadd.f32 %v3122_v51, %v3121_v13  ;;  %v4149_v15 = vadd.f32 %v4116_v11, %v3980_v4 }
 0x20b   : > { %v3654_v33 = vpack.c.bf16 %v4148_v3, %v4148_v3  ;;  %v3124_v31 = vsel %vm709_vm3, %v4148_v3, 0.0  ;;  %v3180_v39 = vmul.f32 %v4148_v3, %v4148_v3  ;;  %v4150_v27 = vadd.f32 %v2840_v10, %v1982_v9 }
 0x20c   : > { %3079 = vst.msk [vmem:[%s5448_s23 + $0x48] sm:$0xf] %vm3060_vm8, %v3656_v24  ;;  %v3182_v60 = vmul.f32 %v4147_v49, %v4147_v49  ;;  %v3125_v14 = vadd.f32 %v3124_v31, %v3123_v42  ;;  %v3226_v28 = vadd.f32 %v3225_v6, %v3224_v58  ;;  %v3657_v25 = vpack.c.bf16 %v4149_v15, %v4149_v15 }
 0x20d   : > { %3077 = vst.msk [vmem:[%s5448_s23 + $0x40] sm:$0xf] %vm3060_vm8, %v3654_v33  ;;  %v3227_v7 = vsel %vm709_vm3, %v3180_v39, 0.0  ;;  %v3655_v38 = vpack.c.bf16 %v4150_v27, %v4150_v27  ;;  %v3126_v26 = vsel %vm709_vm3, %v4150_v27, 0.0  ;;  %v3181_v29 = vmul.f32 %v4150_v27, %v4150_v27 }
 0x20e   : > { %v3228_v32 = vadd.f32 %v3227_v7, %v3226_v28  ;;  %3080 = vst.msk [vmem:[%s5448_s23 + $0x4c] sm:$0xf] %vm3060_vm8, %v3657_v25  ;;  %v3127_v18 = vadd.f32 %v3126_v26, %v3125_v14  ;;  %v3128_v23 = vsel %vm709_vm3, %v4147_v49, 0.0  ;;  %v3183_v59 = vmul.f32 %v4149_v15, %v4149_v15 }
 0x20f   : > { %v3983_v46 = vpop.f32.mrb[20].mxu1  ;;  %v4119_v47 = vpop.f32.mrb[20].mxu0  ;;  %3078 = vst.msk [vmem:[%s5448_s23 + $0x44] sm:$0xf] %vm3060_vm8, %v3655_v38  ;;  %v3229_v35 = vsel %vm709_vm3, %v3181_v29, 0.0  ;;  %v3231_v61 = vsel %vm709_vm3, %v3182_v60, 0.0 }
 0x210   : > { %v4151_v43 = vadd.f32 %v4119_v47, %v3983_v46  ;;  %v1995_v55 = vpop.f32.mrb[21].mxu1  ;;  %v2853_v12 = vpop.f32.mrb[21].mxu0  ;;  %v3129_v56 = vadd.f32 %v3128_v23, %v3127_v18  ;;  %v3230_v53 = vadd.f32 %v3229_v35, %v3228_v32  ;;  %v3130_v37 = vsel %vm709_vm3, %v4149_v15, 0.0 }
 0x211   : > { %v4152_v48 = vadd.f32 %v2853_v12, %v1995_v55  ;;  %v3984_v44 = vpop.f32.mrb[22].mxu1  ;;  %v4120_v2 = vpop.f32.mrb[22].mxu0  ;;  %v3233_v62 = vsel %vm709_vm3, %v3183_v59, 0.0 }
 0x212   : > { %v3660_v17 = vpack.c.bf16 %v4151_v43, %v4151_v43  ;;  %v1998_v8 = vpop.f32.mrb[23].mxu1  ;;  %v2856_v34 = vpop.f32.mrb[23].mxu0  ;;  %v3232_v0 = vadd.f32 %v3231_v61, %v3230_v53  ;;  %v3131_v22 = vadd.f32 %v3130_v37, %v3129_v56  ;;  %v4153_v30 = vadd.f32 %v4120_v2, %v3984_v44 }
 0x213   : > { %v3658_v41 = vpack.c.bf16 %v4152_v48, %v4152_v48  ;;  %v3132_v50 = vsel %vm709_vm3, %v4152_v48, 0.0  ;;  %v3184_v20 = vmul.f32 %v4152_v48, %v4152_v48  ;;  %v4154_v57 = vadd.f32 %v2856_v34, %v1998_v8 }
 0x214   : > { %3083 = vst.msk [vmem:[%s5448_s23 + $0x58] sm:$0xf] %vm3060_vm8, %v3660_v17  ;;  %v3186_v5 = vmul.f32 %v4151_v43, %v4151_v43  ;;  %v3133_v1 = vadd.f32 %v3132_v50, %v3131_v22  ;;  %v3234_v40 = vadd.f32 %v3233_v62, %v3232_v0  ;;  %v3661_v49 = vpack.c.bf16 %v4153_v30, %v4153_v30 }
 0x215   : > { %3081 = vst.msk [vmem:[%s5448_s23 + $0x50] sm:$0xf] %vm3060_vm8, %v3658_v41  ;;  %v3235_v63 = vsel %vm709_vm3, %v3184_v20, 0.0  ;;  %v3659_v54 = vpack.c.bf16 %v4154_v57, %v4154_v57  ;;  %v3134_v36 = vsel %vm709_vm3, %v4154_v57, 0.0  ;;  %v3185_v19 = vmul.f32 %v4154_v57, %v4154_v57 }
 0x216   : > { %v3236_v3 = vadd.f32 %v3235_v63, %v3234_v40  ;;  %3084 = vst.msk [vmem:[%s5448_s23 + $0x5c] sm:$0xf] %vm3060_vm8, %v3661_v49  ;;  %v3135_v4 = vadd.f32 %v3134_v36, %v3133_v1  ;;  %v3136_v45 = vsel %vm709_vm3, %v4151_v43, 0.0  ;;  %v3187_v24 = vmul.f32 %v4153_v30, %v4153_v30 }
 0x217   : > { %v3987_v16 = vpop.f32.mrb[24].mxu1  ;;  %v4123_v52 = vpop.f32.mrb[24].mxu0  ;;  %3082 = vst.msk [vmem:[%s5448_s23 + $0x54] sm:$0xf] %vm3060_vm8, %v3659_v54  ;;  %v3237_v9 = vsel %vm709_vm3, %v3185_v19, 0.0  ;;  %v3239_v31 = vsel %vm709_vm3, %v3186_v5, 0.0 }
 0x218   : > { %v4155_v11 = vadd.f32 %v4123_v52, %v3987_v16  ;;  %v2011_v21 = vpop.f32.mrb[25].mxu1  ;;  %v2869_v13 = vpop.f32.mrb[25].mxu0  ;;  %v3137_v39 = vadd.f32 %v3136_v45, %v3135_v4  ;;  %v3238_v58 = vadd.f32 %v3237_v9, %v3236_v3  ;;  %v3138_v6 = vsel %vm709_vm3, %v4153_v30, 0.0 }
 0x219   : > { %v4156_v10 = vadd.f32 %v2869_v13, %v2011_v21  ;;  %v3988_v51 = vpop.f32.mrb[26].mxu1  ;;  %v4124_v33 = vpop.f32.mrb[26].mxu0  ;;  %v3241_v29 = vsel %vm709_vm3, %v3187_v24, 0.0 }
 0x21a   : > { %v3664_v42 = vpack.c.bf16 %v4155_v11, %v4155_v11  ;;  %v2014_v15 = vpop.f32.mrb[27].mxu1  ;;  %v2872_v27 = vpop.f32.mrb[27].mxu0  ;;  %v3240_v28 = vadd.f32 %v3239_v31, %v3238_v58  ;;  %v3139_v25 = vadd.f32 %v3138_v6, %v3137_v39  ;;  %v4157_v38 = vadd.f32 %v4124_v33, %v3988_v51 }
 0x21b   : > { %v3662_v7 = vpack.c.bf16 %v4156_v10, %v4156_v10  ;;  %v3140_v60 = vsel %vm709_vm3, %v4156_v10, 0.0  ;;  %v3188_v14 = vmul.f32 %v4156_v10, %v4156_v10  ;;  %v4158_v26 = vadd.f32 %v2872_v27, %v2014_v15 }
 0x21c   : > { %3087 = vst.msk [vmem:[%s5448_s23 + $0x68] sm:$0xf] %vm3060_vm8, %v3664_v42  ;;  %v3190_v47 = vmul.f32 %v4155_v11, %v4155_v11  ;;  %v3141_v32 = vadd.f32 %v3140_v60, %v3139_v25  ;;  %v3242_v18 = vadd.f32 %v3241_v29, %v3240_v28  ;;  %v3665_v43 = vpack.c.bf16 %v4157_v38, %v4157_v38 }
 0x21d   : > { %3085 = vst.msk [vmem:[%s5448_s23 + $0x60] sm:$0xf] %vm3060_vm8, %v3662_v7  ;;  %v3243_v46 = vsel %vm709_vm3, %v3188_v14, 0.0  ;;  %v3663_v55 = vpack.c.bf16 %v4158_v26, %v4158_v26  ;;  %v3142_v12 = vsel %vm709_vm3, %v4158_v26, 0.0  ;;  %v3189_v23 = vmul.f32 %v4158_v26, %v4158_v26 }
 0x21e   : > { %v3244_v48 = vadd.f32 %v3243_v46, %v3242_v18  ;;  %3088 = vst.msk [vmem:[%s5448_s23 + $0x6c] sm:$0xf] %vm3060_vm8, %v3665_v43  ;;  %v3143_v44 = vadd.f32 %v3142_v12, %v3141_v32  ;;  %v3144_v53 = vsel %vm709_vm3, %v4155_v11, 0.0  ;;  %v3191_v17 = vmul.f32 %v4157_v38, %v4157_v38 }
 0x21f   : > { %v3991_v59 = vpop.f32.mrb[28].mxu1  ;;  %v4127_v35 = vpop.f32.mrb[28].mxu0  ;;  %3086 = vst.msk [vmem:[%s5448_s23 + $0x64] sm:$0xf] %vm3060_vm8, %v3663_v55  ;;  %v3245_v8 = vsel %vm709_vm3, %v3189_v23, 0.0  ;;  %v3247_v50 = vsel %vm709_vm3, %v3190_v47, 0.0 }
 0x220   : > { %v4159_v2 = vadd.f32 %v4127_v35, %v3991_v59  ;;  %v2027_v61 = vpop.f32.mrb[29].mxu1  ;;  %v2885_v56 = vpop.f32.mrb[29].mxu0  ;;  %v3145_v20 = vadd.f32 %v3144_v53, %v3143_v44  ;;  %v3246_v0 = vadd.f32 %v3245_v8, %v3244_v48  ;;  %v3146_v62 = vsel %vm709_vm3, %v4157_v38, 0.0 }
 0x221   : > { %v4160_v34 = vadd.f32 %v2885_v56, %v2027_v61  ;;  %v3992_v37 = vpop.f32.mrb[30].mxu1  ;;  %v4128_v41 = vpop.f32.mrb[30].mxu0  ;;  %v3249_v19 = vsel %vm709_vm3, %v3191_v17, 0.0 }
 0x222   : > { %v3668_v22 = vpack.c.bf16 %v4159_v2, %v4159_v2  ;;  %v2030_v30 = vpop.f32.mrb[31].mxu1  ;;  %v2888_v57 = vpop.f32.mrb[31].mxu0  ;;  %v3248_v40 = vadd.f32 %v3247_v50, %v3246_v0  ;;  %v3147_v49 = vadd.f32 %v3146_v62, %v3145_v20  ;;  %v4161_v54 = vadd.f32 %v4128_v41, %v3992_v37 }
 0x223   : > { %v3666_v63 = vpack.c.bf16 %v4160_v34, %v4160_v34  ;;  %v3148_v5 = vsel %vm709_vm3, %v4160_v34, 0.0  ;;  %v3192_v1 = vmul.f32 %v4160_v34, %v4160_v34  ;;  %v4162_v36 = vadd.f32 %v2888_v57, %v2030_v30 }
 0x224   : > { %3091 = vst.msk [vmem:[%s5448_s23 + $0x78] sm:$0xf] %vm3060_vm8, %v3668_v22  ;;  %v3149_v52 = vadd.f32 %v3148_v5, %v3147_v49  ;;  %v3250_v3 = vadd.f32 %v3249_v19, %v3248_v40  ;;  %v3669_v4 = vpack.c.bf16 %v4161_v54, %v4161_v54  ;;  %v3194_v11 = vmul.f32 %v4159_v2, %v4159_v2 }
 0x225   : > { %3089 = vst.msk [vmem:[%s5448_s23 + $0x70] sm:$0xf] %vm3060_vm8, %v3666_v63  ;;  %v3251_v16 = vsel %vm709_vm3, %v3192_v1, 0.0  ;;  %v3667_v21 = vpack.c.bf16 %v4162_v36, %v4162_v36  ;;  %v3150_v13 = vsel %vm709_vm3, %v4162_v36, 0.0  ;;  %v3193_v45 = vmul.f32 %v4162_v36, %v4162_v36 }
 0x226   : > { %v3252_v24 = vadd.f32 %v3251_v16, %v3250_v3  ;;  %3092 = vst.msk [vmem:[%s5448_s23 + $0x7c] sm:$0xf] %vm3060_vm8, %v3669_v4  ;;  %v3151_v9 = vadd.f32 %v3150_v13, %v3149_v52  ;;  %v3152_v10 = vsel %vm709_vm3, %v4159_v2, 0.0  ;;  %v3195_v51 = vmul.f32 %v4161_v54, %v4161_v54 }
 0x227   : > { %3090 = vst.msk [vmem:[%s5448_s23 + $0x74] sm:$0xf] %vm3060_vm8, %v3667_v21  ;;  %v3253_v33 = vsel %vm709_vm3, %v3193_v45, 0.0  ;;  %v3255_v58 = vsel %vm709_vm3, %v3194_v11, 0.0  ;;  %v3154_v42 = vsel %vm709_vm3, %v4161_v54, 0.0 }
 0x228   : > { %v3153_v31 = vadd.f32 %v3152_v10, %v3151_v9  ;;  %v3254_v39 = vadd.f32 %v3253_v33, %v3252_v24  ;;  %v3257_v6 = vsel %vm709_vm3, %v3195_v51, 0.0 }
 0x22a   : > { %v3155_v15 = vadd.f32 %v3154_v42, %v3153_v31  ;;  %v3256_v27 = vadd.f32 %v3255_v58, %v3254_v39 }
 0x22c   : > { %v3156_v7 = vrot.slane %v3155_v15, 4  ;;  %v3258_v60 = vadd.f32 %v3257_v6, %v3256_v27 }
 0x22e   : > { %v3157_v14 = vadd.f32 %v3156_v7, %v3155_v15  ;;  %v3259_v28 = vrot.slane %v3258_v60, 4 }
 0x230   : > { %v3158_v25 = vrot.slane %v3157_v14, 2  ;;  %v3260_v38 = vadd.f32 %v3259_v28, %v3258_v60 }
 0x232   : > { %v3159_v26 = vadd.f32 %v3158_v25, %v3157_v14  ;;  %v3261_v29 = vrot.slane %v3260_v38, 2 }
 0x234   : > { %v3160_v46 = vrot.slane %v3159_v26, 1  ;;  %v3262_v47 = vadd.f32 %v3261_v29, %v3260_v38 }
 0x236   : > { %v3161_v32 = vadd.f32 %v3160_v46, %v3159_v26  ;;  %v3263_v18 = vrot.slane %v3262_v47, 1 }
 0x238   : > { %3163 = vst.msk [vmem:[%s212_s25] sm:$0x1] %vm3162_vm9, %v3161_v32  ;;  %v3264_v43 = vadd.f32 %v3263_v18, %v3262_v47 }
 0x23a   : > { %3265 = vst.msk [vmem:[%s215_s28] sm:$0x1] %vm3162_vm9, %v3264_v43 }
 0x23b PF: > { %s15_s15 = sadd.s32 1, %s4434_s15  }
 0x23c   : > { %p12_p5 = scmp.ge.s32.totalorder %s15_s15, 4  }
 0x23e   :  { %14 = sbr.rel (!%p12_p5) target bundleno = 1 (0x1), region = 90 }

</bundles_post_ra>
